<compile_context>
chip_gen: v6e
topology: v6e:2x2x1
jax: 0.10.0
libtpu: 0.0.40
codegen_flags: <defaults>
</compile_context>

<pallas_src>
import jax
import jax.numpy as jnp
from jax import lax
from jax.experimental import pallas as pl
from jax.experimental.pallas import tpu as pltpu

# ---------------- small sizes consistent with the module structure ----------
B = 2             # batch
C_IN = 3          # RGB input channels
HW_IN = 16        # input spatial size             (224 in the real model)
C_CNN = 32        # CNN backbone feature channels  (1280 in EfficientNet-B0)
H_F = W_F = 8     # CNN feature-map spatial size
C_VIT = 16        # transformer feature channels   (768 in swin_tiny)
S_VIT = 16        # transformer token count
EMB = 32          # embedding_dim                  (512 in the real model)
NUM_CLASSES = 10  # num_classes                    (500 in the real model)
KS = 7            # SpatialAttention conv kernel size
PAD = 3           # SpatialAttention conv padding
HP = H_F + 2 * PAD
WP = W_F + 2 * PAD
OUT_LANES = 128   # lane-dense packed output width ([emb | cls | zero pad])


# ---------------------------------------------------------------------------
# Fused kernel: SpatialAttention + pool + ViT mean + fusion head + classifier
# ---------------------------------------------------------------------------
def hybrid_fused_kernel(xpad_ref, w_ref, vit_ref, w1a_ref, w1b_ref, b1_ref,
                        wbig_ref, bbig_ref, out_ref):
    # ------------- SpatialAttention: 7x7 C->1 conv, pad pre-applied ----------
    # 49 taps stream from the VMEM ref (bounded vreg pressure); the weighted
    # tensor accumulates on the VPU and a SINGLE channel reduction (one XLU
    # pass) produces the conv output.
    def kh_body(kh, acc):
        for kw in range(KS):                                 # inner taps unrolled
            tap = xpad_ref[pl.ds(kh, H_F), kw:kw + W_F, :]   # (H_F, W_F, C_CNN)
            acc = acc + tap * w_ref[kh * KS + kw]            # contiguous row read
        return acc

    acc3 = lax.fori_loop(0, KS, kh_body,
                         jnp.zeros((H_F, W_F, C_CNN), jnp.float32),
                         unroll=True)
    attn = jax.nn.sigmoid(jnp.sum(acc3, axis=-1, keepdims=True))   # (H_F, W_F, 1)

    # ---- adaptive_avg_pool2d(x*attn,(1,1)): sum here; 1/(H*W) folded in w1a --
    # NOTE: C_CNN=32 underfills the 128 lanes at toy size; at the real
    # C_CNN=1280 this channels-last layout is naturally lane-dense.
    x = xpad_ref[PAD:PAD + H_F, PAD:PAD + W_F, :]
    cnn_sum = jnp.sum(x * attn, axis=(0, 1)).reshape(1, C_CNN)     # (1, C_CNN)

    # ---- ViT token mean: sum here; 1/S_VIT folded into w1b ------------------
    vit_sum = jnp.sum(vit_ref[...], axis=0, keepdims=True)         # (1, C_VIT)

    # ---- fusion + fc head + classifier --------------------------------------
    # torch.cat([cnn, vit], 1) @ W1  ==  cnn @ W1[:C_CNN] + vit @ W1[C_CNN:]
    # TODO(synk): at real sizes (1280/768 -> 512 -> 500) cast MXU operands to
    # bf16 (f32 accumulation); kept f32 here to match the f32 reference 1e-4.
    h = (jnp.dot(cnn_sum, w1a_ref[...], preferred_element_type=jnp.float32)
         + jnp.dot(vit_sum, w1b_ref[...], preferred_element_type=jnp.float32)
         + b1_ref[...])
    h = jnp.maximum(h, 0.0)                                         # ReLU
    # Dropout(0.5) is identity in eval mode.
    # TODO(synk): training-mode dropout (random mask * 2.0) not implemented.
    # fc[3] and the classifier are folded into ONE packed matmul:
    # [embedding | classification | zero pad] = h @ W_big + b_big.
    out_ref[...] = (jnp.dot(h, wbig_ref[...], preferred_element_type=jnp.float32)
                    + bbig_ref[...])


def fused_forward_pallas(cnn_feat_nhwc, vit_feats, params):
    """cnn_feat_nhwc: (B, H_F, W_F, C_CNN); vit_feats: (B, S_VIT, C_VIT)."""
    f32 = jnp.float32
    zcols = OUT_LANES - EMB - NUM_CLASSES

    # Classifier folded into fc[3] (constant-folded under jit):
    #   emb = h @ W2 + b2 ; cls = emb @ Wc + bc
    #   => [emb | cls | 0] = h @ [W2 | W2@Wc | 0] + [b2 | b2@Wc + bc | 0]
    wbig = jnp.concatenate(
        [params["w2"], params["w2"] @ params["wc"],
         jnp.zeros((EMB, zcols), f32)], axis=1)                     # (EMB, 128)
    bbig = jnp.concatenate(
        [params["b2"], params["b2"] @ params["wc"] + params["bc"],
         jnp.zeros((1, zcols), f32)], axis=1)                       # (1, 128)

    # Pooling scales folded into the fc[0] weight halves.
    w1a_s = params["w1a"] * (1.0 / float(H_F * W_F))
    w1b_s = params["w1b"] * (1.0 / float(S_VIT))

    # Flattened SpatialAttention conv weight: each tap = one contiguous row.
    w2d = params["attn_w"].reshape(KS * KS, C_CNN)

    # Zero-pad once in the wrapper (fuses with the stem epilogue); avoids any
    # per-step scratch zeroing inside the kernel.
    xpad = jnp.pad(cnn_feat_nhwc, ((0, 0), (PAD, PAD), (PAD, PAD), (0, 0)))

    const2 = lambda b: (0, 0)

    packed = pl.pallas_call(
        hybrid_fused_kernel,
        out_shape=jax.ShapeDtypeStruct((B, 1, OUT_LANES), jnp.float32),
        grid=(B,),
        in_specs=[
            # Per-sample blocks (batch dim squeezed out of the kernel refs).
            pl.BlockSpec((None, HP, WP, C_CNN), lambda b: (b, 0, 0, 0)),
            pl.BlockSpec((KS * KS, C_CNN), const2),
            pl.BlockSpec((None, S_VIT, C_VIT), lambda b: (b, 0, 0)),
            # Weight/bias blocks use constant index maps -> DMA'd once.
            # TODO(synk): at real sizes on v7x (64 MiB VMEM) mark these with
            # pipeline_mode=pl.Buffered(1) and set vmem_limit_bytes explicitly.
            pl.BlockSpec((C_CNN, EMB), const2),
            pl.BlockSpec((C_VIT, EMB), const2),
            pl.BlockSpec((1, EMB), const2),
            pl.BlockSpec((EMB, OUT_LANES), const2),
            pl.BlockSpec((1, OUT_LANES), const2),
        ],
        out_specs=pl.BlockSpec((None, 1, OUT_LANES), lambda b: (b, 0, 0)),
        # Batch axis is parallel: one sample per TensorCore on v7x; a cheap
        # 2-step serial loop on single-TC v5e/v6e.
        compiler_params=pltpu.CompilerParams(dimension_semantics=("parallel",)),
    )(xpad, w2d, vit_feats, w1a_s, w1b_s, params["b1"], wbig, bbig)

    packed = packed.reshape(B, OUT_LANES)
    return packed[:, :EMB], packed[:, EMB:EMB + NUM_CLASSES]


# ---------------------------------------------------------------------------
# Backbone stand-ins (plain JAX glue)
# ---------------------------------------------------------------------------
def cnn_backbone_standin(x_nchw, stem_w_hwio, stem_b):
    # TODO(synk): pretrained EfficientNet-B0 feature extractor replaced by a
    # single 3x3 stride-2 conv + ReLU stand-in.  Emits NHWC directly so no
    # transpose / extra HBM pass is needed before the fused kernel.
    y = lax.conv_general_dilated(x_nchw, stem_w_hwio, window_strides=(2, 2),
                                 padding=((1, 1), (1, 1)),
                                 dimension_numbers=("NCHW", "HWIO", "NHWC"))
    return jax.nn.relu(y + stem_b[None, None, None, :])


def vit_backbone_standin(x_nchw, patch_w, patch_b):
    # TODO(synk): pretrained swin_tiny_patch4_window7_224.forward_features
    # replaced by a 4x4 patch-embedding linear projection -> (B, S_VIT, C_VIT).
    patch = 4
    b, c, h, w = x_nchw.shape
    p = x_nchw.reshape(b, c, h // patch, patch, w // patch, patch)
    p = p.transpose(0, 2, 4, 1, 3, 5).reshape(b, (h // patch) * (w // patch),
                                              c * patch * patch)
    return p @ patch_w + patch_b


# ---------------------------------------------------------------------------
# Full forward
# ---------------------------------------------------------------------------
@jax.jit
def hybrid_forward(x_nchw, params):
    cnn_feat_nhwc = cnn_backbone_standin(x_nchw, params["stem_w"], params["stem_b"])
    vit_feats = vit_backbone_standin(x_nchw, params["patch_w"], params["patch_b"])
    emb, cls = fused_forward_pallas(cnn_feat_nhwc, vit_feats, params)
    return {"embedding": emb, "classification": cls}


def reference_forward(x_nchw, params):
    """Pure-JAX reference mirroring the PyTorch forward, for verification."""
    cnn_nhwc = cnn_backbone_standin(x_nchw, params["stem_w"], params["stem_b"])
    cnn_nchw = jnp.transpose(cnn_nhwc, (0, 3, 1, 2))
    w_oihw = jnp.transpose(params["attn_w"], (2, 0, 1))[None]       # (1, C, 7, 7)
    attn = jax.nn.sigmoid(lax.conv_general_dilated(
        cnn_nchw, w_oihw, (1, 1), ((PAD, PAD), (PAD, PAD)),
        dimension_numbers=("NCHW", "OIHW", "NCHW")))
    cnn_pooled = (cnn_nchw * attn).mean(axis=(2, 3))
    vit = vit_backbone_standin(x_nchw, params["patch_w"], params["patch_b"])
    vit_pooled = vit.mean(axis=1)
    fused = jnp.concatenate([cnn_pooled, vit_pooled], axis=1)
    w1 = jnp.concatenate([params["w1a"], params["w1b"]], axis=0)
    h = jax.nn.relu(fused @ w1 + params["b1"])
    emb = h @ params["w2"] + params["b2"]
    cls = emb @ params["wc"] + params["bc"]
    return emb, cls


def init_params(key):
    ks = jax.random.split(key, 9)
    n = lambda k, s, scale: (scale * jax.random.normal(k, s)).astype(jnp.float32)
    return {
        "stem_w": n(ks[0], (3, 3, C_IN, C_CNN), 0.2),   # HWIO stem conv
        "stem_b": n(ks[1], (C_CNN,), 0.1),
        "attn_w": n(ks[2], (KS, KS, C_CNN), 0.05),      # SpatialAttention conv (1,C,7,7)
        "patch_w": n(ks[3], (C_IN * 16, C_VIT), 0.1),
        "patch_b": n(ks[4], (C_VIT,), 0.1),
        "w1a": n(ks[5], (C_CNN, EMB), 0.1),             # fc[0] weight, CNN half
        "w1b": n(ks[6], (C_VIT, EMB), 0.1),             # fc[0] weight, ViT half
        "b1": jnp.zeros((1, EMB), jnp.float32),
        "w2": n(ks[7], (EMB, EMB), 0.1),                # fc[3]
        "b2": jnp.zeros((1, EMB), jnp.float32),
        "wc": n(ks[8], (EMB, NUM_CLASSES), 0.1),        # classifier
        "bc": jnp.zeros((1, NUM_CLASSES), jnp.float32),
    }


if __name__ == "__main__":
    key = jax.random.PRNGKey(0)
    x = jax.random.normal(key, (B, C_IN, HW_IN, HW_IN), dtype=jnp.float32)  # NCHW, like PyTorch
    params = init_params(jax.random.PRNGKey(1))

    out = hybrid_forward(x, params)
    out = jax.block_until_ready(out)

    emb_ref, cls_ref = reference_forward(x, params)
    assert out["embedding"].shape == (B, EMB)
    assert out["classification"].shape == (B, NUM_CLASSES)
    assert jnp.allclose(out["embedding"], emb_ref, atol=1e-4, rtol=1e-4)
    assert jnp.allclose(out["classification"], cls_ref, atol=1e-4, rtol=1e-4)

    print("KERNEL_OK")
</pallas_src>

<mosaic_0001>
module attributes {stable_mosaic.version = 11 : i64} {
  func.func @hybrid_fused_kernel(%arg0: i32, %arg1: memref<1x14x14x32xf32, #tpu.memory_space<vmem>>, %arg2: memref<49x32xf32, #tpu.memory_space<vmem>>, %arg3: memref<1x16x16xf32, #tpu.memory_space<vmem>>, %arg4: memref<32x32xf32, #tpu.memory_space<vmem>>, %arg5: memref<16x32xf32, #tpu.memory_space<vmem>>, %arg6: memref<1x32xf32, #tpu.memory_space<vmem>>, %arg7: memref<32x128xf32, #tpu.memory_space<vmem>>, %arg8: memref<1x128xf32, #tpu.memory_space<vmem>>, %arg9: memref<1x1x128xf32, #tpu.memory_space<vmem>>) attributes {dimension_semantics = [#tpu.dimension_semantics<parallel>], iteration_bounds = array<i64: 2>, scalar_prefetch = 0 : i64, scratch_operands = 0 : i64, tpu.core_type = #tpu.core_type<tc>, window_params = [{transform_indices = @transform_0, window_bounds = array<i64: 1, 14, 14, 32>}, {pipeline_mode = #tpu.pipeline_mode<synchronous>, transform_indices = @transform_1, window_bounds = array<i64: 49, 32>}, {transform_indices = @transform_2, window_bounds = array<i64: 1, 16, 16>}, {pipeline_mode = #tpu.pipeline_mode<synchronous>, transform_indices = @transform_3, window_bounds = array<i64: 32, 32>}, {pipeline_mode = #tpu.pipeline_mode<synchronous>, transform_indices = @transform_4, window_bounds = array<i64: 16, 32>}, {pipeline_mode = #tpu.pipeline_mode<synchronous>, transform_indices = @transform_5, window_bounds = array<i64: 1, 32>}, {pipeline_mode = #tpu.pipeline_mode<synchronous>, transform_indices = @transform_6, window_bounds = array<i64: 32, 128>}, {pipeline_mode = #tpu.pipeline_mode<synchronous>, transform_indices = @transform_7, window_bounds = array<i64: 1, 128>}, {transform_indices = @transform_8, window_bounds = array<i64: 1, 1, 128>}]} {
    %cst = arith.constant 0.000000e+00 : f32
    %0 = vector.broadcast %cst : f32 to vector<8x8x32xf32>
    %c0_i32 = arith.constant 0 : i32
    %c0 = arith.constant 0 : index
    %1 = arith.index_cast %c0_i32 : i32 to index
    %c0_0 = arith.constant 0 : index
    %c0_1 = arith.constant 0 : index
    %2 = vector.load %arg1[%c0, %1, %c0_0, %c0_1] : memref<1x14x14x32xf32, #tpu.memory_space<vmem>>, vector<1x8x8x32xf32>
    %3 = vector.shape_cast %2 : vector<1x8x8x32xf32> to vector<8x8x32xf32>
    %c7_i32 = arith.constant 7 : i32
    %4 = arith.muli %c0_i32, %c7_i32 : i32
    %c0_i32_2 = arith.constant 0 : i32
    %5 = arith.addi %4, %c0_i32_2 : i32
    %6 = arith.index_cast %5 : i32 to index
    %c0_3 = arith.constant 0 : index
    %7 = vector.load %arg2[%6, %c0_3] : memref<49x32xf32, #tpu.memory_space<vmem>>, vector<1x32xf32>
    %8 = vector.shape_cast %7 : vector<1x32xf32> to vector<32xf32>
    %9 = vector.shape_cast %8 : vector<32xf32> to vector<1x1x32xf32>
    %10 = vector.broadcast %9 : vector<1x1x32xf32> to vector<8x8x32xf32>
    %11 = arith.mulf %3, %10 : vector<8x8x32xf32>
    %12 = arith.addf %0, %11 : vector<8x8x32xf32>
    %c0_4 = arith.constant 0 : index
    %13 = arith.index_cast %c0_i32 : i32 to index
    %c1 = arith.constant 1 : index
    %c0_5 = arith.constant 0 : index
    %14 = vector.load %arg1[%c0_4, %13, %c1, %c0_5] : memref<1x14x14x32xf32, #tpu.memory_space<vmem>>, vector<1x8x8x32xf32>
    %15 = vector.shape_cast %14 : vector<1x8x8x32xf32> to vector<8x8x32xf32>
    %c7_i32_6 = arith.constant 7 : i32
    %16 = arith.muli %c0_i32, %c7_i32_6 : i32
    %c1_i32 = arith.constant 1 : i32
    %17 = arith.addi %16, %c1_i32 : i32
    %18 = arith.index_cast %17 : i32 to index
    %c0_7 = arith.constant 0 : index
    %19 = vector.load %arg2[%18, %c0_7] : memref<49x32xf32, #tpu.memory_space<vmem>>, vector<1x32xf32>
    %20 = vector.shape_cast %19 : vector<1x32xf32> to vector<32xf32>
    %21 = vector.shape_cast %20 : vector<32xf32> to vector<1x1x32xf32>
    %22 = vector.broadcast %21 : vector<1x1x32xf32> to vector<8x8x32xf32>
    %23 = arith.mulf %15, %22 : vector<8x8x32xf32>
    %24 = arith.addf %12, %23 : vector<8x8x32xf32>
    %c0_8 = arith.constant 0 : index
    %25 = arith.index_cast %c0_i32 : i32 to index
    %c2 = arith.constant 2 : index
    %c0_9 = arith.constant 0 : index
    %26 = vector.load %arg1[%c0_8, %25, %c2, %c0_9] : memref<1x14x14x32xf32, #tpu.memory_space<vmem>>, vector<1x8x8x32xf32>
    %27 = vector.shape_cast %26 : vector<1x8x8x32xf32> to vector<8x8x32xf32>
    %c7_i32_10 = arith.constant 7 : i32
    %28 = arith.muli %c0_i32, %c7_i32_10 : i32
    %c2_i32 = arith.constant 2 : i32
    %29 = arith.addi %28, %c2_i32 : i32
    %30 = arith.index_cast %29 : i32 to index
    %c0_11 = arith.constant 0 : index
    %31 = vector.load %arg2[%30, %c0_11] : memref<49x32xf32, #tpu.memory_space<vmem>>, vector<1x32xf32>
    %32 = vector.shape_cast %31 : vector<1x32xf32> to vector<32xf32>
    %33 = vector.shape_cast %32 : vector<32xf32> to vector<1x1x32xf32>
    %34 = vector.broadcast %33 : vector<1x1x32xf32> to vector<8x8x32xf32>
    %35 = arith.mulf %27, %34 : vector<8x8x32xf32>
    %36 = arith.addf %24, %35 : vector<8x8x32xf32>
    %c0_12 = arith.constant 0 : index
    %37 = arith.index_cast %c0_i32 : i32 to index
    %c3 = arith.constant 3 : index
    %c0_13 = arith.constant 0 : index
    %38 = vector.load %arg1[%c0_12, %37, %c3, %c0_13] : memref<1x14x14x32xf32, #tpu.memory_space<vmem>>, vector<1x8x8x32xf32>
    %39 = vector.shape_cast %38 : vector<1x8x8x32xf32> to vector<8x8x32xf32>
    %c7_i32_14 = arith.constant 7 : i32
    %40 = arith.muli %c0_i32, %c7_i32_14 : i32
    %c3_i32 = arith.constant 3 : i32
    %41 = arith.addi %40, %c3_i32 : i32
    %42 = arith.index_cast %41 : i32 to index
    %c0_15 = arith.constant 0 : index
    %43 = vector.load %arg2[%42, %c0_15] : memref<49x32xf32, #tpu.memory_space<vmem>>, vector<1x32xf32>
    %44 = vector.shape_cast %43 : vector<1x32xf32> to vector<32xf32>
    %45 = vector.shape_cast %44 : vector<32xf32> to vector<1x1x32xf32>
    %46 = vector.broadcast %45 : vector<1x1x32xf32> to vector<8x8x32xf32>
    %47 = arith.mulf %39, %46 : vector<8x8x32xf32>
    %48 = arith.addf %36, %47 : vector<8x8x32xf32>
    %c0_16 = arith.constant 0 : index
    %49 = arith.index_cast %c0_i32 : i32 to index
    %c4 = arith.constant 4 : index
    %c0_17 = arith.constant 0 : index
    %50 = vector.load %arg1[%c0_16, %49, %c4, %c0_17] : memref<1x14x14x32xf32, #tpu.memory_space<vmem>>, vector<1x8x8x32xf32>
    %51 = vector.shape_cast %50 : vector<1x8x8x32xf32> to vector<8x8x32xf32>
    %c7_i32_18 = arith.constant 7 : i32
    %52 = arith.muli %c0_i32, %c7_i32_18 : i32
    %c4_i32 = arith.constant 4 : i32
    %53 = arith.addi %52, %c4_i32 : i32
    %54 = arith.index_cast %53 : i32 to index
    %c0_19 = arith.constant 0 : index
    %55 = vector.load %arg2[%54, %c0_19] : memref<49x32xf32, #tpu.memory_space<vmem>>, vector<1x32xf32>
    %56 = vector.shape_cast %55 : vector<1x32xf32> to vector<32xf32>
    %57 = vector.shape_cast %56 : vector<32xf32> to vector<1x1x32xf32>
    %58 = vector.broadcast %57 : vector<1x1x32xf32> to vector<8x8x32xf32>
    %59 = arith.mulf %51, %58 : vector<8x8x32xf32>
    %60 = arith.addf %48, %59 : vector<8x8x32xf32>
    %c0_20 = arith.constant 0 : index
    %61 = arith.index_cast %c0_i32 : i32 to index
    %c5 = arith.constant 5 : index
    %c0_21 = arith.constant 0 : index
    %62 = vector.load %arg1[%c0_20, %61, %c5, %c0_21] : memref<1x14x14x32xf32, #tpu.memory_space<vmem>>, vector<1x8x8x32xf32>
    %63 = vector.shape_cast %62 : vector<1x8x8x32xf32> to vector<8x8x32xf32>
    %c7_i32_22 = arith.constant 7 : i32
    %64 = arith.muli %c0_i32, %c7_i32_22 : i32
    %c5_i32 = arith.constant 5 : i32
    %65 = arith.addi %64, %c5_i32 : i32
    %66 = arith.index_cast %65 : i32 to index
    %c0_23 = arith.constant 0 : index
    %67 = vector.load %arg2[%66, %c0_23] : memref<49x32xf32, #tpu.memory_space<vmem>>, vector<1x32xf32>
    %68 = vector.shape_cast %67 : vector<1x32xf32> to vector<32xf32>
    %69 = vector.shape_cast %68 : vector<32xf32> to vector<1x1x32xf32>
    %70 = vector.broadcast %69 : vector<1x1x32xf32> to vector<8x8x32xf32>
    %71 = arith.mulf %63, %70 : vector<8x8x32xf32>
    %72 = arith.addf %60, %71 : vector<8x8x32xf32>
    %c0_24 = arith.constant 0 : index
    %73 = arith.index_cast %c0_i32 : i32 to index
    %c6 = arith.constant 6 : index
    %c0_25 = arith.constant 0 : index
    %74 = vector.load %arg1[%c0_24, %73, %c6, %c0_25] : memref<1x14x14x32xf32, #tpu.memory_space<vmem>>, vector<1x8x8x32xf32>
    %75 = vector.shape_cast %74 : vector<1x8x8x32xf32> to vector<8x8x32xf32>
    %c7_i32_26 = arith.constant 7 : i32
    %76 = arith.muli %c0_i32, %c7_i32_26 : i32
    %c6_i32 = arith.constant 6 : i32
    %77 = arith.addi %76, %c6_i32 : i32
    %78 = arith.index_cast %77 : i32 to index
    %c0_27 = arith.constant 0 : index
    %79 = vector.load %arg2[%78, %c0_27] : memref<49x32xf32, #tpu.memory_space<vmem>>, vector<1x32xf32>
    %80 = vector.shape_cast %79 : vector<1x32xf32> to vector<32xf32>
    %81 = vector.shape_cast %80 : vector<32xf32> to vector<1x1x32xf32>
    %82 = vector.broadcast %81 : vector<1x1x32xf32> to vector<8x8x32xf32>
    %83 = arith.mulf %75, %82 : vector<8x8x32xf32>
    %84 = arith.addf %72, %83 : vector<8x8x32xf32>
    %c1_i32_28 = arith.constant 1 : i32
    %c0_29 = arith.constant 0 : index
    %85 = arith.index_cast %c1_i32_28 : i32 to index
    %c0_30 = arith.constant 0 : index
    %c0_31 = arith.constant 0 : index
    %86 = vector.load %arg1[%c0_29, %85, %c0_30, %c0_31] : memref<1x14x14x32xf32, #tpu.memory_space<vmem>>, vector<1x8x8x32xf32>
    %87 = vector.shape_cast %86 : vector<1x8x8x32xf32> to vector<8x8x32xf32>
    %c7_i32_32 = arith.constant 7 : i32
    %88 = arith.muli %c1_i32_28, %c7_i32_32 : i32
    %c0_i32_33 = arith.constant 0 : i32
    %89 = arith.addi %88, %c0_i32_33 : i32
    %90 = arith.index_cast %89 : i32 to index
    %c0_34 = arith.constant 0 : index
    %91 = vector.load %arg2[%90, %c0_34] : memref<49x32xf32, #tpu.memory_space<vmem>>, vector<1x32xf32>
    %92 = vector.shape_cast %91 : vector<1x32xf32> to vector<32xf32>
    %93 = vector.shape_cast %92 : vector<32xf32> to vector<1x1x32xf32>
    %94 = vector.broadcast %93 : vector<1x1x32xf32> to vector<8x8x32xf32>
    %95 = arith.mulf %87, %94 : vector<8x8x32xf32>
    %96 = arith.addf %84, %95 : vector<8x8x32xf32>
    %c0_35 = arith.constant 0 : index
    %97 = arith.index_cast %c1_i32_28 : i32 to index
    %c1_36 = arith.constant 1 : index
    %c0_37 = arith.constant 0 : index
    %98 = vector.load %arg1[%c0_35, %97, %c1_36, %c0_37] : memref<1x14x14x32xf32, #tpu.memory_space<vmem>>, vector<1x8x8x32xf32>
    %99 = vector.shape_cast %98 : vector<1x8x8x32xf32> to vector<8x8x32xf32>
    %c7_i32_38 = arith.constant 7 : i32
    %100 = arith.muli %c1_i32_28, %c7_i32_38 : i32
    %c1_i32_39 = arith.constant 1 : i32
    %101 = arith.addi %100, %c1_i32_39 : i32
    %102 = arith.index_cast %101 : i32 to index
    %c0_40 = arith.constant 0 : index
    %103 = vector.load %arg2[%102, %c0_40] : memref<49x32xf32, #tpu.memory_space<vmem>>, vector<1x32xf32>
    %104 = vector.shape_cast %103 : vector<1x32xf32> to vector<32xf32>
    %105 = vector.shape_cast %104 : vector<32xf32> to vector<1x1x32xf32>
    %106 = vector.broadcast %105 : vector<1x1x32xf32> to vector<8x8x32xf32>
    %107 = arith.mulf %99, %106 : vector<8x8x32xf32>
    %108 = arith.addf %96, %107 : vector<8x8x32xf32>
    %c0_41 = arith.constant 0 : index
    %109 = arith.index_cast %c1_i32_28 : i32 to index
    %c2_42 = arith.constant 2 : index
    %c0_43 = arith.constant 0 : index
    %110 = vector.load %arg1[%c0_41, %109, %c2_42, %c0_43] : memref<1x14x14x32xf32, #tpu.memory_space<vmem>>, vector<1x8x8x32xf32>
    %111 = vector.shape_cast %110 : vector<1x8x8x32xf32> to vector<8x8x32xf32>
    %c7_i32_44 = arith.constant 7 : i32
    %112 = arith.muli %c1_i32_28, %c7_i32_44 : i32
    %c2_i32_45 = arith.constant 2 : i32
    %113 = arith.addi %112, %c2_i32_45 : i32
    %114 = arith.index_cast %113 : i32 to index
    %c0_46 = arith.constant 0 : index
    %115 = vector.load %arg2[%114, %c0_46] : memref<49x32xf32, #tpu.memory_space<vmem>>, vector<1x32xf32>
    %116 = vector.shape_cast %115 : vector<1x32xf32> to vector<32xf32>
    %117 = vector.shape_cast %116 : vector<32xf32> to vector<1x1x32xf32>
    %118 = vector.broadcast %117 : vector<1x1x32xf32> to vector<8x8x32xf32>
    %119 = arith.mulf %111, %118 : vector<8x8x32xf32>
    %120 = arith.addf %108, %119 : vector<8x8x32xf32>
    %c0_47 = arith.constant 0 : index
    %121 = arith.index_cast %c1_i32_28 : i32 to index
    %c3_48 = arith.constant 3 : index
    %c0_49 = arith.constant 0 : index
    %122 = vector.load %arg1[%c0_47, %121, %c3_48, %c0_49] : memref<1x14x14x32xf32, #tpu.memory_space<vmem>>, vector<1x8x8x32xf32>
    %123 = vector.shape_cast %122 : vector<1x8x8x32xf32> to vector<8x8x32xf32>
    %c7_i32_50 = arith.constant 7 : i32
    %124 = arith.muli %c1_i32_28, %c7_i32_50 : i32
    %c3_i32_51 = arith.constant 3 : i32
    %125 = arith.addi %124, %c3_i32_51 : i32
    %126 = arith.index_cast %125 : i32 to index
    %c0_52 = arith.constant 0 : index
    %127 = vector.load %arg2[%126, %c0_52] : memref<49x32xf32, #tpu.memory_space<vmem>>, vector<1x32xf32>
    %128 = vector.shape_cast %127 : vector<1x32xf32> to vector<32xf32>
    %129 = vector.shape_cast %128 : vector<32xf32> to vector<1x1x32xf32>
    %130 = vector.broadcast %129 : vector<1x1x32xf32> to vector<8x8x32xf32>
    %131 = arith.mulf %123, %130 : vector<8x8x32xf32>
    %132 = arith.addf %120, %131 : vector<8x8x32xf32>
    %c0_53 = arith.constant 0 : index
    %133 = arith.index_cast %c1_i32_28 : i32 to index
    %c4_54 = arith.constant 4 : index
    %c0_55 = arith.constant 0 : index
    %134 = vector.load %arg1[%c0_53, %133, %c4_54, %c0_55] : memref<1x14x14x32xf32, #tpu.memory_space<vmem>>, vector<1x8x8x32xf32>
    %135 = vector.shape_cast %134 : vector<1x8x8x32xf32> to vector<8x8x32xf32>
    %c7_i32_56 = arith.constant 7 : i32
    %136 = arith.muli %c1_i32_28, %c7_i32_56 : i32
    %c4_i32_57 = arith.constant 4 : i32
    %137 = arith.addi %136, %c4_i32_57 : i32
    %138 = arith.index_cast %137 : i32 to index
    %c0_58 = arith.constant 0 : index
    %139 = vector.load %arg2[%138, %c0_58] : memref<49x32xf32, #tpu.memory_space<vmem>>, vector<1x32xf32>
    %140 = vector.shape_cast %139 : vector<1x32xf32> to vector<32xf32>
    %141 = vector.shape_cast %140 : vector<32xf32> to vector<1x1x32xf32>
    %142 = vector.broadcast %141 : vector<1x1x32xf32> to vector<8x8x32xf32>
    %143 = arith.mulf %135, %142 : vector<8x8x32xf32>
    %144 = arith.addf %132, %143 : vector<8x8x32xf32>
    %c0_59 = arith.constant 0 : index
    %145 = arith.index_cast %c1_i32_28 : i32 to index
    %c5_60 = arith.constant 5 : index
    %c0_61 = arith.constant 0 : index
    %146 = vector.load %arg1[%c0_59, %145, %c5_60, %c0_61] : memref<1x14x14x32xf32, #tpu.memory_space<vmem>>, vector<1x8x8x32xf32>
    %147 = vector.shape_cast %146 : vector<1x8x8x32xf32> to vector<8x8x32xf32>
    %c7_i32_62 = arith.constant 7 : i32
    %148 = arith.muli %c1_i32_28, %c7_i32_62 : i32
    %c5_i32_63 = arith.constant 5 : i32
    %149 = arith.addi %148, %c5_i32_63 : i32
    %150 = arith.index_cast %149 : i32 to index
    %c0_64 = arith.constant 0 : index
    %151 = vector.load %arg2[%150, %c0_64] : memref<49x32xf32, #tpu.memory_space<vmem>>, vector<1x32xf32>
    %152 = vector.shape_cast %151 : vector<1x32xf32> to vector<32xf32>
    %153 = vector.shape_cast %152 : vector<32xf32> to vector<1x1x32xf32>
    %154 = vector.broadcast %153 : vector<1x1x32xf32> to vector<8x8x32xf32>
    %155 = arith.mulf %147, %154 : vector<8x8x32xf32>
    %156 = arith.addf %144, %155 : vector<8x8x32xf32>
    %c0_65 = arith.constant 0 : index
    %157 = arith.index_cast %c1_i32_28 : i32 to index
    %c6_66 = arith.constant 6 : index
    %c0_67 = arith.constant 0 : index
    %158 = vector.load %arg1[%c0_65, %157, %c6_66, %c0_67] : memref<1x14x14x32xf32, #tpu.memory_space<vmem>>, vector<1x8x8x32xf32>
    %159 = vector.shape_cast %158 : vector<1x8x8x32xf32> to vector<8x8x32xf32>
    %c7_i32_68 = arith.constant 7 : i32
    %160 = arith.muli %c1_i32_28, %c7_i32_68 : i32
    %c6_i32_69 = arith.constant 6 : i32
    %161 = arith.addi %160, %c6_i32_69 : i32
    %162 = arith.index_cast %161 : i32 to index
    %c0_70 = arith.constant 0 : index
    %163 = vector.load %arg2[%162, %c0_70] : memref<49x32xf32, #tpu.memory_space<vmem>>, vector<1x32xf32>
    %164 = vector.shape_cast %163 : vector<1x32xf32> to vector<32xf32>
    %165 = vector.shape_cast %164 : vector<32xf32> to vector<1x1x32xf32>
    %166 = vector.broadcast %165 : vector<1x1x32xf32> to vector<8x8x32xf32>
    %167 = arith.mulf %159, %166 : vector<8x8x32xf32>
    %168 = arith.addf %156, %167 : vector<8x8x32xf32>
    %c2_i32_71 = arith.constant 2 : i32
    %c0_72 = arith.constant 0 : index
    %169 = arith.index_cast %c2_i32_71 : i32 to index
    %c0_73 = arith.constant 0 : index
    %c0_74 = arith.constant 0 : index
    %170 = vector.load %arg1[%c0_72, %169, %c0_73, %c0_74] : memref<1x14x14x32xf32, #tpu.memory_space<vmem>>, vector<1x8x8x32xf32>
    %171 = vector.shape_cast %170 : vector<1x8x8x32xf32> to vector<8x8x32xf32>
    %c7_i32_75 = arith.constant 7 : i32
    %172 = arith.muli %c2_i32_71, %c7_i32_75 : i32
    %c0_i32_76 = arith.constant 0 : i32
    %173 = arith.addi %172, %c0_i32_76 : i32
    %174 = arith.index_cast %173 : i32 to index
    %c0_77 = arith.constant 0 : index
    %175 = vector.load %arg2[%174, %c0_77] : memref<49x32xf32, #tpu.memory_space<vmem>>, vector<1x32xf32>
    %176 = vector.shape_cast %175 : vector<1x32xf32> to vector<32xf32>
    %177 = vector.shape_cast %176 : vector<32xf32> to vector<1x1x32xf32>
    %178 = vector.broadcast %177 : vector<1x1x32xf32> to vector<8x8x32xf32>
    %179 = arith.mulf %171, %178 : vector<8x8x32xf32>
    %180 = arith.addf %168, %179 : vector<8x8x32xf32>
    %c0_78 = arith.constant 0 : index
    %181 = arith.index_cast %c2_i32_71 : i32 to index
    %c1_79 = arith.constant 1 : index
    %c0_80 = arith.constant 0 : index
    %182 = vector.load %arg1[%c0_78, %181, %c1_79, %c0_80] : memref<1x14x14x32xf32, #tpu.memory_space<vmem>>, vector<1x8x8x32xf32>
    %183 = vector.shape_cast %182 : vector<1x8x8x32xf32> to vector<8x8x32xf32>
    %c7_i32_81 = arith.constant 7 : i32
    %184 = arith.muli %c2_i32_71, %c7_i32_81 : i32
    %c1_i32_82 = arith.constant 1 : i32
    %185 = arith.addi %184, %c1_i32_82 : i32
    %186 = arith.index_cast %185 : i32 to index
    %c0_83 = arith.constant 0 : index
    %187 = vector.load %arg2[%186, %c0_83] : memref<49x32xf32, #tpu.memory_space<vmem>>, vector<1x32xf32>
    %188 = vector.shape_cast %187 : vector<1x32xf32> to vector<32xf32>
    %189 = vector.shape_cast %188 : vector<32xf32> to vector<1x1x32xf32>
    %190 = vector.broadcast %189 : vector<1x1x32xf32> to vector<8x8x32xf32>
    %191 = arith.mulf %183, %190 : vector<8x8x32xf32>
    %192 = arith.addf %180, %191 : vector<8x8x32xf32>
    %c0_84 = arith.constant 0 : index
    %193 = arith.index_cast %c2_i32_71 : i32 to index
    %c2_85 = arith.constant 2 : index
    %c0_86 = arith.constant 0 : index
    %194 = vector.load %arg1[%c0_84, %193, %c2_85, %c0_86] : memref<1x14x14x32xf32, #tpu.memory_space<vmem>>, vector<1x8x8x32xf32>
    %195 = vector.shape_cast %194 : vector<1x8x8x32xf32> to vector<8x8x32xf32>
    %c7_i32_87 = arith.constant 7 : i32
    %196 = arith.muli %c2_i32_71, %c7_i32_87 : i32
    %c2_i32_88 = arith.constant 2 : i32
    %197 = arith.addi %196, %c2_i32_88 : i32
    %198 = arith.index_cast %197 : i32 to index
    %c0_89 = arith.constant 0 : index
    %199 = vector.load %arg2[%198, %c0_89] : memref<49x32xf32, #tpu.memory_space<vmem>>, vector<1x32xf32>
    %200 = vector.shape_cast %199 : vector<1x32xf32> to vector<32xf32>
    %201 = vector.shape_cast %200 : vector<32xf32> to vector<1x1x32xf32>
    %202 = vector.broadcast %201 : vector<1x1x32xf32> to vector<8x8x32xf32>
    %203 = arith.mulf %195, %202 : vector<8x8x32xf32>
    %204 = arith.addf %192, %203 : vector<8x8x32xf32>
    %c0_90 = arith.constant 0 : index
    %205 = arith.index_cast %c2_i32_71 : i32 to index
    %c3_91 = arith.constant 3 : index
    %c0_92 = arith.constant 0 : index
    %206 = vector.load %arg1[%c0_90, %205, %c3_91, %c0_92] : memref<1x14x14x32xf32, #tpu.memory_space<vmem>>, vector<1x8x8x32xf32>
    %207 = vector.shape_cast %206 : vector<1x8x8x32xf32> to vector<8x8x32xf32>
    %c7_i32_93 = arith.constant 7 : i32
    %208 = arith.muli %c2_i32_71, %c7_i32_93 : i32
    %c3_i32_94 = arith.constant 3 : i32
    %209 = arith.addi %208, %c3_i32_94 : i32
    %210 = arith.index_cast %209 : i32 to index
    %c0_95 = arith.constant 0 : index
    %211 = vector.load %arg2[%210, %c0_95] : memref<49x32xf32, #tpu.memory_space<vmem>>, vector<1x32xf32>
    %212 = vector.shape_cast %211 : vector<1x32xf32> to vector<32xf32>
    %213 = vector.shape_cast %212 : vector<32xf32> to vector<1x1x32xf32>
    %214 = vector.broadcast %213 : vector<1x1x32xf32> to vector<8x8x32xf32>
    %215 = arith.mulf %207, %214 : vector<8x8x32xf32>
    %216 = arith.addf %204, %215 : vector<8x8x32xf32>
    %c0_96 = arith.constant 0 : index
    %217 = arith.index_cast %c2_i32_71 : i32 to index
    %c4_97 = arith.constant 4 : index
    %c0_98 = arith.constant 0 : index
    %218 = vector.load %arg1[%c0_96, %217, %c4_97, %c0_98] : memref<1x14x14x32xf32, #tpu.memory_space<vmem>>, vector<1x8x8x32xf32>
    %219 = vector.shape_cast %218 : vector<1x8x8x32xf32> to vector<8x8x32xf32>
    %c7_i32_99 = arith.constant 7 : i32
    %220 = arith.muli %c2_i32_71, %c7_i32_99 : i32
    %c4_i32_100 = arith.constant 4 : i32
    %221 = arith.addi %220, %c4_i32_100 : i32
    %222 = arith.index_cast %221 : i32 to index
    %c0_101 = arith.constant 0 : index
    %223 = vector.load %arg2[%222, %c0_101] : memref<49x32xf32, #tpu.memory_space<vmem>>, vector<1x32xf32>
    %224 = vector.shape_cast %223 : vector<1x32xf32> to vector<32xf32>
    %225 = vector.shape_cast %224 : vector<32xf32> to vector<1x1x32xf32>
    %226 = vector.broadcast %225 : vector<1x1x32xf32> to vector<8x8x32xf32>
    %227 = arith.mulf %219, %226 : vector<8x8x32xf32>
    %228 = arith.addf %216, %227 : vector<8x8x32xf32>
    %c0_102 = arith.constant 0 : index
    %229 = arith.index_cast %c2_i32_71 : i32 to index
    %c5_103 = arith.constant 5 : index
    %c0_104 = arith.constant 0 : index
    %230 = vector.load %arg1[%c0_102, %229, %c5_103, %c0_104] : memref<1x14x14x32xf32, #tpu.memory_space<vmem>>, vector<1x8x8x32xf32>
    %231 = vector.shape_cast %230 : vector<1x8x8x32xf32> to vector<8x8x32xf32>
    %c7_i32_105 = arith.constant 7 : i32
    %232 = arith.muli %c2_i32_71, %c7_i32_105 : i32
    %c5_i32_106 = arith.constant 5 : i32
    %233 = arith.addi %232, %c5_i32_106 : i32
    %234 = arith.index_cast %233 : i32 to index
    %c0_107 = arith.constant 0 : index
    %235 = vector.load %arg2[%234, %c0_107] : memref<49x32xf32, #tpu.memory_space<vmem>>, vector<1x32xf32>
    %236 = vector.shape_cast %235 : vector<1x32xf32> to vector<32xf32>
    %237 = vector.shape_cast %236 : vector<32xf32> to vector<1x1x32xf32>
    %238 = vector.broadcast %237 : vector<1x1x32xf32> to vector<8x8x32xf32>
    %239 = arith.mulf %231, %238 : vector<8x8x32xf32>
    %240 = arith.addf %228, %239 : vector<8x8x32xf32>
    %c0_108 = arith.constant 0 : index
    %241 = arith.index_cast %c2_i32_71 : i32 to index
    %c6_109 = arith.constant 6 : index
    %c0_110 = arith.constant 0 : index
    %242 = vector.load %arg1[%c0_108, %241, %c6_109, %c0_110] : memref<1x14x14x32xf32, #tpu.memory_space<vmem>>, vector<1x8x8x32xf32>
    %243 = vector.shape_cast %242 : vector<1x8x8x32xf32> to vector<8x8x32xf32>
    %c7_i32_111 = arith.constant 7 : i32
    %244 = arith.muli %c2_i32_71, %c7_i32_111 : i32
    %c6_i32_112 = arith.constant 6 : i32
    %245 = arith.addi %244, %c6_i32_112 : i32
    %246 = arith.index_cast %245 : i32 to index
    %c0_113 = arith.constant 0 : index
    %247 = vector.load %arg2[%246, %c0_113] : memref<49x32xf32, #tpu.memory_space<vmem>>, vector<1x32xf32>
    %248 = vector.shape_cast %247 : vector<1x32xf32> to vector<32xf32>
    %249 = vector.shape_cast %248 : vector<32xf32> to vector<1x1x32xf32>
    %250 = vector.broadcast %249 : vector<1x1x32xf32> to vector<8x8x32xf32>
    %251 = arith.mulf %243, %250 : vector<8x8x32xf32>
    %252 = arith.addf %240, %251 : vector<8x8x32xf32>
    %c3_i32_114 = arith.constant 3 : i32
    %c0_115 = arith.constant 0 : index
    %253 = arith.index_cast %c3_i32_114 : i32 to index
    %c0_116 = arith.constant 0 : index
    %c0_117 = arith.constant 0 : index
    %254 = vector.load %arg1[%c0_115, %253, %c0_116, %c0_117] : memref<1x14x14x32xf32, #tpu.memory_space<vmem>>, vector<1x8x8x32xf32>
    %255 = vector.shape_cast %254 : vector<1x8x8x32xf32> to vector<8x8x32xf32>
    %c7_i32_118 = arith.constant 7 : i32
    %256 = arith.muli %c3_i32_114, %c7_i32_118 : i32
    %c0_i32_119 = arith.constant 0 : i32
    %257 = arith.addi %256, %c0_i32_119 : i32
    %258 = arith.index_cast %257 : i32 to index
    %c0_120 = arith.constant 0 : index
    %259 = vector.load %arg2[%258, %c0_120] : memref<49x32xf32, #tpu.memory_space<vmem>>, vector<1x32xf32>
    %260 = vector.shape_cast %259 : vector<1x32xf32> to vector<32xf32>
    %261 = vector.shape_cast %260 : vector<32xf32> to vector<1x1x32xf32>
    %262 = vector.broadcast %261 : vector<1x1x32xf32> to vector<8x8x32xf32>
    %263 = arith.mulf %255, %262 : vector<8x8x32xf32>
    %264 = arith.addf %252, %263 : vector<8x8x32xf32>
    %c0_121 = arith.constant 0 : index
    %265 = arith.index_cast %c3_i32_114 : i32 to index
    %c1_122 = arith.constant 1 : index
    %c0_123 = arith.constant 0 : index
    %266 = vector.load %arg1[%c0_121, %265, %c1_122, %c0_123] : memref<1x14x14x32xf32, #tpu.memory_space<vmem>>, vector<1x8x8x32xf32>
    %267 = vector.shape_cast %266 : vector<1x8x8x32xf32> to vector<8x8x32xf32>
    %c7_i32_124 = arith.constant 7 : i32
    %268 = arith.muli %c3_i32_114, %c7_i32_124 : i32
    %c1_i32_125 = arith.constant 1 : i32
    %269 = arith.addi %268, %c1_i32_125 : i32
    %270 = arith.index_cast %269 : i32 to index
    %c0_126 = arith.constant 0 : index
    %271 = vector.load %arg2[%270, %c0_126] : memref<49x32xf32, #tpu.memory_space<vmem>>, vector<1x32xf32>
    %272 = vector.shape_cast %271 : vector<1x32xf32> to vector<32xf32>
    %273 = vector.shape_cast %272 : vector<32xf32> to vector<1x1x32xf32>
    %274 = vector.broadcast %273 : vector<1x1x32xf32> to vector<8x8x32xf32>
    %275 = arith.mulf %267, %274 : vector<8x8x32xf32>
    %276 = arith.addf %264, %275 : vector<8x8x32xf32>
    %c0_127 = arith.constant 0 : index
    %277 = arith.index_cast %c3_i32_114 : i32 to index
    %c2_128 = arith.constant 2 : index
    %c0_129 = arith.constant 0 : index
    %278 = vector.load %arg1[%c0_127, %277, %c2_128, %c0_129] : memref<1x14x14x32xf32, #tpu.memory_space<vmem>>, vector<1x8x8x32xf32>
    %279 = vector.shape_cast %278 : vector<1x8x8x32xf32> to vector<8x8x32xf32>
    %c7_i32_130 = arith.constant 7 : i32
    %280 = arith.muli %c3_i32_114, %c7_i32_130 : i32
    %c2_i32_131 = arith.constant 2 : i32
    %281 = arith.addi %280, %c2_i32_131 : i32
    %282 = arith.index_cast %281 : i32 to index
    %c0_132 = arith.constant 0 : index
    %283 = vector.load %arg2[%282, %c0_132] : memref<49x32xf32, #tpu.memory_space<vmem>>, vector<1x32xf32>
    %284 = vector.shape_cast %283 : vector<1x32xf32> to vector<32xf32>
    %285 = vector.shape_cast %284 : vector<32xf32> to vector<1x1x32xf32>
    %286 = vector.broadcast %285 : vector<1x1x32xf32> to vector<8x8x32xf32>
    %287 = arith.mulf %279, %286 : vector<8x8x32xf32>
    %288 = arith.addf %276, %287 : vector<8x8x32xf32>
    %c0_133 = arith.constant 0 : index
    %289 = arith.index_cast %c3_i32_114 : i32 to index
    %c3_134 = arith.constant 3 : index
    %c0_135 = arith.constant 0 : index
    %290 = vector.load %arg1[%c0_133, %289, %c3_134, %c0_135] : memref<1x14x14x32xf32, #tpu.memory_space<vmem>>, vector<1x8x8x32xf32>
    %291 = vector.shape_cast %290 : vector<1x8x8x32xf32> to vector<8x8x32xf32>
    %c7_i32_136 = arith.constant 7 : i32
    %292 = arith.muli %c3_i32_114, %c7_i32_136 : i32
    %c3_i32_137 = arith.constant 3 : i32
    %293 = arith.addi %292, %c3_i32_137 : i32
    %294 = arith.index_cast %293 : i32 to index
    %c0_138 = arith.constant 0 : index
    %295 = vector.load %arg2[%294, %c0_138] : memref<49x32xf32, #tpu.memory_space<vmem>>, vector<1x32xf32>
    %296 = vector.shape_cast %295 : vector<1x32xf32> to vector<32xf32>
    %297 = vector.shape_cast %296 : vector<32xf32> to vector<1x1x32xf32>
    %298 = vector.broadcast %297 : vector<1x1x32xf32> to vector<8x8x32xf32>
    %299 = arith.mulf %291, %298 : vector<8x8x32xf32>
    %300 = arith.addf %288, %299 : vector<8x8x32xf32>
    %c0_139 = arith.constant 0 : index
    %301 = arith.index_cast %c3_i32_114 : i32 to index
    %c4_140 = arith.constant 4 : index
    %c0_141 = arith.constant 0 : index
    %302 = vector.load %arg1[%c0_139, %301, %c4_140, %c0_141] : memref<1x14x14x32xf32, #tpu.memory_space<vmem>>, vector<1x8x8x32xf32>
    %303 = vector.shape_cast %302 : vector<1x8x8x32xf32> to vector<8x8x32xf32>
    %c7_i32_142 = arith.constant 7 : i32
    %304 = arith.muli %c3_i32_114, %c7_i32_142 : i32
    %c4_i32_143 = arith.constant 4 : i32
    %305 = arith.addi %304, %c4_i32_143 : i32
    %306 = arith.index_cast %305 : i32 to index
    %c0_144 = arith.constant 0 : index
    %307 = vector.load %arg2[%306, %c0_144] : memref<49x32xf32, #tpu.memory_space<vmem>>, vector<1x32xf32>
    %308 = vector.shape_cast %307 : vector<1x32xf32> to vector<32xf32>
    %309 = vector.shape_cast %308 : vector<32xf32> to vector<1x1x32xf32>
    %310 = vector.broadcast %309 : vector<1x1x32xf32> to vector<8x8x32xf32>
    %311 = arith.mulf %303, %310 : vector<8x8x32xf32>
    %312 = arith.addf %300, %311 : vector<8x8x32xf32>
    %c0_145 = arith.constant 0 : index
    %313 = arith.index_cast %c3_i32_114 : i32 to index
    %c5_146 = arith.constant 5 : index
    %c0_147 = arith.constant 0 : index
    %314 = vector.load %arg1[%c0_145, %313, %c5_146, %c0_147] : memref<1x14x14x32xf32, #tpu.memory_space<vmem>>, vector<1x8x8x32xf32>
    %315 = vector.shape_cast %314 : vector<1x8x8x32xf32> to vector<8x8x32xf32>
    %c7_i32_148 = arith.constant 7 : i32
    %316 = arith.muli %c3_i32_114, %c7_i32_148 : i32
    %c5_i32_149 = arith.constant 5 : i32
    %317 = arith.addi %316, %c5_i32_149 : i32
    %318 = arith.index_cast %317 : i32 to index
    %c0_150 = arith.constant 0 : index
    %319 = vector.load %arg2[%318, %c0_150] : memref<49x32xf32, #tpu.memory_space<vmem>>, vector<1x32xf32>
    %320 = vector.shape_cast %319 : vector<1x32xf32> to vector<32xf32>
    %321 = vector.shape_cast %320 : vector<32xf32> to vector<1x1x32xf32>
    %322 = vector.broadcast %321 : vector<1x1x32xf32> to vector<8x8x32xf32>
    %323 = arith.mulf %315, %322 : vector<8x8x32xf32>
    %324 = arith.addf %312, %323 : vector<8x8x32xf32>
    %c0_151 = arith.constant 0 : index
    %325 = arith.index_cast %c3_i32_114 : i32 to index
    %c6_152 = arith.constant 6 : index
    %c0_153 = arith.constant 0 : index
    %326 = vector.load %arg1[%c0_151, %325, %c6_152, %c0_153] : memref<1x14x14x32xf32, #tpu.memory_space<vmem>>, vector<1x8x8x32xf32>
    %327 = vector.shape_cast %326 : vector<1x8x8x32xf32> to vector<8x8x32xf32>
    %c7_i32_154 = arith.constant 7 : i32
    %328 = arith.muli %c3_i32_114, %c7_i32_154 : i32
    %c6_i32_155 = arith.constant 6 : i32
    %329 = arith.addi %328, %c6_i32_155 : i32
    %330 = arith.index_cast %329 : i32 to index
    %c0_156 = arith.constant 0 : index
    %331 = vector.load %arg2[%330, %c0_156] : memref<49x32xf32, #tpu.memory_space<vmem>>, vector<1x32xf32>
    %332 = vector.shape_cast %331 : vector<1x32xf32> to vector<32xf32>
    %333 = vector.shape_cast %332 : vector<32xf32> to vector<1x1x32xf32>
    %334 = vector.broadcast %333 : vector<1x1x32xf32> to vector<8x8x32xf32>
    %335 = arith.mulf %327, %334 : vector<8x8x32xf32>
    %336 = arith.addf %324, %335 : vector<8x8x32xf32>
    %c4_i32_157 = arith.constant 4 : i32
    %c0_158 = arith.constant 0 : index
    %337 = arith.index_cast %c4_i32_157 : i32 to index
    %c0_159 = arith.constant 0 : index
    %c0_160 = arith.constant 0 : index
    %338 = vector.load %arg1[%c0_158, %337, %c0_159, %c0_160] : memref<1x14x14x32xf32, #tpu.memory_space<vmem>>, vector<1x8x8x32xf32>
    %339 = vector.shape_cast %338 : vector<1x8x8x32xf32> to vector<8x8x32xf32>
    %c7_i32_161 = arith.constant 7 : i32
    %340 = arith.muli %c4_i32_157, %c7_i32_161 : i32
    %c0_i32_162 = arith.constant 0 : i32
    %341 = arith.addi %340, %c0_i32_162 : i32
    %342 = arith.index_cast %341 : i32 to index
    %c0_163 = arith.constant 0 : index
    %343 = vector.load %arg2[%342, %c0_163] : memref<49x32xf32, #tpu.memory_space<vmem>>, vector<1x32xf32>
    %344 = vector.shape_cast %343 : vector<1x32xf32> to vector<32xf32>
    %345 = vector.shape_cast %344 : vector<32xf32> to vector<1x1x32xf32>
    %346 = vector.broadcast %345 : vector<1x1x32xf32> to vector<8x8x32xf32>
    %347 = arith.mulf %339, %346 : vector<8x8x32xf32>
    %348 = arith.addf %336, %347 : vector<8x8x32xf32>
    %c0_164 = arith.constant 0 : index
    %349 = arith.index_cast %c4_i32_157 : i32 to index
    %c1_165 = arith.constant 1 : index
    %c0_166 = arith.constant 0 : index
    %350 = vector.load %arg1[%c0_164, %349, %c1_165, %c0_166] : memref<1x14x14x32xf32, #tpu.memory_space<vmem>>, vector<1x8x8x32xf32>
    %351 = vector.shape_cast %350 : vector<1x8x8x32xf32> to vector<8x8x32xf32>
    %c7_i32_167 = arith.constant 7 : i32
    %352 = arith.muli %c4_i32_157, %c7_i32_167 : i32
    %c1_i32_168 = arith.constant 1 : i32
    %353 = arith.addi %352, %c1_i32_168 : i32
    %354 = arith.index_cast %353 : i32 to index
    %c0_169 = arith.constant 0 : index
    %355 = vector.load %arg2[%354, %c0_169] : memref<49x32xf32, #tpu.memory_space<vmem>>, vector<1x32xf32>
    %356 = vector.shape_cast %355 : vector<1x32xf32> to vector<32xf32>
    %357 = vector.shape_cast %356 : vector<32xf32> to vector<1x1x32xf32>
    %358 = vector.broadcast %357 : vector<1x1x32xf32> to vector<8x8x32xf32>
    %359 = arith.mulf %351, %358 : vector<8x8x32xf32>
    %360 = arith.addf %348, %359 : vector<8x8x32xf32>
    %c0_170 = arith.constant 0 : index
    %361 = arith.index_cast %c4_i32_157 : i32 to index
    %c2_171 = arith.constant 2 : index
    %c0_172 = arith.constant 0 : index
    %362 = vector.load %arg1[%c0_170, %361, %c2_171, %c0_172] : memref<1x14x14x32xf32, #tpu.memory_space<vmem>>, vector<1x8x8x32xf32>
    %363 = vector.shape_cast %362 : vector<1x8x8x32xf32> to vector<8x8x32xf32>
    %c7_i32_173 = arith.constant 7 : i32
    %364 = arith.muli %c4_i32_157, %c7_i32_173 : i32
    %c2_i32_174 = arith.constant 2 : i32
    %365 = arith.addi %364, %c2_i32_174 : i32
    %366 = arith.index_cast %365 : i32 to index
    %c0_175 = arith.constant 0 : index
    %367 = vector.load %arg2[%366, %c0_175] : memref<49x32xf32, #tpu.memory_space<vmem>>, vector<1x32xf32>
    %368 = vector.shape_cast %367 : vector<1x32xf32> to vector<32xf32>
    %369 = vector.shape_cast %368 : vector<32xf32> to vector<1x1x32xf32>
    %370 = vector.broadcast %369 : vector<1x1x32xf32> to vector<8x8x32xf32>
    %371 = arith.mulf %363, %370 : vector<8x8x32xf32>
    %372 = arith.addf %360, %371 : vector<8x8x32xf32>
    %c0_176 = arith.constant 0 : index
    %373 = arith.index_cast %c4_i32_157 : i32 to index
    %c3_177 = arith.constant 3 : index
    %c0_178 = arith.constant 0 : index
    %374 = vector.load %arg1[%c0_176, %373, %c3_177, %c0_178] : memref<1x14x14x32xf32, #tpu.memory_space<vmem>>, vector<1x8x8x32xf32>
    %375 = vector.shape_cast %374 : vector<1x8x8x32xf32> to vector<8x8x32xf32>
    %c7_i32_179 = arith.constant 7 : i32
    %376 = arith.muli %c4_i32_157, %c7_i32_179 : i32
    %c3_i32_180 = arith.constant 3 : i32
    %377 = arith.addi %376, %c3_i32_180 : i32
    %378 = arith.index_cast %377 : i32 to index
    %c0_181 = arith.constant 0 : index
    %379 = vector.load %arg2[%378, %c0_181] : memref<49x32xf32, #tpu.memory_space<vmem>>, vector<1x32xf32>
    %380 = vector.shape_cast %379 : vector<1x32xf32> to vector<32xf32>
    %381 = vector.shape_cast %380 : vector<32xf32> to vector<1x1x32xf32>
    %382 = vector.broadcast %381 : vector<1x1x32xf32> to vector<8x8x32xf32>
    %383 = arith.mulf %375, %382 : vector<8x8x32xf32>
    %384 = arith.addf %372, %383 : vector<8x8x32xf32>
    %c0_182 = arith.constant 0 : index
    %385 = arith.index_cast %c4_i32_157 : i32 to index
    %c4_183 = arith.constant 4 : index
    %c0_184 = arith.constant 0 : index
    %386 = vector.load %arg1[%c0_182, %385, %c4_183, %c0_184] : memref<1x14x14x32xf32, #tpu.memory_space<vmem>>, vector<1x8x8x32xf32>
    %387 = vector.shape_cast %386 : vector<1x8x8x32xf32> to vector<8x8x32xf32>
    %c7_i32_185 = arith.constant 7 : i32
    %388 = arith.muli %c4_i32_157, %c7_i32_185 : i32
    %c4_i32_186 = arith.constant 4 : i32
    %389 = arith.addi %388, %c4_i32_186 : i32
    %390 = arith.index_cast %389 : i32 to index
    %c0_187 = arith.constant 0 : index
    %391 = vector.load %arg2[%390, %c0_187] : memref<49x32xf32, #tpu.memory_space<vmem>>, vector<1x32xf32>
    %392 = vector.shape_cast %391 : vector<1x32xf32> to vector<32xf32>
    %393 = vector.shape_cast %392 : vector<32xf32> to vector<1x1x32xf32>
    %394 = vector.broadcast %393 : vector<1x1x32xf32> to vector<8x8x32xf32>
    %395 = arith.mulf %387, %394 : vector<8x8x32xf32>
    %396 = arith.addf %384, %395 : vector<8x8x32xf32>
    %c0_188 = arith.constant 0 : index
    %397 = arith.index_cast %c4_i32_157 : i32 to index
    %c5_189 = arith.constant 5 : index
    %c0_190 = arith.constant 0 : index
    %398 = vector.load %arg1[%c0_188, %397, %c5_189, %c0_190] : memref<1x14x14x32xf32, #tpu.memory_space<vmem>>, vector<1x8x8x32xf32>
    %399 = vector.shape_cast %398 : vector<1x8x8x32xf32> to vector<8x8x32xf32>
    %c7_i32_191 = arith.constant 7 : i32
    %400 = arith.muli %c4_i32_157, %c7_i32_191 : i32
    %c5_i32_192 = arith.constant 5 : i32
    %401 = arith.addi %400, %c5_i32_192 : i32
    %402 = arith.index_cast %401 : i32 to index
    %c0_193 = arith.constant 0 : index
    %403 = vector.load %arg2[%402, %c0_193] : memref<49x32xf32, #tpu.memory_space<vmem>>, vector<1x32xf32>
    %404 = vector.shape_cast %403 : vector<1x32xf32> to vector<32xf32>
    %405 = vector.shape_cast %404 : vector<32xf32> to vector<1x1x32xf32>
    %406 = vector.broadcast %405 : vector<1x1x32xf32> to vector<8x8x32xf32>
    %407 = arith.mulf %399, %406 : vector<8x8x32xf32>
    %408 = arith.addf %396, %407 : vector<8x8x32xf32>
    %c0_194 = arith.constant 0 : index
    %409 = arith.index_cast %c4_i32_157 : i32 to index
    %c6_195 = arith.constant 6 : index
    %c0_196 = arith.constant 0 : index
    %410 = vector.load %arg1[%c0_194, %409, %c6_195, %c0_196] : memref<1x14x14x32xf32, #tpu.memory_space<vmem>>, vector<1x8x8x32xf32>
    %411 = vector.shape_cast %410 : vector<1x8x8x32xf32> to vector<8x8x32xf32>
    %c7_i32_197 = arith.constant 7 : i32
    %412 = arith.muli %c4_i32_157, %c7_i32_197 : i32
    %c6_i32_198 = arith.constant 6 : i32
    %413 = arith.addi %412, %c6_i32_198 : i32
    %414 = arith.index_cast %413 : i32 to index
    %c0_199 = arith.constant 0 : index
    %415 = vector.load %arg2[%414, %c0_199] : memref<49x32xf32, #tpu.memory_space<vmem>>, vector<1x32xf32>
    %416 = vector.shape_cast %415 : vector<1x32xf32> to vector<32xf32>
    %417 = vector.shape_cast %416 : vector<32xf32> to vector<1x1x32xf32>
    %418 = vector.broadcast %417 : vector<1x1x32xf32> to vector<8x8x32xf32>
    %419 = arith.mulf %411, %418 : vector<8x8x32xf32>
    %420 = arith.addf %408, %419 : vector<8x8x32xf32>
    %c5_i32_200 = arith.constant 5 : i32
    %c0_201 = arith.constant 0 : index
    %421 = arith.index_cast %c5_i32_200 : i32 to index
    %c0_202 = arith.constant 0 : index
    %c0_203 = arith.constant 0 : index
    %422 = vector.load %arg1[%c0_201, %421, %c0_202, %c0_203] : memref<1x14x14x32xf32, #tpu.memory_space<vmem>>, vector<1x8x8x32xf32>
    %423 = vector.shape_cast %422 : vector<1x8x8x32xf32> to vector<8x8x32xf32>
    %c7_i32_204 = arith.constant 7 : i32
    %424 = arith.muli %c5_i32_200, %c7_i32_204 : i32
    %c0_i32_205 = arith.constant 0 : i32
    %425 = arith.addi %424, %c0_i32_205 : i32
    %426 = arith.index_cast %425 : i32 to index
    %c0_206 = arith.constant 0 : index
    %427 = vector.load %arg2[%426, %c0_206] : memref<49x32xf32, #tpu.memory_space<vmem>>, vector<1x32xf32>
    %428 = vector.shape_cast %427 : vector<1x32xf32> to vector<32xf32>
    %429 = vector.shape_cast %428 : vector<32xf32> to vector<1x1x32xf32>
    %430 = vector.broadcast %429 : vector<1x1x32xf32> to vector<8x8x32xf32>
    %431 = arith.mulf %423, %430 : vector<8x8x32xf32>
    %432 = arith.addf %420, %431 : vector<8x8x32xf32>
    %c0_207 = arith.constant 0 : index
    %433 = arith.index_cast %c5_i32_200 : i32 to index
    %c1_208 = arith.constant 1 : index
    %c0_209 = arith.constant 0 : index
    %434 = vector.load %arg1[%c0_207, %433, %c1_208, %c0_209] : memref<1x14x14x32xf32, #tpu.memory_space<vmem>>, vector<1x8x8x32xf32>
    %435 = vector.shape_cast %434 : vector<1x8x8x32xf32> to vector<8x8x32xf32>
    %c7_i32_210 = arith.constant 7 : i32
    %436 = arith.muli %c5_i32_200, %c7_i32_210 : i32
    %c1_i32_211 = arith.constant 1 : i32
    %437 = arith.addi %436, %c1_i32_211 : i32
    %438 = arith.index_cast %437 : i32 to index
    %c0_212 = arith.constant 0 : index
    %439 = vector.load %arg2[%438, %c0_212] : memref<49x32xf32, #tpu.memory_space<vmem>>, vector<1x32xf32>
    %440 = vector.shape_cast %439 : vector<1x32xf32> to vector<32xf32>
    %441 = vector.shape_cast %440 : vector<32xf32> to vector<1x1x32xf32>
    %442 = vector.broadcast %441 : vector<1x1x32xf32> to vector<8x8x32xf32>
    %443 = arith.mulf %435, %442 : vector<8x8x32xf32>
    %444 = arith.addf %432, %443 : vector<8x8x32xf32>
    %c0_213 = arith.constant 0 : index
    %445 = arith.index_cast %c5_i32_200 : i32 to index
    %c2_214 = arith.constant 2 : index
    %c0_215 = arith.constant 0 : index
    %446 = vector.load %arg1[%c0_213, %445, %c2_214, %c0_215] : memref<1x14x14x32xf32, #tpu.memory_space<vmem>>, vector<1x8x8x32xf32>
    %447 = vector.shape_cast %446 : vector<1x8x8x32xf32> to vector<8x8x32xf32>
    %c7_i32_216 = arith.constant 7 : i32
    %448 = arith.muli %c5_i32_200, %c7_i32_216 : i32
    %c2_i32_217 = arith.constant 2 : i32
    %449 = arith.addi %448, %c2_i32_217 : i32
    %450 = arith.index_cast %449 : i32 to index
    %c0_218 = arith.constant 0 : index
    %451 = vector.load %arg2[%450, %c0_218] : memref<49x32xf32, #tpu.memory_space<vmem>>, vector<1x32xf32>
    %452 = vector.shape_cast %451 : vector<1x32xf32> to vector<32xf32>
    %453 = vector.shape_cast %452 : vector<32xf32> to vector<1x1x32xf32>
    %454 = vector.broadcast %453 : vector<1x1x32xf32> to vector<8x8x32xf32>
    %455 = arith.mulf %447, %454 : vector<8x8x32xf32>
    %456 = arith.addf %444, %455 : vector<8x8x32xf32>
    %c0_219 = arith.constant 0 : index
    %457 = arith.index_cast %c5_i32_200 : i32 to index
    %c3_220 = arith.constant 3 : index
    %c0_221 = arith.constant 0 : index
    %458 = vector.load %arg1[%c0_219, %457, %c3_220, %c0_221] : memref<1x14x14x32xf32, #tpu.memory_space<vmem>>, vector<1x8x8x32xf32>
    %459 = vector.shape_cast %458 : vector<1x8x8x32xf32> to vector<8x8x32xf32>
    %c7_i32_222 = arith.constant 7 : i32
    %460 = arith.muli %c5_i32_200, %c7_i32_222 : i32
    %c3_i32_223 = arith.constant 3 : i32
    %461 = arith.addi %460, %c3_i32_223 : i32
    %462 = arith.index_cast %461 : i32 to index
    %c0_224 = arith.constant 0 : index
    %463 = vector.load %arg2[%462, %c0_224] : memref<49x32xf32, #tpu.memory_space<vmem>>, vector<1x32xf32>
    %464 = vector.shape_cast %463 : vector<1x32xf32> to vector<32xf32>
    %465 = vector.shape_cast %464 : vector<32xf32> to vector<1x1x32xf32>
    %466 = vector.broadcast %465 : vector<1x1x32xf32> to vector<8x8x32xf32>
    %467 = arith.mulf %459, %466 : vector<8x8x32xf32>
    %468 = arith.addf %456, %467 : vector<8x8x32xf32>
    %c0_225 = arith.constant 0 : index
    %469 = arith.index_cast %c5_i32_200 : i32 to index
    %c4_226 = arith.constant 4 : index
    %c0_227 = arith.constant 0 : index
    %470 = vector.load %arg1[%c0_225, %469, %c4_226, %c0_227] : memref<1x14x14x32xf32, #tpu.memory_space<vmem>>, vector<1x8x8x32xf32>
    %471 = vector.shape_cast %470 : vector<1x8x8x32xf32> to vector<8x8x32xf32>
    %c7_i32_228 = arith.constant 7 : i32
    %472 = arith.muli %c5_i32_200, %c7_i32_228 : i32
    %c4_i32_229 = arith.constant 4 : i32
    %473 = arith.addi %472, %c4_i32_229 : i32
    %474 = arith.index_cast %473 : i32 to index
    %c0_230 = arith.constant 0 : index
    %475 = vector.load %arg2[%474, %c0_230] : memref<49x32xf32, #tpu.memory_space<vmem>>, vector<1x32xf32>
    %476 = vector.shape_cast %475 : vector<1x32xf32> to vector<32xf32>
    %477 = vector.shape_cast %476 : vector<32xf32> to vector<1x1x32xf32>
    %478 = vector.broadcast %477 : vector<1x1x32xf32> to vector<8x8x32xf32>
    %479 = arith.mulf %471, %478 : vector<8x8x32xf32>
    %480 = arith.addf %468, %479 : vector<8x8x32xf32>
    %c0_231 = arith.constant 0 : index
    %481 = arith.index_cast %c5_i32_200 : i32 to index
    %c5_232 = arith.constant 5 : index
    %c0_233 = arith.constant 0 : index
    %482 = vector.load %arg1[%c0_231, %481, %c5_232, %c0_233] : memref<1x14x14x32xf32, #tpu.memory_space<vmem>>, vector<1x8x8x32xf32>
    %483 = vector.shape_cast %482 : vector<1x8x8x32xf32> to vector<8x8x32xf32>
    %c7_i32_234 = arith.constant 7 : i32
    %484 = arith.muli %c5_i32_200, %c7_i32_234 : i32
    %c5_i32_235 = arith.constant 5 : i32
    %485 = arith.addi %484, %c5_i32_235 : i32
    %486 = arith.index_cast %485 : i32 to index
    %c0_236 = arith.constant 0 : index
    %487 = vector.load %arg2[%486, %c0_236] : memref<49x32xf32, #tpu.memory_space<vmem>>, vector<1x32xf32>
    %488 = vector.shape_cast %487 : vector<1x32xf32> to vector<32xf32>
    %489 = vector.shape_cast %488 : vector<32xf32> to vector<1x1x32xf32>
    %490 = vector.broadcast %489 : vector<1x1x32xf32> to vector<8x8x32xf32>
    %491 = arith.mulf %483, %490 : vector<8x8x32xf32>
    %492 = arith.addf %480, %491 : vector<8x8x32xf32>
    %c0_237 = arith.constant 0 : index
    %493 = arith.index_cast %c5_i32_200 : i32 to index
    %c6_238 = arith.constant 6 : index
    %c0_239 = arith.constant 0 : index
    %494 = vector.load %arg1[%c0_237, %493, %c6_238, %c0_239] : memref<1x14x14x32xf32, #tpu.memory_space<vmem>>, vector<1x8x8x32xf32>
    %495 = vector.shape_cast %494 : vector<1x8x8x32xf32> to vector<8x8x32xf32>
    %c7_i32_240 = arith.constant 7 : i32
    %496 = arith.muli %c5_i32_200, %c7_i32_240 : i32
    %c6_i32_241 = arith.constant 6 : i32
    %497 = arith.addi %496, %c6_i32_241 : i32
    %498 = arith.index_cast %497 : i32 to index
    %c0_242 = arith.constant 0 : index
    %499 = vector.load %arg2[%498, %c0_242] : memref<49x32xf32, #tpu.memory_space<vmem>>, vector<1x32xf32>
    %500 = vector.shape_cast %499 : vector<1x32xf32> to vector<32xf32>
    %501 = vector.shape_cast %500 : vector<32xf32> to vector<1x1x32xf32>
    %502 = vector.broadcast %501 : vector<1x1x32xf32> to vector<8x8x32xf32>
    %503 = arith.mulf %495, %502 : vector<8x8x32xf32>
    %504 = arith.addf %492, %503 : vector<8x8x32xf32>
    %c6_i32_243 = arith.constant 6 : i32
    %c0_244 = arith.constant 0 : index
    %505 = arith.index_cast %c6_i32_243 : i32 to index
    %c0_245 = arith.constant 0 : index
    %c0_246 = arith.constant 0 : index
    %506 = vector.load %arg1[%c0_244, %505, %c0_245, %c0_246] : memref<1x14x14x32xf32, #tpu.memory_space<vmem>>, vector<1x8x8x32xf32>
    %507 = vector.shape_cast %506 : vector<1x8x8x32xf32> to vector<8x8x32xf32>
    %c7_i32_247 = arith.constant 7 : i32
    %508 = arith.muli %c6_i32_243, %c7_i32_247 : i32
    %c0_i32_248 = arith.constant 0 : i32
    %509 = arith.addi %508, %c0_i32_248 : i32
    %510 = arith.index_cast %509 : i32 to index
    %c0_249 = arith.constant 0 : index
    %511 = vector.load %arg2[%510, %c0_249] : memref<49x32xf32, #tpu.memory_space<vmem>>, vector<1x32xf32>
    %512 = vector.shape_cast %511 : vector<1x32xf32> to vector<32xf32>
    %513 = vector.shape_cast %512 : vector<32xf32> to vector<1x1x32xf32>
    %514 = vector.broadcast %513 : vector<1x1x32xf32> to vector<8x8x32xf32>
    %515 = arith.mulf %507, %514 : vector<8x8x32xf32>
    %516 = arith.addf %504, %515 : vector<8x8x32xf32>
    %c0_250 = arith.constant 0 : index
    %517 = arith.index_cast %c6_i32_243 : i32 to index
    %c1_251 = arith.constant 1 : index
    %c0_252 = arith.constant 0 : index
    %518 = vector.load %arg1[%c0_250, %517, %c1_251, %c0_252] : memref<1x14x14x32xf32, #tpu.memory_space<vmem>>, vector<1x8x8x32xf32>
    %519 = vector.shape_cast %518 : vector<1x8x8x32xf32> to vector<8x8x32xf32>
    %c7_i32_253 = arith.constant 7 : i32
    %520 = arith.muli %c6_i32_243, %c7_i32_253 : i32
    %c1_i32_254 = arith.constant 1 : i32
    %521 = arith.addi %520, %c1_i32_254 : i32
    %522 = arith.index_cast %521 : i32 to index
    %c0_255 = arith.constant 0 : index
    %523 = vector.load %arg2[%522, %c0_255] : memref<49x32xf32, #tpu.memory_space<vmem>>, vector<1x32xf32>
    %524 = vector.shape_cast %523 : vector<1x32xf32> to vector<32xf32>
    %525 = vector.shape_cast %524 : vector<32xf32> to vector<1x1x32xf32>
    %526 = vector.broadcast %525 : vector<1x1x32xf32> to vector<8x8x32xf32>
    %527 = arith.mulf %519, %526 : vector<8x8x32xf32>
    %528 = arith.addf %516, %527 : vector<8x8x32xf32>
    %c0_256 = arith.constant 0 : index
    %529 = arith.index_cast %c6_i32_243 : i32 to index
    %c2_257 = arith.constant 2 : index
    %c0_258 = arith.constant 0 : index
    %530 = vector.load %arg1[%c0_256, %529, %c2_257, %c0_258] : memref<1x14x14x32xf32, #tpu.memory_space<vmem>>, vector<1x8x8x32xf32>
    %531 = vector.shape_cast %530 : vector<1x8x8x32xf32> to vector<8x8x32xf32>
    %c7_i32_259 = arith.constant 7 : i32
    %532 = arith.muli %c6_i32_243, %c7_i32_259 : i32
    %c2_i32_260 = arith.constant 2 : i32
    %533 = arith.addi %532, %c2_i32_260 : i32
    %534 = arith.index_cast %533 : i32 to index
    %c0_261 = arith.constant 0 : index
    %535 = vector.load %arg2[%534, %c0_261] : memref<49x32xf32, #tpu.memory_space<vmem>>, vector<1x32xf32>
    %536 = vector.shape_cast %535 : vector<1x32xf32> to vector<32xf32>
    %537 = vector.shape_cast %536 : vector<32xf32> to vector<1x1x32xf32>
    %538 = vector.broadcast %537 : vector<1x1x32xf32> to vector<8x8x32xf32>
    %539 = arith.mulf %531, %538 : vector<8x8x32xf32>
    %540 = arith.addf %528, %539 : vector<8x8x32xf32>
    %c0_262 = arith.constant 0 : index
    %541 = arith.index_cast %c6_i32_243 : i32 to index
    %c3_263 = arith.constant 3 : index
    %c0_264 = arith.constant 0 : index
    %542 = vector.load %arg1[%c0_262, %541, %c3_263, %c0_264] : memref<1x14x14x32xf32, #tpu.memory_space<vmem>>, vector<1x8x8x32xf32>
    %543 = vector.shape_cast %542 : vector<1x8x8x32xf32> to vector<8x8x32xf32>
    %c7_i32_265 = arith.constant 7 : i32
    %544 = arith.muli %c6_i32_243, %c7_i32_265 : i32
    %c3_i32_266 = arith.constant 3 : i32
    %545 = arith.addi %544, %c3_i32_266 : i32
    %546 = arith.index_cast %545 : i32 to index
    %c0_267 = arith.constant 0 : index
    %547 = vector.load %arg2[%546, %c0_267] : memref<49x32xf32, #tpu.memory_space<vmem>>, vector<1x32xf32>
    %548 = vector.shape_cast %547 : vector<1x32xf32> to vector<32xf32>
    %549 = vector.shape_cast %548 : vector<32xf32> to vector<1x1x32xf32>
    %550 = vector.broadcast %549 : vector<1x1x32xf32> to vector<8x8x32xf32>
    %551 = arith.mulf %543, %550 : vector<8x8x32xf32>
    %552 = arith.addf %540, %551 : vector<8x8x32xf32>
    %c0_268 = arith.constant 0 : index
    %553 = arith.index_cast %c6_i32_243 : i32 to index
    %c4_269 = arith.constant 4 : index
    %c0_270 = arith.constant 0 : index
    %554 = vector.load %arg1[%c0_268, %553, %c4_269, %c0_270] : memref<1x14x14x32xf32, #tpu.memory_space<vmem>>, vector<1x8x8x32xf32>
    %555 = vector.shape_cast %554 : vector<1x8x8x32xf32> to vector<8x8x32xf32>
    %c7_i32_271 = arith.constant 7 : i32
    %556 = arith.muli %c6_i32_243, %c7_i32_271 : i32
    %c4_i32_272 = arith.constant 4 : i32
    %557 = arith.addi %556, %c4_i32_272 : i32
    %558 = arith.index_cast %557 : i32 to index
    %c0_273 = arith.constant 0 : index
    %559 = vector.load %arg2[%558, %c0_273] : memref<49x32xf32, #tpu.memory_space<vmem>>, vector<1x32xf32>
    %560 = vector.shape_cast %559 : vector<1x32xf32> to vector<32xf32>
    %561 = vector.shape_cast %560 : vector<32xf32> to vector<1x1x32xf32>
    %562 = vector.broadcast %561 : vector<1x1x32xf32> to vector<8x8x32xf32>
    %563 = arith.mulf %555, %562 : vector<8x8x32xf32>
    %564 = arith.addf %552, %563 : vector<8x8x32xf32>
    %c0_274 = arith.constant 0 : index
    %565 = arith.index_cast %c6_i32_243 : i32 to index
    %c5_275 = arith.constant 5 : index
    %c0_276 = arith.constant 0 : index
    %566 = vector.load %arg1[%c0_274, %565, %c5_275, %c0_276] : memref<1x14x14x32xf32, #tpu.memory_space<vmem>>, vector<1x8x8x32xf32>
    %567 = vector.shape_cast %566 : vector<1x8x8x32xf32> to vector<8x8x32xf32>
    %c7_i32_277 = arith.constant 7 : i32
    %568 = arith.muli %c6_i32_243, %c7_i32_277 : i32
    %c5_i32_278 = arith.constant 5 : i32
    %569 = arith.addi %568, %c5_i32_278 : i32
    %570 = arith.index_cast %569 : i32 to index
    %c0_279 = arith.constant 0 : index
    %571 = vector.load %arg2[%570, %c0_279] : memref<49x32xf32, #tpu.memory_space<vmem>>, vector<1x32xf32>
    %572 = vector.shape_cast %571 : vector<1x32xf32> to vector<32xf32>
    %573 = vector.shape_cast %572 : vector<32xf32> to vector<1x1x32xf32>
    %574 = vector.broadcast %573 : vector<1x1x32xf32> to vector<8x8x32xf32>
    %575 = arith.mulf %567, %574 : vector<8x8x32xf32>
    %576 = arith.addf %564, %575 : vector<8x8x32xf32>
    %c0_280 = arith.constant 0 : index
    %577 = arith.index_cast %c6_i32_243 : i32 to index
    %c6_281 = arith.constant 6 : index
    %c0_282 = arith.constant 0 : index
    %578 = vector.load %arg1[%c0_280, %577, %c6_281, %c0_282] : memref<1x14x14x32xf32, #tpu.memory_space<vmem>>, vector<1x8x8x32xf32>
    %579 = vector.shape_cast %578 : vector<1x8x8x32xf32> to vector<8x8x32xf32>
    %c7_i32_283 = arith.constant 7 : i32
    %580 = arith.muli %c6_i32_243, %c7_i32_283 : i32
    %c6_i32_284 = arith.constant 6 : i32
    %581 = arith.addi %580, %c6_i32_284 : i32
    %582 = arith.index_cast %581 : i32 to index
    %c0_285 = arith.constant 0 : index
    %583 = vector.load %arg2[%582, %c0_285] : memref<49x32xf32, #tpu.memory_space<vmem>>, vector<1x32xf32>
    %584 = vector.shape_cast %583 : vector<1x32xf32> to vector<32xf32>
    %585 = vector.shape_cast %584 : vector<32xf32> to vector<1x1x32xf32>
    %586 = vector.broadcast %585 : vector<1x1x32xf32> to vector<8x8x32xf32>
    %587 = arith.mulf %579, %586 : vector<8x8x32xf32>
    %588 = arith.addf %576, %587 : vector<8x8x32xf32>
    %c7_i32_286 = arith.constant 7 : i32
    %cst_287 = arith.constant dense<0.000000e+00> : vector<8x8xf32>
    %589 = vector.multi_reduction <add>, %588, %cst_287 [2] : vector<8x8x32xf32> to vector<8x8xf32>
    %590 = vector.shape_cast %589 : vector<8x8xf32> to vector<8x8x1xf32>
    %591 = arith.negf %590 : vector<8x8x1xf32>
    %592 = math.exp %591 : vector<8x8x1xf32>
    %cst_288 = arith.constant 1.000000e+00 : f32
    %593 = vector.broadcast %cst_288 : f32 to vector<8x8x1xf32>
    %594 = arith.addf %593, %592 : vector<8x8x1xf32>
    %595 = arith.divf %593, %594 : vector<8x8x1xf32>
    %c0_289 = arith.constant 0 : index
    %c3_290 = arith.constant 3 : index
    %c3_291 = arith.constant 3 : index
    %c0_292 = arith.constant 0 : index
    %596 = vector.load %arg1[%c0_289, %c3_290, %c3_291, %c0_292] : memref<1x14x14x32xf32, #tpu.memory_space<vmem>>, vector<1x8x8x32xf32>
    %597 = vector.shape_cast %596 : vector<1x8x8x32xf32> to vector<8x8x32xf32>
    %598 = vector.broadcast %595 : vector<8x8x1xf32> to vector<8x8x32xf32>
    %599 = arith.mulf %597, %598 : vector<8x8x32xf32>
    %cst_293 = arith.constant dense<0.000000e+00> : vector<32xf32>
    %600 = vector.multi_reduction <add>, %599, %cst_293 [0, 1] : vector<8x8x32xf32> to vector<32xf32>
    %601 = vector.shape_cast %600 : vector<32xf32> to vector<1x32xf32>
    %c0_294 = arith.constant 0 : index
    %c0_295 = arith.constant 0 : index
    %c0_296 = arith.constant 0 : index
    %602 = vector.load %arg3[%c0_294, %c0_295, %c0_296] : memref<1x16x16xf32, #tpu.memory_space<vmem>>, vector<1x16x16xf32>
    %603 = vector.shape_cast %602 : vector<1x16x16xf32> to vector<16x16xf32>
    %cst_297 = arith.constant dense<0.000000e+00> : vector<16xf32>
    %604 = vector.multi_reduction <add>, %603, %cst_297 [0] : vector<16x16xf32> to vector<16xf32>
    %605 = vector.shape_cast %604 : vector<16xf32> to vector<1x16xf32>
    %c0_298 = arith.constant 0 : index
    %c0_299 = arith.constant 0 : index
    %606 = vector.load %arg4[%c0_298, %c0_299] : memref<32x32xf32, #tpu.memory_space<vmem>>, vector<32x32xf32>
    %cst_300 = arith.constant dense<0.000000e+00> : vector<1x32xf32>
    %607 = tpu.matmul %601, %606, %cst_300 {dimension_numbers = #tpu.dot_dimension_numbers<[1], [0], [0], [1], [0, 0, 1, 1], [], []>} : vector<1x32xf32>, vector<32x32xf32>, vector<1x32xf32> -> vector<1x32xf32>
    %c0_301 = arith.constant 0 : index
    %c0_302 = arith.constant 0 : index
    %608 = vector.load %arg5[%c0_301, %c0_302] : memref<16x32xf32, #tpu.memory_space<vmem>>, vector<16x32xf32>
    %cst_303 = arith.constant dense<0.000000e+00> : vector<1x32xf32>
    %609 = tpu.matmul %605, %608, %cst_303 {dimension_numbers = #tpu.dot_dimension_numbers<[1], [0], [0], [1], [0, 0, 1, 1], [], []>} : vector<1x16xf32>, vector<16x32xf32>, vector<1x32xf32> -> vector<1x32xf32>
    %610 = arith.addf %607, %609 : vector<1x32xf32>
    %c0_304 = arith.constant 0 : index
    %c0_305 = arith.constant 0 : index
    %611 = vector.load %arg6[%c0_304, %c0_305] : memref<1x32xf32, #tpu.memory_space<vmem>>, vector<1x32xf32>
    %612 = arith.addf %610, %611 : vector<1x32xf32>
    %cst_306 = arith.constant 0.000000e+00 : f32
    %613 = vector.broadcast %cst_306 : f32 to vector<1x32xf32>
    %614 = arith.maximumf %612, %613 : vector<1x32xf32>
    %c0_307 = arith.constant 0 : index
    %c0_308 = arith.constant 0 : index
    %615 = vector.load %arg7[%c0_307, %c0_308] : memref<32x128xf32, #tpu.memory_space<vmem>>, vector<32x128xf32>
    %cst_309 = arith.constant dense<0.000000e+00> : vector<1x128xf32>
    %616 = tpu.matmul %614, %615, %cst_309 {dimension_numbers = #tpu.dot_dimension_numbers<[1], [0], [0], [1], [0, 0, 1, 1], [], []>} : vector<1x32xf32>, vector<32x128xf32>, vector<1x128xf32> -> vector<1x128xf32>
    %c0_310 = arith.constant 0 : index
    %c0_311 = arith.constant 0 : index
    %617 = vector.load %arg8[%c0_310, %c0_311] : memref<1x128xf32, #tpu.memory_space<vmem>>, vector<1x128xf32>
    %618 = arith.addf %616, %617 : vector<1x128xf32>
    %c0_312 = arith.constant 0 : index
    %c0_313 = arith.constant 0 : index
    %c0_314 = arith.constant 0 : index
    %619 = vector.load %arg9[%c0_312, %c0_313, %c0_314] : memref<1x1x128xf32, #tpu.memory_space<vmem>>, vector<1x1x128xf32>
    %620 = vector.shape_cast %619 : vector<1x1x128xf32> to vector<1x128xf32>
    %621 = vector.shape_cast %618 : vector<1x128xf32> to vector<1x1x128xf32>
    tpu.vector_store %arg9[%c0_312, %c0_313, %c0_314], %621 {strides = array<i32>} : memref<1x1x128xf32, #tpu.memory_space<vmem>>, vector<1x1x128xf32>,
    return
  }
  func.func @transform_0(%arg0: i32) -> (i32, i32, i32, i32) {
    %c0_i32 = arith.constant 0 : i32
    %c0_i32_0 = arith.constant 0 : i32
    %c0_i32_1 = arith.constant 0 : i32
    %c0_i32_2 = arith.constant 0 : i32
    return %arg0, %c0_i32, %c0_i32_0, %c0_i32_1 : i32, i32, i32, i32
  }
  func.func @transform_1(%arg0: i32) -> (i32, i32) {
    %c0_i32 = arith.constant 0 : i32
    %c0_i32_0 = arith.constant 0 : i32
    %c0_i32_1 = arith.constant 0 : i32
    return %c0_i32, %c0_i32_0 : i32, i32
  }
  func.func @transform_2(%arg0: i32) -> (i32, i32, i32) {
    %c0_i32 = arith.constant 0 : i32
    %c0_i32_0 = arith.constant 0 : i32
    %c0_i32_1 = arith.constant 0 : i32
    return %arg0, %c0_i32, %c0_i32_0 : i32, i32, i32
  }
  func.func @transform_3(%arg0: i32) -> (i32, i32) {
    %c0_i32 = arith.constant 0 : i32
    %c0_i32_0 = arith.constant 0 : i32
    %c0_i32_1 = arith.constant 0 : i32
    return %c0_i32, %c0_i32_0 : i32, i32
  }
  func.func @transform_4(%arg0: i32) -> (i32, i32) {
    %c0_i32 = arith.constant 0 : i32
    %c0_i32_0 = arith.constant 0 : i32
    %c0_i32_1 = arith.constant 0 : i32
    return %c0_i32, %c0_i32_0 : i32, i32
  }
  func.func @transform_5(%arg0: i32) -> (i32, i32) {
    %c0_i32 = arith.constant 0 : i32
    %c0_i32_0 = arith.constant 0 : i32
    %c0_i32_1 = arith.constant 0 : i32
    return %c0_i32, %c0_i32_0 : i32, i32
  }
  func.func @transform_6(%arg0: i32) -> (i32, i32) {
    %c0_i32 = arith.constant 0 : i32
    %c0_i32_0 = arith.constant 0 : i32
    %c0_i32_1 = arith.constant 0 : i32
    return %c0_i32, %c0_i32_0 : i32, i32
  }
  func.func @transform_7(%arg0: i32) -> (i32, i32) {
    %c0_i32 = arith.constant 0 : i32
    %c0_i32_0 = arith.constant 0 : i32
    %c0_i32_1 = arith.constant 0 : i32
    return %c0_i32, %c0_i32_0 : i32, i32
  }
  func.func @transform_8(%arg0: i32) -> (i32, i32, i32) {
    %c0_i32 = arith.constant 0 : i32
    %c0_i32_0 = arith.constant 0 : i32
    %c0_i32_1 = arith.constant 0 : i32
    return %arg0, %c0_i32, %c0_i32_0 : i32, i32, i32
  }
}

</mosaic_0001>

<bundles_post_ra>
// kernel: hybrid_forward.1
= control target key start
LH: loop header
LB: loop body
LE: loop exit
PB: predicated region body
PF: predicated region fallthrough
CT: control target
= control target key end

     0   :  { %s2757_s27 = smov 0   ;;  %s4557_s0 = inlined_call_operand.vmem [shape: f32[2,14,14,32], index: 0, kind: input, shape index: {}]   ;;  %s4558_s1 = inlined_call_operand.vmem [shape: f32[49,32], index: 1, kind: input, shape index: {}]   ;;  %s4559_s2 = inlined_call_operand.vmem [shape: f32[2,16,16], index: 2, kind: input, shape index: {}]   ;;  %s4560_s3 = inlined_call_operand.vmem [shape: f32[32,32], index: 3, kind: input, shape index: {}]   ;;  %s4561_s4 = inlined_call_operand.vmem [shape: f32[16,32], index: 4, kind: input, shape index: {}]   ;;  %s4562_s5 = inlined_call_operand.vmem [shape: f32[1,32], index: 5, kind: input, shape index: {}]   ;;  %s4563_s6 = inlined_call_operand.vmem [shape: f32[32,128], index: 6, kind: input, shape index: {}]   ;;  %s4564_s7 = inlined_call_operand.vmem [shape: f32[1,128], index: 7, kind: input, shape index: {}]   ;;  %s4565_s8 = inlined_call_operand.vmem [shape: f32[2,1,128], index: 8, kind: output, shape index: {}]  }
   0x1 LB: > { %s2156_s28 = sadd.s32 4294967295, %s2708_s27   ;;  %p2160_p0 = scmp.ge.s32.totalorder %s2708_s27, 1  ;;  %s2708_s27 = sphi %s2757_s27, %s18_s27  }
   0x2   : > { %p272_p1 = scmp.lt.s32.totalorder %s2708_s27, 3 }
   0x4   : > { %p273_p2 = pnand %p2160_p0, %p272_p1 }
   0x6   : > { %276 = sbr.rel (%p273_p2) target bundleno = 866 (0x362), region = 52 }
   0xb   : > { %p309_p3 = scmp.lt.s32.totalorder %s2156_s28, 1  ;;  %v2771_v0 = vld [vmem:[%s4558_s1] ss:$0 sm:$0xff]  ;;  %v2776_v1 = vld [vmem:[%s4558_s1 + $0x1] ss:$0 sm:$0xff]  ;;  %vm1749_vm0 = vcmask 261120  }
   0xc   : > { %4750 = vst [vmem:[#allocation2_spill] sm:$0xff] %v2771_v0  ;;  %4751 = vst [vmem:[#allocation3_spill] sm:$0xff] %v2776_v1  ;;  %v2781_v2 = vld [vmem:[%s4558_s1 + $0x2] ss:$0 sm:$0xff]  ;;  %v2791_v3 = vld [vmem:[%s4558_s1 + $0x3] ss:$0 sm:$0xff] }
   0xd   : > { %s4995_s28 = smov (!%p309_p3, %s2156_s28), 1  ;;  %4752 = vst [vmem:[#allocation4_spill] sm:$0xff] %v2781_v2  ;;  %4753 = vst [vmem:[#allocation5_spill] sm:$0xff] %v2791_v3  ;;  %v2804_v12 = vld [vmem:[%s4558_s1 + $0x4] ss:$0 sm:$0xff]  ;;  %vm1853_vm1 = vcmask 130048  }
   0xe   : > { %s2605_s29 = smul.u32 224, %s4995_s28  ;;  %v2811_v16 = vld [vmem:[%s4558_s1 + $0x5] ss:$0 sm:$0xff]  ;;  %v2827_v23 = vld [vmem:[%s4558_s1 + $0x6] ss:$0 sm:$0xff]  ;;  %s2562_s21 = sshll.u32 %s4995_s28, 4 }
   0xf   : > { %v2842_v30 = vld [vmem:[%s4558_s1 + $0x7] ss:$0 sm:$0xff]  ;;  %v2856_v37 = vld [vmem:[%s4558_s1 + $0x8] ss:$0 sm:$0xff]  ;;  %v2871_v44 = vld [vmem:[%s4558_s1 + $0x9] ss:$0 sm:$0xff]  ;;  %s318_s30 = scalar_lea.vmem %s4559_s2, %s2562_s21 }
  0x10   : > { %s2786_s16 = scalar_lea.vmem %s4557_s0, %s2605_s29  ;;  %4755 = vst [vmem:[#allocation7_spill] sm:$0xff] %v2871_v44  ;;  %v2886_v51 = vld [vmem:[%s4558_s1 + $0xa] ss:$0 sm:$0xff]  ;;  %v2898_v57 = vld [vmem:[%s4558_s1 + $0xb] ss:$0 sm:$0xff]  ;;  %vm2711_vm2 = vmmov 0   ;;  %s321_s29 = scalar_lea.vmem %s4565_s8, %s4995_s28 }
  0x11   : > { %v322_v4 = vld [vmem:[%s2786_s16] sm:$0xff]  ;;  %v2851_v36 = vld [vmem:[%s2786_s16 + $0x10] sm:$0xff]  ;;  %4757 = vst [vmem:[#allocation9_spill] sm:$0xff] %v2886_v51 }
  0x12   : > { %v351_v5 = vld [vmem:[%s2786_s16 + $0x1] sm:$0xff]  ;;  %v335_v7 = vmul.f32 %v2771_v0, %v322_v4  ;;  %v539_v40 = vmul.f32 %v2842_v30, %v2851_v36  ;;  %v2866_v43 = vld [vmem:[%s2786_s16 + $0x11] sm:$0xff]  ;;  %v2913_v4 = vld [vmem:[%s4558_s1 + $0xc] ss:$0 sm:$0xff] }
  0x13   : > { %v380_v6 = vld [vmem:[%s2786_s16 + $0x2] sm:$0xff]  ;;  %v364_v8 = vmul.f32 %v2776_v1, %v351_v5  ;;  %v568_v47 = vmul.f32 %v2856_v37, %v2866_v43  ;;  %v2881_v50 = vld [vmem:[%s2786_s16 + $0x12] sm:$0xff]  ;;  %4758 = vst [vmem:[#allocation10_spill] sm:$0xff] %v2913_v4 }
  0x14   : > { %v393_v9 = vmul.f32 %v2781_v2, %v380_v6  ;;  %v409_v10 = vld [vmem:[%s2786_s16 + $0x3] sm:$0xff]  ;;  %v597_v53 = vmul.f32 %v2871_v44, %v2881_v50  ;;  %v2893_v56 = vld [vmem:[%s2786_s16 + $0x13] sm:$0xff] }
  0x15   : > { %v438_v11 = vld [vmem:[%s2786_s16 + $0x4] sm:$0xff]  ;;  %v372_v13 = vadd.f32 %v364_v8, %v335_v7  ;;  %v422_v14 = vmul.f32 %v2791_v3, %v409_v10  ;;  %v2901_v58 = vld [vmem:[%s2786_s16 + $0x30] sm:$0xff]  ;;  %v626_v60 = vmul.f32 %v2886_v51, %v2893_v56 }
  0x16   : > { %v467_v15 = vld [vmem:[%s2786_s16 + $0x5] sm:$0xff]  ;;  %v451_v19 = vmul.f32 %v2804_v12, %v438_v11  ;;  %v541_v62 = vmul.f32 %v2901_v58, %v2842_v30  ;;  %v2908_v63 = vld [vmem:[%s2786_s16 + $0x14] sm:$0xff]  ;;  %v2928_v11 = vld [vmem:[%s4558_s1 + $0xd] ss:$0 sm:$0xff] }
  0x17   : > { %v2814_v17 = vld [vmem:[%s2786_s16 + $0x20] sm:$0xff]  ;;  %v401_v18 = vadd.f32 %v393_v9, %v372_v13  ;;  %v480_v27 = vmul.f32 %v2811_v16, %v467_v15  ;;  %v2916_v5 = vld [vmem:[%s2786_s16 + $0x31] sm:$0xff]  ;;  %v655_v7 = vmul.f32 %v2898_v57, %v2908_v63  ;;  %4760 = vst [vmem:[#allocation12_spill] sm:$0xff] %v2928_v11 }
  0x18   : > { %v2818_v20 = vld [vmem:[%s2786_s16 + $0x21] sm:$0xff]  ;;  %v337_v25 = vmul.f32 %v2814_v17, %v2771_v0  ;;  %4759 = vst [vmem:[#allocation11_spill] sm:$0xff] %v2916_v5  ;;  %v570_v9 = vmul.f32 %v2916_v5, %v2856_v37  ;;  %v2923_v10 = vld [vmem:[%s2786_s16 + $0x15] sm:$0xff] }
  0x19   : > { %v2821_v21 = vld [vmem:[%s2786_s16 + $0x22] sm:$0xff]  ;;  %v430_v26 = vadd.f32 %v422_v14, %v401_v18  ;;  %v366_v28 = vmul.f32 %v2818_v20, %v2776_v1  ;;  %v2931_v13 = vld [vmem:[%s2786_s16 + $0x32] sm:$0xff]  ;;  %v684_v15 = vmul.f32 %v2913_v4, %v2923_v10 }
  0x1a   : > { %v496_v22 = vld [vmem:[%s2786_s16 + $0x6] sm:$0xff]  ;;  %v395_v29 = vmul.f32 %v2821_v21, %v2781_v2  ;;  %4761 = vst [vmem:[#allocation13_spill] sm:$0xff] %v2931_v13 }
  0x1b   : > { %v2830_v24 = vld [vmem:[%s2786_s16 + $0x23] sm:$0xff]  ;;  %v459_v32 = vadd.f32 %v451_v19, %v430_v26  ;;  %v509_v33 = vmul.f32 %v2827_v23, %v496_v22  ;;  %v374_v34 = vadd.f32 %v366_v28, %v337_v25  ;;  %v599_v19 = vmul.f32 %v2931_v13, %v2871_v44  ;;  %v2938_v22 = vld [vmem:[%s2786_s16 + $0x16] sm:$0xff]  ;;  %v2943_v25 = vld [vmem:[%s4558_s1 + $0xe] ss:$0 sm:$0xff] }
  0x1c   : > { %v2845_v31 = vld [vmem:[%s2786_s16 + $0x24] sm:$0xff]  ;;  %v424_v35 = vmul.f32 %v2830_v24, %v2791_v3  ;;  %4762 = vst [vmem:[#allocation14_spill] sm:$0xff] %v2943_v25  ;;  %v2946_v26 = vld [vmem:[%s2786_s16 + $0x33] sm:$0xff]  ;;  %v713_v28 = vmul.f32 %v2928_v11, %v2938_v22 }
  0x1d   : > { %v2859_v38 = vld [vmem:[%s2786_s16 + $0x25] sm:$0xff]  ;;  %v488_v39 = vadd.f32 %v480_v27, %v459_v32  ;;  %v403_v41 = vadd.f32 %v395_v29, %v374_v34  ;;  %v453_v42 = vmul.f32 %v2845_v31, %v2804_v12  ;;  %4763 = vst [vmem:[#allocation15_spill] sm:$0xff] %v2946_v26  ;;  %v628_v32 = vmul.f32 %v2946_v26, %v2886_v51  ;;  %v2958_v34 = vld [vmem:[%s2786_s16 + $0x34] sm:$0xff] }
  0x1e   : > { %4754 = vst [vmem:[#allocation6_spill] sm:$0xff] %v2859_v38  ;;  %v2874_v45 = vld [vmem:[%s2786_s16 + $0x26] sm:$0xff]  ;;  %v482_v49 = vmul.f32 %v2859_v38, %v2811_v16  ;;  %4765 = vst [vmem:[#allocation17_spill] sm:$0xff] %v2958_v34 }
  0x1f   : > { %4756 = vst [vmem:[#allocation8_spill] sm:$0xff] %v2874_v45  ;;  %v517_v46 = vadd.f32 %v509_v33, %v488_v39  ;;  %v432_v48 = vadd.f32 %v424_v35, %v403_v41  ;;  %v511_v55 = vmul.f32 %v2874_v45, %v2827_v23  ;;  %v2955_v33 = vld [vmem:[%s4558_s1 + $0xf] ss:$0 sm:$0xff]  ;;  %v743_v39 = vmul.f32 %v2943_v25, %v2814_v17 }
  0x20   : > { %4764 = vst [vmem:[#allocation16_spill] sm:$0xff] %v2955_v33  ;;  %v657_v41 = vmul.f32 %v2958_v34, %v2898_v57 }
  0x21   : > { %v547_v52 = vadd.f32 %v539_v40, %v517_v46  ;;  %v461_v54 = vadd.f32 %v453_v42, %v432_v48  ;;  %v2967_v42 = vld [vmem:[%s4558_s1 + $0x10] ss:$0 sm:$0xff]  ;;  %v2970_v46 = vld [vmem:[%s2786_s16 + $0x35] sm:$0xff]  ;;  %v772_v48 = vmul.f32 %v2955_v33, %v2818_v20 }
  0x22   : > { %4766 = vst [vmem:[#allocation18_spill] sm:$0xff] %v2967_v42  ;;  %4767 = vst [vmem:[#allocation19_spill] sm:$0xff] %v2970_v46 }
  0x23   : > { %v576_v59 = vadd.f32 %v568_v47, %v547_v52  ;;  %v490_v61 = vadd.f32 %v482_v49, %v461_v54  ;;  %v2977_v49 = vld [vmem:[%s4558_s1 + $0x11] ss:$0 sm:$0xff]  ;;  %v2982_v52 = vld [vmem:[%s4558_s1 + $0x12] ss:$0 sm:$0xff] }
  0x24   : > { %4768 = vst [vmem:[#allocation20_spill] sm:$0xff] %v2977_v49  ;;  %4769 = vst [vmem:[#allocation21_spill] sm:$0xff] %v2982_v52 }
  0x25   : > { %v605_v6 = vadd.f32 %v597_v53, %v576_v59  ;;  %v519_v8 = vadd.f32 %v511_v55, %v490_v61  ;;  %v2987_v53 = vld [vmem:[%s4558_s1 + $0x13] ss:$0 sm:$0xff]  ;;  %v686_v55 = vmul.f32 %v2970_v46, %v2913_v4  ;;  %v2994_v59 = vld [vmem:[%s4558_s1 + $0x14] ss:$0 sm:$0xff] }
  0x26   : > { %4770 = vst [vmem:[#allocation22_spill] sm:$0xff] %v2994_v59 }
  0x27   : > { %v634_v14 = vadd.f32 %v626_v60, %v605_v6  ;;  %v549_v18 = vadd.f32 %v541_v62, %v519_v8  ;;  %v2997_v60 = vld [vmem:[%s2786_s16 + $0x36] sm:$0xff]  ;;  %v801_v62 = vmul.f32 %v2967_v42, %v2821_v21  ;;  %v3004_v6 = vld [vmem:[%s4558_s1 + $0x15] ss:$0 sm:$0xff] }
  0x28   : > { %4771 = vst [vmem:[#allocation23_spill] sm:$0xff] %v2997_v60  ;;  %4772 = vst [vmem:[#allocation24_spill] sm:$0xff] %v3004_v6  ;;  %v3014_v8 = vld [vmem:[%s4558_s1 + $0x17] ss:$0 sm:$0xff] }
  0x29   : > { %v663_v27 = vadd.f32 %v655_v7, %v634_v14  ;;  %v578_v29 = vadd.f32 %v570_v9, %v549_v18  ;;  %v3009_v7 = vld [vmem:[%s4558_s1 + $0x16] ss:$0 sm:$0xff]  ;;  %4774 = vst [vmem:[#allocation26_spill] sm:$0xff] %v3014_v8  ;;  %v715_v14 = vmul.f32 %v2997_v60, %v2928_v11  ;;  %v859_v18 = vmul.f32 %v2982_v52, %v2845_v31  ;;  %v3078_v11 = vld [vmem:[%s4558_s1 + $0x1d] ss:$0 sm:$0xff] }
  0x2a   : > { %4773 = vst [vmem:[#allocation25_spill] sm:$0xff] %v3009_v7  ;;  %4782 = vst [vmem:[#allocation34_spill] sm:$0xff] %v3078_v11 }
  0x2b   : > { %v692_v35 = vadd.f32 %v684_v15, %v663_v27  ;;  %v607_v40 = vadd.f32 %v599_v19, %v578_v29  ;;  %v830_v15 = vmul.f32 %v2977_v49, %v2830_v24  ;;  %v888_v19 = vmul.f32 %v2987_v53, %v2859_v38  ;;  %v3027_v27 = vld [vmem:[%s4558_s1 + $0x18] ss:$0 sm:$0xff]  ;;  %v3081_v38 = vld [vmem:[%s2786_s16 + $0x42] sm:$0xff] }
  0x2c   : > { %4775 = vst [vmem:[#allocation27_spill] sm:$0xff] %v3027_v27  ;;  %v336_v29 = vmul.f32 %v2851_v36, %v2771_v0  ;;  %4783 = vst [vmem:[#allocation35_spill] sm:$0xff] %v3081_v38 }
  0x2d   : > { %v721_v47 = vadd.f32 %v713_v28, %v692_v35  ;;  %v636_v54 = vadd.f32 %v628_v32, %v607_v40  ;;  %v3030_v28 = vld [vmem:[%s2786_s16 + $0x40] sm:$0xff]  ;;  %v917_v35 = vmul.f32 %v2994_v59, %v2874_v45  ;;  %v3044_v40 = vld [vmem:[%s4558_s1 + $0x1a] ss:$0 sm:$0xff]  ;;  %v3073_v45 = vld [vmem:[%s4558_s1 + $0x1c] ss:$0 sm:$0xff] }
  0x2e   : > { %4776 = vst [vmem:[#allocation28_spill] sm:$0xff] %v3030_v28  ;;  %4778 = vst [vmem:[#allocation30_spill] sm:$0xff] %v3044_v40  ;;  %v745_v36 = vmul.f32 %v3030_v28, %v2943_v25 }
  0x2f   : > { %v751_v61 = vadd.f32 %v743_v39, %v721_v47  ;;  %v665_v9 = vadd.f32 %v657_v41, %v636_v54  ;;  %v3039_v39 = vld [vmem:[%s4558_s1 + $0x19] ss:$0 sm:$0xff]  ;;  %v3047_v41 = vld [vmem:[%s2786_s16 + $0x41] sm:$0xff]  ;;  %v3057_v54 = vmul.f32 %v3009_v7, %v2916_v5  ;;  %4781 = vst [vmem:[#allocation33_spill] sm:$0xff] %v3073_v45  ;;  %v3097_v5 = vmul.f32 %v3044_v40, %v2970_v46  ;;  %v3117_v46 = vld [vmem:[%s4558_s1 + $0x20] ss:$0 sm:$0xff] }
  0x30   : > { %4777 = vst [vmem:[#allocation29_spill] sm:$0xff] %v3039_v39  ;;  %4779 = vst [vmem:[#allocation31_spill] sm:$0xff] %v3047_v41 }
  0x31   : > { %v780_v32 = vadd.f32 %v772_v48, %v751_v61  ;;  %v694_v47 = vadd.f32 %v686_v55, %v665_v9  ;;  %v3053_v48 = vmul.f32 %v3004_v6, %v2901_v58  ;;  %v3061_v61 = vmul.f32 %v3014_v8, %v2931_v13  ;;  %v3066_v55 = vld [vmem:[%s4558_s1 + $0x1b] ss:$0 sm:$0xff]  ;;  %4784 = vst [vmem:[#allocation36_spill] sm:$0xff] %v3097_v5 }
  0x32   : > { %4780 = vst [vmem:[#allocation32_spill] sm:$0xff] %v3066_v55  ;;  %v774_v9 = vmul.f32 %v3047_v41, %v2955_v33  ;;  %v365_v13 = vmul.f32 %v2866_v43, %v2776_v1  ;;  %v394_v33 = vmul.f32 %v2881_v50, %v2781_v2  ;;  %v3102_v43 = vld [vmem:[%s4558_s1 + $0x1e] ss:$0 sm:$0xff]  ;;  %v803_v50 = vmul.f32 %v3081_v38, %v2967_v42 }
  0x33   : > { %v809_v25 = vadd.f32 %v801_v62, %v780_v32  ;;  %v723_v4 = vadd.f32 %v715_v14, %v694_v47  ;;  %v3089_v62 = vmul.f32 %v3027_v27, %v2946_v26  ;;  %v3093_v32 = vmul.f32 %v3039_v39, %v2958_v34  ;;  %4785 = vst [vmem:[#allocation37_spill] sm:$0xff] %v3102_v43  ;;  %v3107_v47 = vld [vmem:[%s2786_s16 + $0x43] sm:$0xff]  ;;  %v3112_v34 = vld [vmem:[%s4558_s1 + $0x1f] ss:$0 sm:$0xff] }
  0x34   : > { %4786 = vst [vmem:[#allocation38_spill] sm:$0xff] %v3107_v47  ;;  %v373_v5 = vadd.f32 %v365_v13, %v336_v29  ;;  %v423_v2 = vmul.f32 %v2893_v56, %v2791_v3  ;;  %v3131_v42 = vmul.f32 %v3078_v11, %v3047_v41  ;;  %v832_v56 = vmul.f32 %v3107_v47, %v2977_v49  ;;  %v3141_v29 = vld [vmem:[%s4558_s1 + $0x21] ss:$0 sm:$0xff]  ;;  %v3151_v41 = vld [vmem:[%s4558_s1 + $0x23] ss:$0 sm:$0xff] }
  0x35   : > { %v838_v14 = vadd.f32 %v830_v15, %v809_v25  ;;  %v753_v26 = vadd.f32 %v745_v36, %v723_v4  ;;  %v3123_v25 = vmul.f32 %v3066_v55, %v2997_v60  ;;  %v3127_v15 = vmul.f32 %v3073_v45, %v3030_v28  ;;  %v3134_v4 = vld [vmem:[%s2786_s16 + $0x44] sm:$0xff]  ;;  %4790 = vst [vmem:[#allocation42_spill] sm:$0xff] %v3141_v29  ;;  %v3146_v36 = vld [vmem:[%s4558_s1 + $0x22] ss:$0 sm:$0xff] }
  0x36   : > { %4788 = vst [vmem:[#allocation40_spill] sm:$0xff] %v3131_v42  ;;  %4789 = vst [vmem:[#allocation41_spill] sm:$0xff] %v3134_v4  ;;  %v402_v60 = vadd.f32 %v394_v33, %v373_v5  ;;  %v3161_v49 = vmul.f32 %v3112_v34, %v3107_v47  ;;  %v3165_v42 = vmul.f32 %v3117_v46, %v3134_v4  ;;  %v3174_v5 = vld [vmem:[%s2786_s16 + $0x50] sm:$0xff]  ;;  %v3186_v47 = vld [vmem:[%s4558_s1 + $0x25] ss:$0 sm:$0xff] }
  0x37   : > { %4787 = vst [vmem:[#allocation39_spill] sm:$0xff] %v3127_v15  ;;  %v867_v13 = vadd.f32 %v859_v18, %v838_v14  ;;  %4791 = vst [vmem:[#allocation43_spill] sm:$0xff] %v3146_v36  ;;  %v782_v28 = vadd.f32 %v774_v9, %v753_v26  ;;  %v452_v18 = vmul.f32 %v2908_v63, %v2804_v12  ;;  %v3168_v15 = vld [vmem:[%s2786_s16 + $0x45] sm:$0xff]  ;;  %v3181_v9 = vld [vmem:[%s4558_s1 + $0x24] ss:$0 sm:$0xff] }
  0x38   : > { %4792 = vst [vmem:[#allocation44_spill] sm:$0xff] %v3151_v41  ;;  %v3157_v14 = vmul.f32 %v3102_v43, %v3081_v38  ;;  %4794 = vst [vmem:[#allocation46_spill] sm:$0xff] %v3161_v49  ;;  %v3171_v26 = vld [vmem:[%s2786_s16 + $0x46] sm:$0xff]  ;;  %v861_v63 = vmul.f32 %v3134_v4, %v2982_v52  ;;  %v431_v49 = vadd.f32 %v423_v2, %v402_v60 }
  0x39   : > { %4795 = vst [vmem:[#allocation47_spill] sm:$0xff] %v3165_v42  ;;  %4796 = vst [vmem:[#allocation48_spill] sm:$0xff] %v3168_v15  ;;  %v896_v33 = vadd.f32 %v888_v19, %v867_v13  ;;  %v3191_v38 = vld [vmem:[%s4558_s1 + $0x26] ss:$0 sm:$0xff]  ;;  %v811_v42 = vadd.f32 %v803_v50, %v782_v28  ;;  %v481_v19 = vmul.f32 %v2923_v10, %v2811_v16  ;;  %v3213_v10 = vld [vmem:[%s2786_s16 + $0x52] sm:$0xff] }
  0x3a   : > { %4793 = vst [vmem:[#allocation45_spill] sm:$0xff] %v3157_v14  ;;  %4797 = vst [vmem:[#allocation49_spill] sm:$0xff] %v3171_v26  ;;  %v3197_v13 = vmul.f32 %v3141_v29, %v3168_v15  ;;  %v3201_v4 = vmul.f32 %v3146_v36, %v3171_v26  ;;  %v3205_v52 = vmul.f32 %v3151_v41, %v3174_v5  ;;  %v3208_v14 = vld [vmem:[%s2786_s16 + $0x51] sm:$0xff]  ;;  %v3221_v50 = vld [vmem:[%s4558_s1 + $0x27] ss:$0 sm:$0xff] }
  0x3b   : > { %4798 = vst [vmem:[#allocation50_spill] sm:$0xff] %v3174_v5  ;;  %4799 = vst [vmem:[#allocation51_spill] sm:$0xff] %v3181_v9  ;;  %v890_v2 = vmul.f32 %v3168_v15, %v2987_v53  ;;  %v925_v60 = vadd.f32 %v917_v35, %v896_v33  ;;  %v3216_v28 = vld [vmem:[%s2786_s16 + $0x53] sm:$0xff]  ;;  %v3227_v15 = vmul.f32 %v3181_v9, %v3208_v14 }
  0x3c   : > { %4800 = vst [vmem:[#allocation52_spill] sm:$0xff] %v3186_v47  ;;  %4801 = vst [vmem:[#allocation53_spill] sm:$0xff] %v3191_v38  ;;  %v3231_v35 = vmul.f32 %v3186_v47, %v3213_v10  ;;  %v3235_v33 = vmul.f32 %v3191_v38, %v3216_v28 }
  0x3d   : > { %4802 = vst [vmem:[#allocation54_spill] sm:$0xff] %v3197_v13  ;;  %4803 = vst [vmem:[#allocation55_spill] sm:$0xff] %v3201_v4  ;;  %v840_v4 = vadd.f32 %v832_v56, %v811_v42  ;;  %v460_v13 = vadd.f32 %v452_v18, %v431_v49  ;;  %v919_v42 = vmul.f32 %v3171_v26, %v2994_v59  ;;  %v3241_v56 = vld [vmem:[%s2786_s16 + $0x54] sm:$0xff]  ;;  %v3251_v18 = vld [vmem:[%s4558_s1 + $0x29] ss:$0 sm:$0xff] }
  0x3e   : > { %4804 = vst [vmem:[#allocation56_spill] sm:$0xff] %v3205_v52  ;;  %4805 = vst [vmem:[#allocation57_spill] sm:$0xff] %v3208_v14  ;;  %v510_v52 = vmul.f32 %v2938_v22, %v2827_v23  ;;  %v955_v49 = vadd.f32 %v3053_v48, %v925_v60  ;;  %v3246_v22 = vld [vmem:[%s4558_s1 + $0x28] ss:$0 sm:$0xff]  ;;  %v3257_v48 = vmul.f32 %v3221_v50, %v3241_v56  ;;  %v3260_v60 = vld [vmem:[%s2786_s16 + $0x55] sm:$0xff] }
  0x3f   : > { %4806 = vst [vmem:[#allocation58_spill] sm:$0xff] %v3213_v10  ;;  %4807 = vst [vmem:[#allocation59_spill] sm:$0xff] %v3216_v28  ;;  %v3263_v26 = vld [vmem:[%s2786_s16 + $0x56] sm:$0xff]  ;;  %v949_v59 = vmul.f32 %v3174_v5, %v3004_v6  ;;  %v598_v6 = vmul.f32 %v2821_v21, %v2871_v44  ;;  %v3339_v21 = vld [vmem:[%s4558_s1 + $0x2e] ss:$0 sm:$0xff] }
  0x40   : > { %4808 = vst [vmem:[#allocation60_spill] sm:$0xff] %v3221_v50  ;;  %4809 = vst [vmem:[#allocation61_spill] sm:$0xff] %v3227_v15  ;;  %v489_v15 = vadd.f32 %v481_v19, %v460_v13  ;;  %v3275_v19 = vld [vmem:[%s4558_s1 + $0x2a] ss:$0 sm:$0xff]  ;;  %v3280_v13 = vld [vmem:[%s4558_s1 + $0x2b] ss:$0 sm:$0xff] }
  0x41   : > { %4810 = vst [vmem:[#allocation62_spill] sm:$0xff] %v3231_v35  ;;  %4811 = vst [vmem:[#allocation63_spill] sm:$0xff] %v3235_v33  ;;  %v869_v35 = vadd.f32 %v861_v63, %v840_v4  ;;  %v540_v33 = vmul.f32 %v2814_v17, %v2842_v30  ;;  %v978_v4 = vmul.f32 %v3208_v14, %v3009_v7 }
  0x42   : > { %4812 = vst [vmem:[#allocation64_spill] sm:$0xff] %v3241_v56  ;;  %4813 = vst [vmem:[#allocation65_spill] sm:$0xff] %v3246_v22  ;;  %v1007_v17 = vmul.f32 %v3213_v10, %v3014_v8  ;;  %v984_v63 = vadd.f32 %v3057_v54, %v955_v49  ;;  %v518_v5 = vadd.f32 %v510_v52, %v489_v15  ;;  %v3298_v8 = vld [vmem:[%s2786_s16 + $0x60] sm:$0xff] }
  0x43   : > { %4814 = vst [vmem:[#allocation66_spill] sm:$0xff] %v3251_v18  ;;  %4815 = vst [vmem:[#allocation67_spill] sm:$0xff] %v3257_v48  ;;  %v3285_v48 = vld [vmem:[%s4558_s1 + $0x2c] ss:$0 sm:$0xff]  ;;  %v898_v14 = vadd.f32 %v890_v2, %v869_v35  ;;  %v569_v54 = vmul.f32 %v2818_v20, %v2856_v37  ;;  %v3291_v49 = vmul.f32 %v3246_v22, %v3260_v60  ;;  %v3306_v20 = vld [vmem:[%s2786_s16 + $0x61] sm:$0xff] }
  0x44   : > { %4816 = vst [vmem:[#allocation68_spill] sm:$0xff] %v3260_v60  ;;  %4817 = vst [vmem:[#allocation69_spill] sm:$0xff] %v3263_v26  ;;  %v3295_v10 = vmul.f32 %v3251_v18, %v3263_v26  ;;  %v1036_v7 = vmul.f32 %v3216_v28, %v3027_v27  ;;  %v1065_v52 = vmul.f32 %v3241_v56, %v3039_v39  ;;  %v3309_v2 = vld [vmem:[%s2786_s16 + $0x62] sm:$0xff]  ;;  %v3314_v35 = vld [vmem:[%s4558_s1 + $0x2d] ss:$0 sm:$0xff] }
  0x45   : > { %4818 = vst [vmem:[#allocation70_spill] sm:$0xff] %v3275_v19  ;;  %4819 = vst [vmem:[#allocation71_spill] sm:$0xff] %v3280_v13  ;;  %v1013_v15 = vadd.f32 %v3061_v61, %v984_v63  ;;  %v3320_v56 = vmul.f32 %v3275_v19, %v3298_v8  ;;  %v3324_v61 = vmul.f32 %v3280_v13, %v3306_v20  ;;  %v4843_v28 = vld [vmem:[#allocation6_spill] sm:$0xff] }
  0x46   : > { %4820 = vst [vmem:[#allocation72_spill] sm:$0xff] %v3285_v48  ;;  %4821 = vst [vmem:[#allocation73_spill] sm:$0xff] %v3291_v49  ;;  %v548_v49 = vadd.f32 %v540_v33, %v518_v5  ;;  %v3328_v63 = vmul.f32 %v3285_v48, %v3309_v2  ;;  %v3334_v33 = vld [vmem:[%s2786_s16 + $0x63] sm:$0xff] }
  0x47   : > { %4822 = vst [vmem:[#allocation74_spill] sm:$0xff] %v3295_v10  ;;  %4823 = vst [vmem:[#allocation75_spill] sm:$0xff] %v3298_v8  ;;  %v927_v10 = vadd.f32 %v919_v42, %v898_v14  ;;  %v1094_v14 = vmul.f32 %v3260_v60, %v3044_v40  ;;  %v1042_v5 = vadd.f32 %v3089_v62, %v1013_v15  ;;  %v3397_v27 = vld [vmem:[%s2786_s16 + $0x66] sm:$0xff] }
  0x48   : > { %4824 = vst [vmem:[#allocation76_spill] sm:$0xff] %v3306_v20  ;;  %4825 = vst [vmem:[#allocation77_spill] sm:$0xff] %v3309_v2  ;;  %v1123_v62 = vmul.f32 %v3263_v26, %v3066_v55  ;;  %v1153_v15 = vmul.f32 %v3298_v8, %v3073_v45  ;;  %v3353_v60 = vmul.f32 %v3306_v20, %v3078_v11  ;;  %v4837_v26 = vld [vmem:[#allocation4_spill] sm:$0xff]  ;;  %v4838_v11 = vld [vmem:[#allocation13_spill] sm:$0xff] }
  0x49   : > { %4826 = vst [vmem:[#allocation78_spill] sm:$0xff] %v3314_v35  ;;  %4827 = vst [vmem:[#allocation79_spill] sm:$0xff] %v3320_v56  ;;  %v957_v42 = vadd.f32 %v949_v59, %v927_v10  ;;  %v577_v56 = vadd.f32 %v569_v54, %v548_v49  ;;  %v1071_v59 = vadd.f32 %v3093_v32, %v1042_v5  ;;  %v3357_v10 = vld [vmem:[%s2786_s16 + $0x64] sm:$0xff]  ;;  %v4839_v55 = vld [vmem:[#allocation36_spill] sm:$0xff] }
  0x4a   : > { %4828 = vst [vmem:[#allocation80_spill] sm:$0xff] %v3324_v61  ;;  %4829 = vst [vmem:[#allocation81_spill] sm:$0xff] %v3328_v63  ;;  %v627_v61 = vmul.f32 %v2830_v24, %v2886_v51  ;;  %v3345_v63 = vmul.f32 %v3314_v35, %v3334_v33  ;;  %v3362_v24 = vld [vmem:[%s4558_s1 + $0x2f] ss:$0 sm:$0xff]  ;;  %v3368_v8 = vmul.f32 %v3339_v21, %v3357_v10 }
  0x4b   : > { %4830 = vst [vmem:[#allocation82_spill] sm:$0xff] %v3334_v33  ;;  %4831 = vst [vmem:[#allocation83_spill] sm:$0xff] %v3339_v21  ;;  %v986_v54 = vadd.f32 %v978_v4, %v957_v42  ;;  %v606_v49 = vadd.f32 %v598_v6, %v577_v56  ;;  %v338_v32 = vmul.f32 %v2901_v58, %v2771_v0  ;;  %v4836_v5 = vld [vmem:[#allocation11_spill] sm:$0xff] }
  0x4c   : > { %4832 = vst [vmem:[#allocation84_spill] sm:$0xff] %v3345_v63  ;;  %4833 = vst [vmem:[#allocation85_spill] sm:$0xff] %v3357_v10  ;;  %v656_v63 = vmul.f32 %v2845_v31, %v2898_v57  ;;  %v367_v20 = vmul.f32 %v4836_v5, %v2776_v1  ;;  %v396_v45 = vmul.f32 %v4838_v11, %v4837_v26  ;;  %v3378_v6 = vld [vmem:[%s2786_s16 + $0x65] sm:$0xff]  ;;  %v3383_v31 = vld [vmem:[%s4558_s1 + $0x30] ss:$0 sm:$0xff] }
  0x4d   : > { %4834 = vst [vmem:[#allocation86_spill] sm:$0xff] %v3362_v24  ;;  %4835 = vst [vmem:[#allocation87_spill] sm:$0xff] %v3368_v8  ;;  %v1100_v4 = vadd.f32 %v4839_v55, %v1071_v59  ;;  %v1015_v56 = vadd.f32 %v1007_v17, %v986_v54  ;;  %v635_v42 = vadd.f32 %v627_v61, %v606_v49  ;;  %v4842_v8 = vld [vmem:[#allocation10_spill] sm:$0xff]  ;;  %v4845_v59 = vld [vmem:[#allocation15_spill] sm:$0xff] }
  0x4e   : > { %4840 = vst [vmem:[#allocation11_spill] sm:$0xff] %v3378_v6  ;;  %4841 = vst [vmem:[#allocation13_spill] sm:$0xff] %v3383_v31  ;;  %v685_v40 = vmul.f32 %v4843_v28, %v4842_v8  ;;  %v3389_v39 = vmul.f32 %v3362_v24, %v3378_v6  ;;  %v1211_v26 = vmul.f32 %v3309_v2, %v3102_v43  ;;  %v4847_v54 = vld [vmem:[#allocation12_spill] sm:$0xff]  ;;  %v4850_v2 = vld [vmem:[#allocation17_spill] sm:$0xff] }
  0x4f   : > { %v375_v55 = vadd.f32 %v367_v20, %v338_v32  ;;  %v425_v1 = vmul.f32 %v4845_v59, %v2791_v3  ;;  %v1129_v0 = vadd.f32 %v3123_v25, %v1100_v4  ;;  %4846 = vst [vmem:[#allocation6_spill] sm:$0xff] %v3397_v27  ;;  %v1044_v17 = vadd.f32 %v1036_v7, %v1015_v56  ;;  %v4848_v49 = vld [vmem:[#allocation8_spill] sm:$0xff]  ;;  %v4851_v25 = vld [vmem:[#allocation39_spill] sm:$0xff] }
  0x50   : > { %4844 = vst [vmem:[#allocation36_spill] sm:$0xff] %v3389_v39  ;;  %v664_v61 = vadd.f32 %v656_v63, %v635_v42  ;;  %v714_v28 = vmul.f32 %v4848_v49, %v4847_v54  ;;  %v3403_v39 = vmul.f32 %v3383_v31, %v3397_v27  ;;  %v1240_v20 = vmul.f32 %v3334_v33, %v3112_v34  ;;  %v4852_v63 = vld [vmem:[#allocation14_spill] sm:$0xff] }
  0x51   : > { %v404_v32 = vadd.f32 %v396_v45, %v375_v55  ;;  %v454_v43 = vmul.f32 %v4850_v2, %v2804_v12  ;;  %v1159_v4 = vadd.f32 %v4851_v25, %v1129_v0  ;;  %v1073_v3 = vadd.f32 %v1065_v52, %v1044_v17  ;;  %v4853_v55 = vld [vmem:[#allocation19_spill] sm:$0xff]  ;;  %v4854_v0 = vld [vmem:[#allocation40_spill] sm:$0xff] }
  0x52   : > { %4849 = vst [vmem:[#allocation15_spill] sm:$0xff] %v3403_v39  ;;  %v693_v7 = vadd.f32 %v685_v40, %v664_v61  ;;  %v744_v56 = vmul.f32 %v2901_v58, %v4852_v63  ;;  %v3414_v42 = vmul.f32 %v3357_v10, %v3117_v46  ;;  %v3418_v49 = vmul.f32 %v3378_v6, %v3141_v29  ;;  %v3424_v17 = vld [vmem:[%s2786_s16 + $0x70] sm:$0xff]  ;;  %v4905_v29 = vld [vmem:[#allocation67_spill] sm:$0xff] }
  0x53   : > { %v433_v45 = vadd.f32 %v425_v1, %v404_v32  ;;  %v483_v39 = vmul.f32 %v4853_v55, %v2811_v16  ;;  %v1188_v52 = vadd.f32 %v4854_v0, %v1159_v4  ;;  %v1102_v40 = vadd.f32 %v1094_v14, %v1073_v3  ;;  %4855 = vst [vmem:[#allocation8_spill] sm:$0xff] %v3424_v17  ;;  %v4856_v61 = vld [vmem:[#allocation16_spill] sm:$0xff]  ;;  %v4857_v4 = vld [vmem:[#allocation23_spill] sm:$0xff]  ;;  %v4858_v14 = vld [vmem:[#allocation45_spill] sm:$0xff] }
  0x54   : > { %v722_v58 = vadd.f32 %v714_v28, %v693_v7  ;;  %v773_v25 = vmul.f32 %v4836_v5, %v4856_v61  ;;  %v3430_v10 = vmul.f32 %v3397_v27, %v3146_v36  ;;  %v3434_v1 = vmul.f32 %v3151_v41, %v3424_v17  ;;  %v3440_v7 = vld [vmem:[%s2786_s16 + $0x71] sm:$0xff]  ;;  %v4861_v27 = vld [vmem:[#allocation18_spill] sm:$0xff] }
  0x55   : > { %v462_v32 = vadd.f32 %v454_v43, %v433_v45  ;;  %v512_v3 = vmul.f32 %v4857_v4, %v2827_v23  ;;  %v1217_v0 = vadd.f32 %v4858_v14, %v1188_v52  ;;  %v1131_v28 = vadd.f32 %v1123_v62, %v1102_v40  ;;  %4859 = vst [vmem:[#allocation17_spill] sm:$0xff] %v3440_v7  ;;  %v3443_v5 = vld [vmem:[%s2786_s16 + $0x72] sm:$0xff]  ;;  %v4863_v40 = vld [vmem:[#allocation46_spill] sm:$0xff] }
  0x56   : > { %4860 = vst [vmem:[#allocation39_spill] sm:$0xff] %v3443_v5  ;;  %v752_v6 = vadd.f32 %v744_v56, %v722_v58  ;;  %v802_v36 = vmul.f32 %v4838_v11, %v4861_v27  ;;  %v3449_v17 = vmul.f32 %v3181_v9, %v3440_v7  ;;  %v3453_v43 = vmul.f32 %v3186_v47, %v3443_v5  ;;  %v4862_v62 = vld [vmem:[#allocation28_spill] sm:$0xff] }
  0x57   : > { %v491_v45 = vadd.f32 %v483_v39, %v462_v32  ;;  %v542_v52 = vmul.f32 %v4862_v62, %v2842_v30  ;;  %v1246_v14 = vadd.f32 %v4863_v40, %v1217_v0  ;;  %v1161_v56 = vadd.f32 %v1153_v15, %v1131_v28  ;;  %v3459_v58 = vld [vmem:[%s2786_s16 + $0x73] sm:$0xff]  ;;  %v4867_v15 = vld [vmem:[#allocation31_spill] sm:$0xff] }
  0x58   : > { %4864 = vst [vmem:[#allocation19_spill] sm:$0xff] %v3459_v58  ;;  %v3462_v11 = vld [vmem:[%s2786_s16 + $0x74] sm:$0xff]  ;;  %v781_v41 = vadd.f32 %v773_v25, %v752_v6  ;;  %v3468_v5 = vmul.f32 %v3191_v38, %v3459_v58  ;;  %v571_v0 = vmul.f32 %v4867_v15, %v2856_v37  ;;  %v4868_v28 = vld [vmem:[#allocation47_spill] sm:$0xff] }
  0x59   : > { %4865 = vst [vmem:[#allocation40_spill] sm:$0xff] %v3462_v11  ;;  %v4866_v7 = vld [vmem:[#allocation20_spill] sm:$0xff]  ;;  %v3472_v39 = vmul.f32 %v3221_v50, %v3462_v11  ;;  %v520_v32 = vadd.f32 %v512_v3, %v491_v45  ;;  %v1275_v40 = vadd.f32 %v4868_v28, %v1246_v14  ;;  %v1190_v6 = vadd.f32 %v3353_v60, %v1161_v56  ;;  %v4871_v38 = vld [vmem:[#allocation21_spill] sm:$0xff]  ;;  %v4872_v60 = vld [vmem:[#allocation35_spill] sm:$0xff] }
  0x5a   : > { %v831_v9 = vmul.f32 %v4845_v59, %v4866_v7  ;;  %v3479_v25 = vld [vmem:[%s2786_s16 + $0x75] sm:$0xff]  ;;  %v810_v58 = vadd.f32 %v802_v36, %v781_v41  ;;  %v860_v47 = vmul.f32 %v4850_v2, %v4871_v38  ;;  %v600_v14 = vmul.f32 %v4872_v60, %v2871_v44  ;;  %v4873_v56 = vld [vmem:[#allocation54_spill] sm:$0xff] }
  0x5b   : > { %4869 = vst [vmem:[#allocation16_spill] sm:$0xff] %v3479_v25  ;;  %v3482_v59 = vld [vmem:[%s2786_s16 + $0x76] sm:$0xff]  ;;  %v3488_v11 = vmul.f32 %v3246_v22, %v3479_v25  ;;  %v550_v45 = vadd.f32 %v542_v52, %v520_v32  ;;  %v1304_v28 = vadd.f32 %v4873_v56, %v1275_v40  ;;  %v1219_v41 = vadd.f32 %v1211_v26, %v1190_v6  ;;  %v3498_v36 = vld [vmem:[%s2786_s16 + $0x80] sm:$0xff]  ;;  %v4877_v6 = vld [vmem:[#allocation55_spill] sm:$0xff] }
  0x5c   : > { %4870 = vst [vmem:[#allocation23_spill] sm:$0xff] %v3482_v59  ;;  %v3492_v3 = vmul.f32 %v3251_v18, %v3482_v59  ;;  %4874 = vst [vmem:[#allocation45_spill] sm:$0xff] %v3498_v36  ;;  %v3501_v2 = vld [vmem:[%s2786_s16 + $0x81] sm:$0xff]  ;;  %v839_v50 = vadd.f32 %v831_v9, %v810_v58  ;;  %v889_v25 = vmul.f32 %v4853_v55, %v2987_v53 }
  0x5d   : > { %4875 = vst [vmem:[#allocation18_spill] sm:$0xff] %v3501_v2  ;;  %v3507_v59 = vmul.f32 %v3275_v19, %v3498_v36  ;;  %v3511_v52 = vmul.f32 %v3280_v13, %v3501_v2  ;;  %v579_v32 = vadd.f32 %v571_v0, %v550_v45  ;;  %v4876_v26 = vld [vmem:[#allocation38_spill] sm:$0xff]  ;;  %v1333_v56 = vadd.f32 %v4877_v6, %v1304_v28 }
  0x5e   : > { %v629_v40 = vmul.f32 %v4876_v26, %v2886_v51  ;;  %v1248_v9 = vadd.f32 %v1240_v20, %v1219_v41  ;;  %v3517_v58 = vld [vmem:[%s2786_s16 + $0x82] sm:$0xff]  ;;  %v868_v18 = vadd.f32 %v860_v47, %v839_v50  ;;  %v4882_v20 = vld [vmem:[#allocation41_spill] sm:$0xff]  ;;  %v4883_v41 = vld [vmem:[#allocation56_spill] sm:$0xff] }
  0x5f   : > { %4878 = vst [vmem:[#allocation28_spill] sm:$0xff] %v3517_v58  ;;  %v3520_v55 = vld [vmem:[%s2786_s16 + $0x83] sm:$0xff]  ;;  %v3526_v2 = vmul.f32 %v3285_v48, %v3517_v58  ;;  %v608_v45 = vadd.f32 %v600_v14, %v579_v32  ;;  %v658_v28 = vmul.f32 %v4882_v20, %v2898_v57  ;;  %v1363_v6 = vadd.f32 %v4883_v41, %v1333_v56  ;;  %v4886_v48 = vld [vmem:[#allocation24_spill] sm:$0xff]  ;;  %v4890_v41 = vld [vmem:[#allocation61_spill] sm:$0xff] }
  0x60   : > { %4879 = vst [vmem:[#allocation46_spill] sm:$0xff] %v3520_v55  ;;  %v4880_v36 = vld [vmem:[#allocation22_spill] sm:$0xff]  ;;  %v3530_v0 = vmul.f32 %v3314_v35, %v3520_v55  ;;  %v1277_v47 = vadd.f32 %v3414_v42, %v1248_v9  ;;  %v897_v58 = vadd.f32 %v889_v25, %v868_v18  ;;  %v948_v13 = vmul.f32 %v4862_v62, %v4886_v48  ;;  %v4889_v42 = vld [vmem:[#allocation48_spill] sm:$0xff]  ;;  %v4892_v35 = vld [vmem:[#allocation25_spill] sm:$0xff] }
  0x61   : > { %v918_v19 = vmul.f32 %v4857_v4, %v4880_v36  ;;  %v3537_v50 = vld [vmem:[%s2786_s16 + $0x84] sm:$0xff]  ;;  %v637_v56 = vadd.f32 %v629_v40, %v608_v45  ;;  %v687_v9 = vmul.f32 %v4889_v42, %v4842_v8  ;;  %v1392_v55 = vadd.f32 %v4890_v41, %v1363_v6  ;;  %v4895_v6 = vld [vmem:[#allocation49_spill] sm:$0xff] }
  0x62   : > { %4881 = vst [vmem:[#allocation20_spill] sm:$0xff] %v3530_v0  ;;  %4884 = vst [vmem:[#allocation31_spill] sm:$0xff] %v3537_v50  ;;  %v3540_v4 = vld [vmem:[%s2786_s16 + $0x85] sm:$0xff]  ;;  %v3546_v14 = vmul.f32 %v3339_v21, %v3537_v50  ;;  %v1306_v18 = vadd.f32 %v3418_v49, %v1277_v47  ;;  %v977_v50 = vmul.f32 %v4867_v15, %v4892_v35 }
  0x63   : > { %4885 = vst [vmem:[#allocation47_spill] sm:$0xff] %v3540_v4  ;;  %v3550_v32 = vmul.f32 %v3362_v24, %v3540_v4  ;;  %v3557_v25 = vld [vmem:[%s2786_s16 + $0x86] sm:$0xff]  ;;  %v926_v62 = vadd.f32 %v918_v19, %v897_v58  ;;  %v666_v24 = vadd.f32 %v658_v28, %v637_v56  ;;  %v716_v49 = vmul.f32 %v4895_v6, %v4847_v54 }
  0x64   : > { %4887 = vst [vmem:[#allocation21_spill] sm:$0xff] %v3546_v14  ;;  %4891 = vst [vmem:[#allocation54_spill] sm:$0xff] %v3557_v25  ;;  %v326_v21 = vld [vmem:[%s2786_s16 + $0x40] sm:$0xff]  ;;  %v3565_v4 = vmul.f32 %v3383_v31, %v3557_v25  ;;  %v1335_v58 = vadd.f32 %v3430_v10, %v1306_v18  ;;  %v4900_v56 = vld [vmem:[#allocation3_spill] sm:$0xff] }
  0x65   : > { %4888 = vst [vmem:[#allocation35_spill] sm:$0xff] %v3550_v32  ;;  %v355_v22 = vld [vmem:[%s2786_s16 + $0x41] sm:$0xff]  ;;  %v956_v15 = vadd.f32 %v948_v13, %v926_v62  ;;  %v695_v25 = vadd.f32 %v687_v9, %v666_v24  ;;  %v4902_v10 = vld [vmem:[#allocation4_spill] sm:$0xff] }
  0x66   : > { %4893 = vst [vmem:[#allocation38_spill] sm:$0xff] %v3565_v4  ;;  %v4894_v40 = vld [vmem:[#allocation26_spill] sm:$0xff]  ;;  %v4897_v32 = vld [vmem:[#allocation27_spill] sm:$0xff]  ;;  %v368_v8 = vmul.f32 %v4900_v56, %v355_v22 }
  0x67   : > { %v1006_v45 = vmul.f32 %v4872_v60, %v4894_v40  ;;  %v384_v47 = vld [vmem:[%s2786_s16 + $0x42] sm:$0xff]  ;;  %v1035_v14 = vmul.f32 %v4876_v26, %v4897_v32  ;;  %v724_v62 = vadd.f32 %v716_v49, %v695_v25  ;;  %v4903_v26 = vld [vmem:[#allocation57_spill] sm:$0xff] }
  0x68   : > { %v4896_v41 = vld [vmem:[#allocation62_spill] sm:$0xff]  ;;  %v4901_v54 = vld [vmem:[#allocation63_spill] sm:$0xff]  ;;  %v397_v13 = vmul.f32 %v4902_v10, %v384_v47  ;;  %v775_v24 = vmul.f32 %v4903_v26, %v4856_v61 }
  0x69   : > { %v1421_v19 = vadd.f32 %v4896_v41, %v1392_v55  ;;  %v413_v0 = vld [vmem:[%s2786_s16 + $0x43] sm:$0xff]  ;;  %v1365_v55 = vadd.f32 %v3434_v1, %v1335_v58  ;;  %v985_v41 = vadd.f32 %v977_v50, %v956_v15  ;;  %v4908_v15 = vld [vmem:[#allocation73_spill] sm:$0xff] }
  0x6a   : > { %v4898_v31 = vld [vmem:[#allocation50_spill] sm:$0xff] }
  0x6b   : > { %v746_v4 = vmul.f32 %v4898_v31, %v4852_v63  ;;  %v4899_v60 = vld [vmem:[#allocation2_spill] sm:$0xff]  ;;  %v1450_v33 = vadd.f32 %v4901_v54, %v1421_v19  ;;  %v4904_v63 = vld [vmem:[#allocation5_spill] sm:$0xff]  ;;  %v1394_v22 = vadd.f32 %v3449_v17, %v1365_v55  ;;  %v1014_v56 = vadd.f32 %v1006_v45, %v985_v41 }
  0x6c   : > { %v339_v28 = vmul.f32 %v4899_v60, %v326_v21  ;;  %v442_v18 = vld [vmem:[%s2786_s16 + $0x44] sm:$0xff]  ;;  %v426_v32 = vmul.f32 %v4904_v63, %v413_v0  ;;  %v4906_v54 = vld [vmem:[#allocation29_spill] sm:$0xff] }
  0x6d   : > { %v1479_v21 = vadd.f32 %v4905_v29, %v1450_v33  ;;  %v1064_v1 = vmul.f32 %v4882_v20, %v4906_v54  ;;  %v471_v50 = vld [vmem:[%s2786_s16 + $0x45] sm:$0xff]  ;;  %v754_v19 = vadd.f32 %v746_v4, %v724_v62  ;;  %v455_v58 = vmul.f32 %v2804_v12, %v442_v18 }
  0x6e   : > { %v376_v9 = vadd.f32 %v368_v8, %v339_v28  ;;  %v4907_v47 = vld [vmem:[#allocation58_spill] sm:$0xff]  ;;  %v1423_v0 = vadd.f32 %v3453_v43, %v1394_v22  ;;  %v1043_v28 = vadd.f32 %v1035_v14, %v1014_v56  ;;  %v4910_v20 = vld [vmem:[#allocation59_spill] sm:$0xff]  ;;  %v484_v41 = vmul.f32 %v2811_v16, %v471_v50 }
  0x6f   : > { %v804_v25 = vmul.f32 %v4907_v47, %v4861_v27  ;;  %v1508_v8 = vadd.f32 %v4908_v15, %v1479_v21  ;;  %v4909_v29 = vld [vmem:[#allocation30_spill] sm:$0xff]  ;;  %v783_v45 = vadd.f32 %v775_v24, %v754_v19  ;;  %v833_v4 = vmul.f32 %v4910_v20, %v4866_v7  ;;  %v4912_v21 = vld [vmem:[#allocation32_spill] sm:$0xff]  ;;  %v4914_v19 = vld [vmem:[#allocation79_spill] sm:$0xff] }
  0x70   : > { %v405_v49 = vadd.f32 %v397_v13, %v376_v9  ;;  %v1093_v33 = vmul.f32 %v4889_v42, %v4909_v29  ;;  %v500_v17 = vld [vmem:[%s2786_s16 + $0x46] sm:$0xff]  ;;  %v1452_v18 = vadd.f32 %v3468_v5, %v1423_v0  ;;  %v1072_v9 = vadd.f32 %v1064_v1, %v1043_v28  ;;  %v4913_v42 = vld [vmem:[#allocation64_spill] sm:$0xff]  ;;  %v4915_v15 = vld [vmem:[#allocation33_spill] sm:$0xff] }
  0x71   : > { %v4911_v13 = vld [vmem:[#allocation74_spill] sm:$0xff]  ;;  %v1122_v43 = vmul.f32 %v4895_v6, %v4912_v21  ;;  %v812_v14 = vadd.f32 %v804_v25, %v783_v45  ;;  %v862_v56 = vmul.f32 %v4913_v42, %v4871_v38  ;;  %v513_v22 = vmul.f32 %v2827_v23, %v500_v17  ;;  %v3616_v1 = vld [vmem:[%s2786_s16 + $0x50] sm:$0xff] }
  0x72   : > { %v434_v55 = vadd.f32 %v426_v32, %v405_v49  ;;  %v1537_v62 = vadd.f32 %v4911_v13, %v1508_v8  ;;  %v1481_v50 = vadd.f32 %v3472_v39, %v1452_v18  ;;  %v1101_v49 = vadd.f32 %v1093_v33, %v1072_v9  ;;  %v4916_v6 = vld [vmem:[#allocation68_spill] sm:$0xff]  ;;  %v4918_v33 = vld [vmem:[#allocation34_spill] sm:$0xff]  ;;  %v4919_v13 = vld [vmem:[#allocation69_spill] sm:$0xff] }
  0x73   : > { %v1152_v5 = vmul.f32 %v4898_v31, %v4915_v15  ;;  %v841_v8 = vadd.f32 %v833_v4, %v812_v14  ;;  %v891_v25 = vmul.f32 %v4916_v6, %v2987_v53  ;;  %v4917_v28 = vld [vmem:[#allocation80_spill] sm:$0xff]  ;;  %v4920_v9 = vld [vmem:[#allocation81_spill] sm:$0xff] }
  0x74   : > { %v463_v24 = vadd.f32 %v455_v58, %v434_v55  ;;  %v1567_v32 = vadd.f32 %v4914_v19, %v1537_v62  ;;  %v543_v58 = vmul.f32 %v2842_v30, %v3616_v1  ;;  %v1510_v45 = vadd.f32 %v3488_v11, %v1481_v50  ;;  %v3627_v31 = vld [vmem:[%s2786_s16 + $0x51] sm:$0xff] }
  0x75   : > { %v1130_v39 = vadd.f32 %v1122_v43, %v1101_v49  ;;  %v1181_v55 = vmul.f32 %v4903_v26, %v4918_v33  ;;  %v870_v4 = vadd.f32 %v862_v56, %v841_v8  ;;  %v920_v62 = vmul.f32 %v4919_v13, %v4880_v36  ;;  %v3638_v19 = vld [vmem:[%s2786_s16 + $0x52] sm:$0xff]  ;;  %v4922_v56 = vld [vmem:[#allocation75_spill] sm:$0xff] }
  0x76   : > { %v492_v0 = vadd.f32 %v484_v41, %v463_v24  ;;  %v1596_v17 = vadd.f32 %v4917_v28, %v1567_v32  ;;  %v572_v18 = vmul.f32 %v2856_v37, %v3627_v31  ;;  %v1539_v11 = vadd.f32 %v3492_v3, %v1510_v45  ;;  %v4921_v24 = vld [vmem:[#allocation37_spill] sm:$0xff]  ;;  %v4923_v8 = vld [vmem:[#allocation84_spill] sm:$0xff] }
  0x77   : > { %v1160_v43 = vadd.f32 %v1152_v5, %v1130_v39  ;;  %v1210_v26 = vmul.f32 %v4907_v47, %v4921_v24  ;;  %v899_v32 = vadd.f32 %v891_v25, %v870_v4  ;;  %v950_v50 = vmul.f32 %v4922_v56, %v4886_v48  ;;  %v3649_v47 = vld [vmem:[%s2786_s16 + $0x53] sm:$0xff]  ;;  %v4925_v4 = vld [vmem:[#allocation87_spill] sm:$0xff] }
  0x78   : > { %v521_v41 = vadd.f32 %v513_v22, %v492_v0  ;;  %v1625_v14 = vadd.f32 %v4920_v9, %v1596_v17  ;;  %v601_v22 = vmul.f32 %v2871_v44, %v3638_v19  ;;  %v1569_v28 = vadd.f32 %v3507_v59, %v1539_v11  ;;  %v4924_v25 = vld [vmem:[#allocation76_spill] sm:$0xff] }
  0x79   : > { %v1189_v3 = vadd.f32 %v1181_v55, %v1160_v43  ;;  %v1239_v5 = vmul.f32 %v4910_v20, %v3112_v34  ;;  %v928_v17 = vadd.f32 %v920_v62, %v899_v32  ;;  %v979_v45 = vmul.f32 %v4924_v25, %v4892_v35  ;;  %v3660_v20 = vld [vmem:[%s2786_s16 + $0x54] sm:$0xff] }
  0x7a   : > { %v551_v49 = vadd.f32 %v543_v58, %v521_v41  ;;  %v1654_v0 = vadd.f32 %v4923_v8, %v1625_v14  ;;  %v630_v58 = vmul.f32 %v2886_v51, %v3649_v47  ;;  %v1598_v9 = vadd.f32 %v3511_v52, %v1569_v28  ;;  %v4926_v62 = vld [vmem:[#allocation77_spill] sm:$0xff]  ;;  %v4927_v32 = vld [vmem:[#allocation36_spill] sm:$0xff] }
  0x7b   : > { %v1218_v59 = vadd.f32 %v1210_v26, %v1189_v3  ;;  %v1268_v55 = vmul.f32 %v4913_v42, %v3117_v46  ;;  %v958_v14 = vadd.f32 %v950_v50, %v928_v17  ;;  %v1008_v11 = vmul.f32 %v4926_v62, %v4894_v40  ;;  %v4928_v26 = vld [vmem:[#allocation42_spill] sm:$0xff]  ;;  %v3671_v42 = vld [vmem:[%s2786_s16 + $0x55] sm:$0xff]  ;;  %v4929_v50 = vld [vmem:[#allocation27_spill] sm:$0xff] }
  0x7c   : > { %v580_v39 = vadd.f32 %v572_v18, %v551_v49  ;;  %v1683_v41 = vadd.f32 %v4925_v4, %v1654_v0  ;;  %v659_v18 = vmul.f32 %v2898_v57, %v3660_v20  ;;  %v1627_v8 = vadd.f32 %v3526_v2, %v1598_v9  ;;  %v4930_v3 = vld [vmem:[#allocation82_spill] sm:$0xff]  ;;  %v4932_v57 = vld [vmem:[#allocation15_spill] sm:$0xff] }
  0x7d   : > { %v1247_v52 = vadd.f32 %v1239_v5, %v1218_v59  ;;  %v1297_v0 = vmul.f32 %v4916_v6, %v4928_v26  ;;  %v987_v28 = vadd.f32 %v979_v45, %v958_v14  ;;  %v1037_v17 = vmul.f32 %v4930_v3, %v4929_v50  ;;  %v4934_v5 = vld [vmem:[#allocation43_spill] sm:$0xff]  ;;  %v3682_v6 = vld [vmem:[%s2786_s16 + $0x56] sm:$0xff] }
  0x7e   : > { %v609_v43 = vadd.f32 %v601_v22, %v580_v39  ;;  %v1712_v49 = vadd.f32 %v4927_v32, %v1683_v41  ;;  %v4931_v22 = vld [vmem:[#allocation10_spill] sm:$0xff]  ;;  %v4933_v41 = vld [vmem:[#allocation20_spill] sm:$0xff]  ;;  %v1326_v9 = vmul.f32 %v4919_v13, %v4934_v5  ;;  %v4935_v45 = vld [vmem:[#allocation85_spill] sm:$0xff] }
  0x7f   : > { %v688_v39 = vmul.f32 %v4931_v22, %v3671_v42  ;;  %v1656_v32 = vadd.f32 %v4933_v41, %v1627_v8  ;;  %v1276_v2 = vadd.f32 %v1268_v55, %v1247_v52  ;;  %v1016_v59 = vadd.f32 %v1008_v11, %v987_v28  ;;  %v4938_v55 = vld [vmem:[#allocation44_spill] sm:$0xff]  ;;  %v3693_v13 = vld [vmem:[%s2786_s16 + $0x60] sm:$0xff]  ;;  %v4939_v28 = vld [vmem:[#allocation11_spill] sm:$0xff] }
  0x80   : > { %v638_v4 = vadd.f32 %v630_v58, %v609_v43  ;;  %v1741_v51 = vadd.f32 %v4932_v57, %v1712_v49  ;;  %v1066_v14 = vmul.f32 %v4935_v45, %v4906_v54  ;;  %v4936_v58 = vld [vmem:[#allocation12_spill] sm:$0xff]  ;;  %v4937_v49 = vld [vmem:[#allocation21_spill] sm:$0xff]  ;;  %v1356_v52 = vmul.f32 %v4922_v56, %v4938_v55  ;;  %v4941_v54 = vld [vmem:[#allocation35_spill] sm:$0xff] }
  0x81   : > { %v717_v43 = vmul.f32 %v4936_v58, %v3682_v6  ;;  %v1685_v57 = vadd.f32 %v4937_v49, %v1656_v32  ;;  %v1305_v8 = vadd.f32 %v1297_v0, %v1276_v2  ;;  %v1045_v11 = vadd.f32 %v1037_v17, %v1016_v59  ;;  %v4942_v32 = vld [vmem:[#allocation51_spill] sm:$0xff] }
  0x82   : > { %v667_v44 = vadd.f32 %v659_v18, %v638_v4  ;;  %v1750_v22 = vsel %vm1749_vm0, %v1741_v51, 0.0  ;;  %v1095_v41 = vmul.f32 %v4939_v28, %v4909_v29  ;;  %v4940_v4 = vld [vmem:[#allocation14_spill] sm:$0xff]  ;;  %v1385_v0 = vmul.f32 %v4924_v25, %v4942_v32  ;;  %v4945_v29 = vld [vmem:[#allocation52_spill] sm:$0xff] }
  0x83   : > { %1751 = vadd.xlane.f32.xlu0 %v1750_v22  ;;  %v747_v58 = vmul.f32 %v4940_v4, %v3693_v13  ;;  %v1714_v51 = vadd.f32 %v4941_v54, %v1685_v57  ;;  %v1334_v50 = vadd.f32 %v1326_v9, %v1305_v8  ;;  %v3703_v2 = vld [vmem:[%s2786_s16 + $0x61] sm:$0xff]  ;;  %v1074_v56 = vadd.f32 %v1066_v14, %v1045_v11  ;;  %v4946_v57 = vld [vmem:[#allocation8_spill] sm:$0xff] }
  0x84   : > { %v696_v18 = vadd.f32 %v688_v39, %v667_v44  ;;  %v4943_v22 = vld [vmem:[#allocation6_spill] sm:$0xff]  ;;  %v776_v44 = vmul.f32 %v4856_v61, %v3703_v2  ;;  %v1414_v54 = vmul.f32 %v4926_v62, %v4945_v29  ;;  %v1154_v14 = vmul.f32 %v4946_v57, %v4915_v15  ;;  %v4947_v61 = vld [vmem:[#allocation53_spill] sm:$0xff] }
  0x85   : > { %v1124_v17 = vmul.f32 %v4943_v22, %v4912_v21  ;;  %v4944_v39 = vld [vmem:[#allocation38_spill] sm:$0xff]  ;;  %v1364_v4 = vadd.f32 %v1356_v52, %v1334_v50  ;;  %v1103_v25 = vadd.f32 %v1095_v41, %v1074_v56  ;;  %v4948_v50 = vld [vmem:[#allocation17_spill] sm:$0xff] }
  0x86   : > { %v725_v59 = vadd.f32 %v717_v43, %v696_v18  ;;  %v1743_v49 = vadd.f32 %v4944_v39, %v1714_v51  ;;  %v3713_v9 = vld [vmem:[%s2786_s16 + $0x62] sm:$0xff]  ;;  %v1443_v51 = vmul.f32 %v4930_v3, %v4947_v61  ;;  %v1183_v52 = vmul.f32 %v4948_v50, %v4918_v33  ;;  %v4949_v39 = vld [vmem:[#allocation60_spill] sm:$0xff] }
  0x87   : > { %v805_v11 = vmul.f32 %v4861_v27, %v3713_v9  ;;  %v1393_v18 = vadd.f32 %v1385_v0, %v1364_v4  ;;  %v3725_v62 = vld [vmem:[%s2786_s16 + $0x63] sm:$0xff]  ;;  %v1132_v41 = vadd.f32 %v1124_v17, %v1103_v25  ;;  %v340_v27 = vmul.f32 %v3616_v1, %v4899_v60  ;;  %v4952_v60 = vld [vmem:[#allocation65_spill] sm:$0xff] }
  0x88   : > { %v755_v8 = vadd.f32 %v747_v58, %v725_v59  ;;  %v1756_v43 = vsel %vm1749_vm0, %v1743_v49, 0.0  ;;  %v834_v58 = vmul.f32 %v4866_v7, %v3725_v62  ;;  %v1472_v0 = vmul.f32 %v4935_v45, %v4949_v39  ;;  %v4950_v49 = vld [vmem:[#allocation3_spill] sm:$0xff] }
  0x89   : > { %1757 = vadd.xlane.f32.xlu1 %v1756_v43  ;;  %v1422_v59 = vadd.f32 %v1414_v54, %v1393_v18  ;;  %v369_v3 = vmul.f32 %v3627_v31, %v4950_v49  ;;  %v398_v4 = vmul.f32 %v3638_v19, %v4902_v10  ;;  %v1162_v33 = vadd.f32 %v1154_v14, %v1132_v41  ;;  %v4951_v17 = vld [vmem:[#allocation39_spill] sm:$0xff]  ;;  %v4954_v41 = vld [vmem:[#allocation66_spill] sm:$0xff]  ;;  %v4957_v49 = vld [vmem:[#allocation16_spill] sm:$0xff] }
  0x8a   : > { %v784_v56 = vadd.f32 %v776_v44, %v755_v8  ;;  %v1212_v44 = vmul.f32 %v4951_v17, %v4921_v24  ;;  %v863_v7 = vmul.f32 %v4935_v45, %v4871_v38  ;;  %v1501_v1 = vmul.f32 %v4939_v28, %v4952_v60  ;;  %v4953_v18 = vld [vmem:[#allocation19_spill] sm:$0xff] }
  0x8b   : > { %v1451_v8 = vadd.f32 %v1443_v51, %v1422_v59  ;;  %v377_v54 = vadd.f32 %v369_v3, %v340_v27  ;;  %v427_v43 = vmul.f32 %v3649_v47, %v4904_v63  ;;  %v1191_v31 = vadd.f32 %v1183_v52, %v1162_v33  ;;  %v4955_v27 = vld [vmem:[#allocation40_spill] sm:$0xff] }
  0x8c   : > { %v813_v25 = vadd.f32 %v805_v11, %v784_v56  ;;  %v1241_v10 = vmul.f32 %v4953_v18, %v3112_v34  ;;  %v892_v14 = vmul.f32 %v4939_v28, %v2987_v53  ;;  %v1530_v38 = vmul.f32 %v4943_v22, %v4954_v41 }
  0x8d   : > { %v1480_v11 = vadd.f32 %v1472_v0, %v1451_v8  ;;  %v406_v45 = vadd.f32 %v398_v4, %v377_v54  ;;  %v456_v51 = vmul.f32 %v3660_v20, %v2804_v12  ;;  %v1220_v56 = vadd.f32 %v1212_v44, %v1191_v31  ;;  %v4958_v44 = vld [vmem:[#allocation71_spill] sm:$0xff] }
  0x8e   : > { %v842_v19 = vadd.f32 %v834_v58, %v813_v25  ;;  %v1270_v63 = vmul.f32 %v4955_v27, %v3117_v46  ;;  %v921_v47 = vmul.f32 %v4943_v22, %v4880_v36  ;;  %v4956_v58 = vld [vmem:[#allocation70_spill] sm:$0xff]  ;;  %v485_v59 = vmul.f32 %v3671_v42, %v2811_v16  ;;  %v4959_v8 = vld [vmem:[#allocation23_spill] sm:$0xff] }
  0x8f   : > { %v1509_v52 = vadd.f32 %v1501_v1, %v1480_v11  ;;  %v1560_v53 = vmul.f32 %v4956_v58, %v4946_v57  ;;  %v435_v28 = vadd.f32 %v427_v43, %v406_v45  ;;  %v1249_v0 = vadd.f32 %v1241_v10, %v1220_v56  ;;  %v4960_v43 = vld [vmem:[#allocation72_spill] sm:$0xff]  ;;  %v4963_v56 = vld [vmem:[#allocation18_spill] sm:$0xff] }
  0x90   : > { %v871_v33 = vadd.f32 %v863_v7, %v842_v19  ;;  %v1299_v12 = vmul.f32 %v4957_v49, %v4928_v26  ;;  %v951_v3 = vmul.f32 %v4946_v57, %v4886_v48  ;;  %v1589_v36 = vmul.f32 %v4958_v44, %v4948_v50  ;;  %v4961_v19 = vld [vmem:[#allocation45_spill] sm:$0xff] }
  0x91   : > { %v1538_v4 = vadd.f32 %v1530_v38, %v1509_v52  ;;  %v464_v22 = vadd.f32 %v456_v51, %v435_v28  ;;  %v514_v25 = vmul.f32 %v3682_v6, %v2827_v23  ;;  %v1278_v7 = vadd.f32 %v1270_v63, %v1249_v0  ;;  %v4962_v38 = vld [vmem:[#allocation78_spill] sm:$0xff]  ;;  %v4966_v28 = vld [vmem:[#allocation7_spill] sm:$0xff] }
  0x92   : > { %v900_v20 = vadd.f32 %v892_v14, %v871_v33  ;;  %v1328_v16 = vmul.f32 %v4959_v8, %v4934_v5  ;;  %v980_v1 = vmul.f32 %v4948_v50, %v4892_v35  ;;  %v1618_v48 = vmul.f32 %v4960_v43, %v4951_v17  ;;  %v4964_v33 = vld [vmem:[#allocation27_spill] sm:$0xff] }
  0x93   : > { %v1568_v54 = vadd.f32 %v1560_v53, %v1538_v4  ;;  %v493_v57 = vadd.f32 %v485_v59, %v464_v22  ;;  %v544_v31 = vmul.f32 %v3693_v13, %v2842_v30  ;;  %v1307_v10 = vadd.f32 %v1299_v12, %v1278_v7  ;;  %v4965_v53 = vld [vmem:[#allocation83_spill] sm:$0xff]  ;;  %v4970_v7 = vld [vmem:[#allocation9_spill] sm:$0xff] }
  0x94   : > { %v929_v42 = vadd.f32 %v921_v47, %v900_v20  ;;  %v1358_v23 = vmul.f32 %v4961_v19, %v4938_v55  ;;  %v1009_v14 = vmul.f32 %v4951_v17, %v4894_v40  ;;  %v1647_v35 = vmul.f32 %v4962_v38, %v4953_v18 }
  0x95   : > { %v1597_v11 = vadd.f32 %v1589_v36, %v1568_v54  ;;  %v522_v50 = vadd.f32 %v514_v25, %v493_v57  ;;  %v573_v45 = vmul.f32 %v3703_v2, %v2856_v37  ;;  %v1336_v51 = vadd.f32 %v1328_v16, %v1307_v10  ;;  %v4967_v37 = vld [vmem:[#allocation28_spill] sm:$0xff]  ;;  %v4972_v57 = vld [vmem:[#allocation30_spill] sm:$0xff] }
  0x96   : > { %v959_v6 = vadd.f32 %v951_v3, %v929_v42  ;;  %v1387_v30 = vmul.f32 %v4963_v56, %v4942_v32  ;;  %v1038_v47 = vmul.f32 %v4953_v18, %v4964_v33  ;;  %v1676_v40 = vmul.f32 %v4965_v53, %v4955_v27  ;;  %v4968_v3 = vld [vmem:[#allocation29_spill] sm:$0xff]  ;;  %v4969_v18 = vld [vmem:[#allocation86_spill] sm:$0xff]  ;;  %v4975_v33 = vld [vmem:[#allocation47_spill] sm:$0xff] }
  0x97   : > { %v1626_v52 = vadd.f32 %v1618_v48, %v1597_v11  ;;  %v552_v17 = vadd.f32 %v544_v31, %v522_v50  ;;  %v602_v59 = vmul.f32 %v3713_v9, %v4966_v28  ;;  %v1366_v0 = vadd.f32 %v1358_v23, %v1336_v51  ;;  %v3806_v10 = vld [vmem:[%s2786_s16 + $0x64] sm:$0xff]  ;;  %v4973_v23 = vld [vmem:[#allocation13_spill] sm:$0xff] }
  0x98   : > { %v988_v63 = vadd.f32 %v980_v1, %v959_v6  ;;  %v1416_v12 = vmul.f32 %v4967_v37, %v4945_v29  ;;  %v1067_v4 = vmul.f32 %v4955_v27, %v4968_v3  ;;  %v1705_v22 = vmul.f32 %v4969_v18, %v4957_v49  ;;  %v4971_v1 = vld [vmem:[#allocation46_spill] sm:$0xff]  ;;  %v3813_v11 = vld [vmem:[%s4558_s1 + $0xb] ss:$0 sm:$0xff] }
  0x99   : > { %v1655_v36 = vadd.f32 %v1647_v35, %v1626_v52  ;;  %v581_v25 = vadd.f32 %v573_v45, %v552_v17  ;;  %v631_v16 = vmul.f32 %v3725_v62, %v4970_v7  ;;  %v1395_v42 = vadd.f32 %v1387_v30, %v1366_v0  ;;  %v4974_v50 = vld [vmem:[#allocation31_spill] sm:$0xff]  ;;  %v4977_v3 = vld [vmem:[#allocation34_spill] sm:$0xff]  ;;  %v3850_v7 = vld [vmem:[%s2786_s16 + $0x70] sm:$0xff] }
  0x9a   : > { %v1017_v20 = vadd.f32 %v1009_v14, %v988_v63  ;;  %v1445_v54 = vmul.f32 %v4971_v1, %v4947_v61  ;;  %v1096_v31 = vmul.f32 %v4957_v49, %v4972_v57  ;;  %v1734_v6 = vmul.f32 %v4973_v23, %v4959_v8  ;;  %v3822_v30 = vld [vmem:[%s2786_s16 + $0x65] sm:$0xff]  ;;  %v3868_v57 = vld [vmem:[%s2786_s16 + $0x90] sm:$0xff] }
  0x9b   : > { %v1684_v27 = vadd.f32 %v1676_v40, %v1655_v36  ;;  %v610_v14 = vadd.f32 %v602_v59, %v581_v25  ;;  %v660_v61 = vmul.f32 %v3813_v11, %v3806_v10  ;;  %v1424_v35 = vadd.f32 %v1416_v12, %v1395_v42  ;;  %v3829_v40 = vld [vmem:[%s4558_s1 + $0xc] ss:$0 sm:$0xff]  ;;  %v4976_v59 = vld [vmem:[#allocation54_spill] sm:$0xff] }
  0x9c   : > { %v1046_v48 = vadd.f32 %v1038_v47, %v1017_v20  ;;  %v1474_v49 = vmul.f32 %v4974_v50, %v4949_v39  ;;  %v1125_v51 = vmul.f32 %v4959_v8, %v4912_v21  ;;  %v1503_v47 = vmul.f32 %v4975_v33, %v4952_v60  ;;  %v3838_v12 = vld [vmem:[%s2786_s16 + $0x66] sm:$0xff] }
  0x9d   : > { %v1713_v63 = vadd.f32 %v1705_v22, %v1684_v27  ;;  %v639_v52 = vadd.f32 %v631_v16, %v610_v14  ;;  %v689_v17 = vmul.f32 %v3829_v40, %v3822_v30  ;;  %v1453_v28 = vadd.f32 %v1445_v54, %v1424_v35  ;;  %v3845_v22 = vld [vmem:[%s4558_s1 + $0xd] ss:$0 sm:$0xff]  ;;  %v3873_v27 = vld [vmem:[%s4558_s1 + $0x1] ss:$0 sm:$0xff]  ;;  %v3880_v14 = vld [vmem:[%s4558_s1 + $0x2] ss:$0 sm:$0xff] }
  0x9e   : > { %v1075_v45 = vadd.f32 %v1067_v4, %v1046_v48  ;;  %v1532_v21 = vmul.f32 %v4976_v59, %v4954_v41  ;;  %v1155_v0 = vmul.f32 %v4961_v19, %v4915_v15  ;;  %v1184_v4 = vmul.f32 %v4963_v56, %v4977_v3  ;;  %v3855_v15 = vld [vmem:[%s4558_s1 + $0xe] ss:$0 sm:$0xff]  ;;  %v3862_v56 = vld [vmem:[%s4558_s1] ss:$0 sm:$0xff] }
  0x9f   : > { %v1742_v20 = vadd.f32 %v1734_v6, %v1713_v63  ;;  %v668_v36 = vadd.f32 %v660_v61, %v639_v52  ;;  %v718_v25 = vmul.f32 %v3845_v22, %v3838_v12  ;;  %v1482_v16 = vadd.f32 %v1474_v49, %v1453_v28 }
  0xa0   : > { %v1104_v8 = vadd.f32 %v1096_v31, %v1075_v45  ;;  %v748_v19 = vmul.f32 %v3855_v15, %v3850_v7  ;;  %v341_v54 = vmul.f32 %v3862_v56, %v3693_v13  ;;  %v370_v6 = vmul.f32 %v3873_v27, %v3703_v2  ;;  %v3889_v2 = vld [vmem:[%s2786_s16 + $0x71] sm:$0xff] }
  0xa1   : > { %v1753_v48 = vsel %vm1749_vm0, %v1742_v20, 0.0  ;;  %v697_v31 = vadd.f32 %v689_v17, %v668_v36  ;;  %v399_v13 = vmul.f32 %v3880_v14, %v3713_v9  ;;  %v1511_v61 = vadd.f32 %v1503_v47, %v1482_v16  ;;  %v3897_v9 = vld [vmem:[%s4558_s1 + $0xf] ss:$0 sm:$0xff]  ;;  %v3916_v20 = vld [vmem:[%s2786_s16 + $0x92] sm:$0xff]  ;;  %v3921_v36 = vld [vmem:[%s4558_s1 + $0x10] ss:$0 sm:$0xff] }
  0xa2   : > { %v1133_v42 = vadd.f32 %v1125_v51, %v1104_v8  ;;  %1754 = vadd.xlane.f32.xlu0 %v1753_v48  ;;  %v1562_v35 = vmul.f32 %v4956_v58, %v3868_v57  ;;  %v1213_v45 = vmul.f32 %v4967_v37, %v4921_v24  ;;  %v3892_v51 = vld [vmem:[%s2786_s16 + $0x91] sm:$0xff]  ;;  %v777_v47 = vmul.f32 %v3897_v9, %v3889_v2  ;;  %v3904_v58 = vld [vmem:[%s4558_s1 + $0x3] ss:$0 sm:$0xff] }
  0xa3   : > { %v726_v63 = vadd.f32 %v718_v25, %v697_v31  ;;  %v378_v52 = vadd.f32 %v370_v6, %v341_v54  ;;  %v428_v24 = vmul.f32 %v3904_v58, %v3725_v62  ;;  %v1540_v37 = vadd.f32 %v1532_v21, %v1511_v61  ;;  %v3945_v48 = vld [vmem:[%s4558_s1 + $0x11] ss:$0 sm:$0xff] }
  0xa4   : > { %v1163_v49 = vadd.f32 %v1155_v0, %v1133_v42  ;;  %v1591_v17 = vmul.f32 %v4958_v44, %v3892_v51  ;;  %v1242_v8 = vmul.f32 %v4971_v1, %v3112_v34  ;;  %v3913_v0 = vld [vmem:[%s2786_s16 + $0x72] sm:$0xff]  ;;  %v3928_v44 = vld [vmem:[%s4558_s1 + $0x4] ss:$0 sm:$0xff]  ;;  %v1271_v16 = vmul.f32 %v4974_v50, %v3117_v46 }
  0xa5   : > { %v756_v3 = vadd.f32 %v748_v19, %v726_v63  ;;  %v806_v62 = vmul.f32 %v3921_v36, %v3913_v0  ;;  %v407_v21 = vadd.f32 %v399_v13, %v378_v52  ;;  %v457_v34 = vmul.f32 %v3928_v44, %v3806_v10  ;;  %v3937_v42 = vld [vmem:[%s2786_s16 + $0x73] sm:$0xff]  ;;  %v3969_v63 = vld [vmem:[%s4558_s1 + $0x12] ss:$0 sm:$0xff] }
  0xa6   : > { %v1192_v28 = vadd.f32 %v1184_v4, %v1163_v49  ;;  %v1570_v1 = vadd.f32 %v1562_v35, %v1540_v37  ;;  %v1620_v4 = vmul.f32 %v4960_v43, %v3916_v20  ;;  %v3940_v19 = vld [vmem:[%s2786_s16 + $0x93] sm:$0xff]  ;;  %v835_v10 = vmul.f32 %v3945_v48, %v3937_v42  ;;  %v3952_v43 = vld [vmem:[%s4558_s1 + $0x5] ss:$0 sm:$0xff] }
  0xa7   : > { %v785_v54 = vadd.f32 %v777_v47, %v756_v3  ;;  %v436_v31 = vadd.f32 %v428_v24, %v407_v21  ;;  %v486_v46 = vmul.f32 %v3952_v43, %v3822_v30  ;;  %v1649_v6 = vmul.f32 %v4962_v38, %v3940_v19  ;;  %v3961_v35 = vld [vmem:[%s2786_s16 + $0x74] sm:$0xff]  ;;  %v3976_v38 = vld [vmem:[%s4558_s1 + $0x6] ss:$0 sm:$0xff]  ;;  %v3993_v3 = vld [vmem:[%s4558_s1 + $0x13] ss:$0 sm:$0xff] }
  0xa8   : > { %v1221_v25 = vadd.f32 %v1213_v45, %v1192_v28  ;;  %v1599_v50 = vadd.f32 %v1591_v17, %v1570_v1  ;;  %v1300_v61 = vmul.f32 %v4975_v33, %v4928_v26  ;;  %v3964_v49 = vld [vmem:[%s2786_s16 + $0x94] sm:$0xff]  ;;  %v864_v30 = vmul.f32 %v3969_v63, %v3961_v35 }
  0xa9   : > { %v814_v45 = vadd.f32 %v806_v62, %v785_v54  ;;  %v465_v47 = vadd.f32 %v457_v34, %v436_v31  ;;  %v515_v26 = vmul.f32 %v3976_v38, %v3838_v12  ;;  %v1678_v52 = vmul.f32 %v4965_v53, %v3964_v49  ;;  %v3985_v17 = vld [vmem:[%s2786_s16 + $0x75] sm:$0xff]  ;;  %v4000_v53 = vld [vmem:[%s4558_s1 + $0x7] ss:$0 sm:$0xff]  ;;  %v4017_v54 = vld [vmem:[%s4558_s1 + $0x14] ss:$0 sm:$0xff] }
  0xaa   : > { %v1250_v13 = vadd.f32 %v1242_v8, %v1221_v25  ;;  %v1628_v33 = vadd.f32 %v1620_v4, %v1599_v50  ;;  %v1329_v37 = vmul.f32 %v4976_v59, %v4934_v5  ;;  %v3988_v28 = vld [vmem:[%s2786_s16 + $0x95] sm:$0xff]  ;;  %v893_v12 = vmul.f32 %v3993_v3, %v3985_v17 }
  0xab   : > { %v843_v8 = vadd.f32 %v835_v10, %v814_v45  ;;  %v494_v62 = vadd.f32 %v486_v46, %v465_v47  ;;  %v545_v5 = vmul.f32 %v4000_v53, %v3850_v7  ;;  %v1707_v21 = vmul.f32 %v4969_v18, %v3988_v28  ;;  %v4009_v4 = vld [vmem:[%s2786_s16 + $0x76] sm:$0xff]  ;;  %v4024_v18 = vld [vmem:[%s4558_s1 + $0x8] ss:$0 sm:$0xff] }
  0xac   : > { %v1279_v24 = vadd.f32 %v1271_v16, %v1250_v13  ;;  %v1657_v59 = vadd.f32 %v1649_v6, %v1628_v33  ;;  %v1359_v1 = vmul.f32 %v3868_v57, %v4938_v55  ;;  %v4012_v25 = vld [vmem:[%s2786_s16 + $0x96] sm:$0xff]  ;;  %v922_v10 = vmul.f32 %v4017_v54, %v4009_v4 }
  0xad   : > { %v872_v16 = vadd.f32 %v864_v30, %v843_v8  ;;  %v523_v31 = vadd.f32 %v515_v26, %v494_v62  ;;  %v574_v55 = vmul.f32 %v4024_v18, %v3889_v2  ;;  %v1736_v50 = vmul.f32 %v4973_v23, %v4012_v25  ;;  %v4038_v30 = vld [vmem:[%s4558_s1 + $0x15] ss:$0 sm:$0xff]  ;;  %v4045_v23 = vld [vmem:[%s4558_s1 + $0x9] ss:$0 sm:$0xff] }
  0xae   : > { %v1308_v34 = vadd.f32 %v1300_v61, %v1279_v24  ;;  %v1686_v46 = vadd.f32 %v1678_v52, %v1657_v59  ;;  %v1388_v13 = vmul.f32 %v3892_v51, %v4942_v32  ;;  %v4033_v61 = vld [vmem:[%s2786_s16 + $0x80] sm:$0xff]  ;;  %v603_v32 = vmul.f32 %v4045_v23, %v3913_v0  ;;  %v4064_v59 = vld [vmem:[%s4558_s1 + $0xa] ss:$0 sm:$0xff] }
  0xaf   : > { %v901_v45 = vadd.f32 %v893_v12, %v872_v16  ;;  %v952_v47 = vmul.f32 %v4038_v30, %v4033_v61  ;;  %v553_v26 = vadd.f32 %v545_v5, %v523_v31  ;;  %v1417_v24 = vmul.f32 %v3916_v20, %v4945_v29  ;;  %v4057_v12 = vld [vmem:[%s4558_s1 + $0x16] ss:$0 sm:$0xff] }
  0xb0   : > { %v1337_v6 = vadd.f32 %v1329_v37, %v1308_v34  ;;  %v1715_v33 = vadd.f32 %v1707_v21, %v1686_v46  ;;  %v4052_v37 = vld [vmem:[%s2786_s16 + $0x81] sm:$0xff]  ;;  %v632_v29 = vmul.f32 %v4064_v59, %v3937_v42 }
  0xb1   : > { %v930_v8 = vadd.f32 %v922_v10, %v901_v45  ;;  %v981_v62 = vmul.f32 %v4057_v12, %v4052_v37  ;;  %v582_v5 = vadd.f32 %v574_v55, %v553_v26  ;;  %v4076_v10 = vld [vmem:[%s2786_s16 + $0x82] sm:$0xff]  ;;  %v4081_v55 = vld [vmem:[%s4558_s1 + $0x17] ss:$0 sm:$0xff] }
  0xb2   : > { %v1367_v52 = vadd.f32 %v1359_v1, %v1337_v6  ;;  %v1744_v21 = vadd.f32 %v1736_v50, %v1715_v33  ;;  %v4071_v1 = vld [vmem:[%s4558_s1 + $0x26] ss:$0 sm:$0xff]  ;;  %v1010_v46 = vmul.f32 %v4081_v55, %v4076_v10  ;;  %v661_v6 = vmul.f32 %v3813_v11, %v3961_v35 }
  0xb3   : > { %4978 = vst [vmem:[#allocation55_spill] sm:$0xff] %v4071_v1  ;;  %v1446_v16 = vmul.f32 %v4071_v1, %v3940_v19  ;;  %v960_v31 = vadd.f32 %v952_v47, %v930_v8  ;;  %v611_v50 = vadd.f32 %v603_v32, %v582_v5  ;;  %v1475_v47 = vmul.f32 %v3964_v49, %v4949_v39  ;;  %v4091_v26 = vld [vmem:[%s2786_s16 + $0x83] sm:$0xff] }
  0xb4   : > { %v1396_v34 = vadd.f32 %v1388_v13, %v1367_v52  ;;  %v1759_v13 = vsel %vm1749_vm0, %v1744_v21, 0.0  ;;  %v4096_v52 = vld [vmem:[%s4558_s1 + $0x18] ss:$0 sm:$0xff]  ;;  %v1504_v39 = vmul.f32 %v3988_v28, %v4952_v60  ;;  %v4107_v21 = vld [vmem:[%s2786_s16 + $0x84] sm:$0xff]  ;;  %v719_v60 = vmul.f32 %v3845_v22, %v4009_v4 }
  0xb5   : > { %1760 = vadd.xlane.f32.xlu1 %v1759_v13  ;;  %v989_v33 = vadd.f32 %v981_v62, %v960_v31  ;;  %v1039_v32 = vmul.f32 %v4096_v52, %v4091_v26  ;;  %v640_v8 = vadd.f32 %v632_v29, %v611_v50  ;;  %v1533_v62 = vmul.f32 %v4012_v25, %v4954_v41  ;;  %v4112_v31 = vld [vmem:[%s4558_s1 + $0x19] ss:$0 sm:$0xff]  ;;  %v4117_v50 = vld [vmem:[%s2786_s16 + $0x85] sm:$0xff]  ;;  %v4124_v41 = vld [vmem:[%s4558_s1 + $0x1a] ss:$0 sm:$0xff] }
  0xb6   : > { %v1425_v45 = vadd.f32 %v1417_v24, %v1396_v34  ;;  %v690_v24 = vmul.f32 %v3829_v40, %v3985_v17  ;;  %4979 = vst [vmem:[#allocation22_spill] sm:$0xff] %v4112_v31  ;;  %v1068_v29 = vmul.f32 %v4112_v31, %v4107_v21  ;;  %4980 = vst [vmem:[#allocation41_spill] sm:$0xff] %v4124_v41 }
  0xb7   : > { %v1018_v34 = vadd.f32 %v1010_v46, %v989_v33  ;;  %v1097_v46 = vmul.f32 %v4124_v41, %v4117_v50  ;;  %v371_v33 = vmul.f32 %v3873_v27, %v3889_v2  ;;  %v4142_v41 = vld [vmem:[%s4558_s1 + $0x2a] ss:$0 sm:$0xff]  ;;  %v429_v2 = vmul.f32 %v3904_v58, %v3937_v42  ;;  %v4166_v58 = vld [vmem:[%s4558_s1 + $0x2b] ss:$0 sm:$0xff] }
  0xb8   : > { %v1454_v5 = vadd.f32 %v1446_v16, %v1425_v45  ;;  %v669_v16 = vadd.f32 %v661_v6, %v640_v8  ;;  %v342_v45 = vmul.f32 %v3862_v56, %v3850_v7  ;;  %v4133_v6 = vld [vmem:[%s2786_s16 + $0xa0] sm:$0xff] }
  0xb9   : > { %v1047_v8 = vadd.f32 %v1039_v32, %v1018_v34  ;;  %v1563_v7 = vmul.f32 %v4142_v41, %v4133_v6  ;;  %v4147_v56 = vld [vmem:[%s2786_s16 + $0x86] sm:$0xff]  ;;  %v778_v34 = vmul.f32 %v3897_v9, %v4052_v37 }
  0xba   : > { %v1483_v13 = vadd.f32 %v1475_v47, %v1454_v5  ;;  %v698_v1 = vadd.f32 %v690_v24, %v669_v16  ;;  %v749_v47 = vmul.f32 %v3855_v15, %v4033_v61  ;;  %v400_v5 = vmul.f32 %v3880_v14, %v3913_v0  ;;  %v4152_v32 = vld [vmem:[%s2786_s16 + $0xa1] sm:$0xff]  ;;  %v4157_v14 = vld [vmem:[%s4558_s1 + $0x1b] ss:$0 sm:$0xff] }
  0xbb   : > { %v379_v27 = vadd.f32 %v371_v33, %v342_v45  ;;  %v1076_v24 = vadd.f32 %v1068_v29, %v1047_v8  ;;  %v1126_v0 = vmul.f32 %v4157_v14, %v4147_v56  ;;  %v1592_v42 = vmul.f32 %v4166_v58, %v4152_v32  ;;  %v4173_v45 = vld [vmem:[%s2786_s16 + $0xa2] sm:$0xff] }
  0xbc   : > { %v1512_v31 = vadd.f32 %v1504_v39, %v1483_v13  ;;  %v727_v39 = vadd.f32 %v719_v60, %v698_v1  ;;  %v458_v13 = vmul.f32 %v3928_v44, %v3961_v35  ;;  %v807_v33 = vmul.f32 %v3921_v36, %v4076_v10  ;;  %v4187_v44 = vld [vmem:[%s4558_s1 + $0x2c] ss:$0 sm:$0xff] }
  0xbd   : > { %v408_v29 = vadd.f32 %v400_v5, %v379_v27  ;;  %v1105_v1 = vadd.f32 %v1097_v46, %v1076_v24  ;;  %4981 = vst [vmem:[#allocation56_spill] sm:$0xff] %v4187_v44  ;;  %v1621_v35 = vmul.f32 %v4187_v44, %v4173_v45  ;;  %v487_v5 = vmul.f32 %v3952_v43, %v3985_v17  ;;  %v4194_v27 = vld [vmem:[%s2786_s16 + $0xa3] sm:$0xff]  ;;  %v4208_v43 = vld [vmem:[%s4558_s1 + $0x2d] ss:$0 sm:$0xff] }
  0xbe   : > { %v1541_v16 = vadd.f32 %v1533_v62, %v1512_v31  ;;  %v4178_v62 = vld [vmem:[%s4558_s1 + $0x1c] ss:$0 sm:$0xff]  ;;  %v757_v60 = vadd.f32 %v749_v47, %v727_v39  ;;  %4982 = vst [vmem:[#allocation24_spill] sm:$0xff] %v4208_v43  ;;  %v1650_v17 = vmul.f32 %v4208_v43, %v4194_v27 }
  0xbf   : > { %v1156_v31 = vmul.f32 %v4178_v62, %v3868_v57  ;;  %v437_v46 = vadd.f32 %v429_v2, %v408_v29  ;;  %v1134_v47 = vadd.f32 %v1126_v0, %v1105_v1  ;;  %v516_v0 = vmul.f32 %v3976_v38, %v4009_v4  ;;  %v4215_v29 = vld [vmem:[%s2786_s16 + $0xa4] sm:$0xff]  ;;  %v4229_v38 = vld [vmem:[%s4558_s1 + $0x2e] ss:$0 sm:$0xff] }
  0xc0   : > { %v1571_v8 = vadd.f32 %v1563_v7, %v1541_v16  ;;  %v4199_v7 = vld [vmem:[%s4558_s1 + $0x1d] ss:$0 sm:$0xff]  ;;  %v786_v39 = vadd.f32 %v778_v34, %v757_v60  ;;  %v836_v16 = vmul.f32 %v3945_v48, %v4091_v26  ;;  %4983 = vst [vmem:[#allocation48_spill] sm:$0xff] %v4229_v38  ;;  %v1679_v4 = vmul.f32 %v4229_v38, %v4215_v29 }
  0xc1   : > { %v1185_v24 = vmul.f32 %v4199_v7, %v3892_v51  ;;  %v466_v2 = vadd.f32 %v458_v13, %v437_v46  ;;  %v1164_v34 = vadd.f32 %v1156_v31, %v1134_v47  ;;  %v546_v31 = vmul.f32 %v4000_v53, %v4033_v61  ;;  %v4236_v46 = vld [vmem:[%s2786_s16 + $0xa5] sm:$0xff]  ;;  %v4250_v53 = vld [vmem:[%s4558_s1 + $0x2f] ss:$0 sm:$0xff] }
  0xc2   : > { %v1600_v44 = vadd.f32 %v1592_v42, %v1571_v8  ;;  %v4220_v42 = vld [vmem:[%s4558_s1 + $0x1e] ss:$0 sm:$0xff]  ;;  %v815_v60 = vadd.f32 %v807_v33, %v786_v39  ;;  %v865_v8 = vmul.f32 %v3969_v63, %v4107_v21  ;;  %v894_v39 = vmul.f32 %v3993_v3, %v4117_v50  ;;  %4984 = vst [vmem:[#allocation61_spill] sm:$0xff] %v4250_v53 }
  0xc3   : > { %v1214_v1 = vmul.f32 %v4220_v42, %v3916_v20  ;;  %v495_v13 = vadd.f32 %v487_v5, %v466_v2  ;;  %v1193_v33 = vadd.f32 %v1185_v24, %v1164_v34  ;;  %v1708_v61 = vmul.f32 %v4250_v53, %v4236_v46  ;;  %v4257_v2 = vld [vmem:[%s2786_s16 + $0xa6] sm:$0xff] }
  0xc4   : > { %v1629_v43 = vadd.f32 %v1621_v35, %v1600_v44  ;;  %v4241_v44 = vld [vmem:[%s4558_s1 + $0x1f] ss:$0 sm:$0xff]  ;;  %v844_v47 = vadd.f32 %v836_v16, %v815_v60  ;;  %v575_v24 = vmul.f32 %v4024_v18, %v4052_v37  ;;  %v4262_v16 = vld [vmem:[%s4558_s1 + $0x20] ss:$0 sm:$0xff]  ;;  %v923_v60 = vmul.f32 %v4017_v54, %v4147_v56  ;;  %v4271_v18 = vld [vmem:[%s4558_s1 + $0x30] ss:$0 sm:$0xff] }
  0xc5   : > { %v1243_v35 = vmul.f32 %v4241_v44, %v3940_v19  ;;  %v524_v5 = vadd.f32 %v516_v0, %v495_v13  ;;  %v1222_v34 = vadd.f32 %v1214_v1, %v1193_v33  ;;  %4985 = vst [vmem:[#allocation25_spill] sm:$0xff] %v4262_v16  ;;  %v1737_v37 = vmul.f32 %v4271_v18, %v4257_v2 }
  0xc6   : > { %v1658_v38 = vadd.f32 %v1650_v17, %v1629_v43  ;;  %v1272_v43 = vmul.f32 %v4262_v16, %v3964_v49  ;;  %v873_v17 = vadd.f32 %v865_v8, %v844_v47  ;;  %v604_v1 = vmul.f32 %v4045_v23, %v4076_v10  ;;  %v4280_v8 = vld [vmem:[%s4558_s1 + $0x21] ss:$0 sm:$0xff]  ;;  %v4291_v23 = vld [vmem:[%s4558_s1 + $0x22] ss:$0 sm:$0xff] }
  0xc7   : > { %v554_v0 = vadd.f32 %v546_v31, %v524_v5  ;;  %v1251_v13 = vadd.f32 %v1243_v35, %v1222_v34  ;;  %v953_v33 = vmul.f32 %v4038_v30, %v3868_v57  ;;  %v633_v31 = vmul.f32 %v4064_v59, %v4091_v26  ;;  %v4302_v59 = vld [vmem:[%s4558_s1 + $0x23] ss:$0 sm:$0xff] }
  0xc8   : > { %v1687_v53 = vadd.f32 %v1679_v4, %v1658_v38  ;;  %v1301_v38 = vmul.f32 %v4280_v8, %v3988_v28  ;;  %v902_v4 = vadd.f32 %v894_v39, %v873_v17  ;;  %v1330_v10 = vmul.f32 %v4291_v23, %v4012_v25 }
  0xc9   : > { %v583_v16 = vadd.f32 %v575_v24, %v554_v0  ;;  %v1280_v5 = vadd.f32 %v1272_v43, %v1251_v13  ;;  %v982_v39 = vmul.f32 %v4057_v12, %v3892_v51  ;;  %v1360_v24 = vmul.f32 %v4302_v59, %v4133_v6 }
  0xca   : > { %v1716_v47 = vadd.f32 %v1708_v61, %v1687_v53  ;;  %v931_v35 = vadd.f32 %v923_v60, %v902_v4  ;;  %v662_v53 = vmul.f32 %v3813_v11, %v4107_v21  ;;  %v1011_v60 = vmul.f32 %v4081_v55, %v3916_v20  ;;  %v4314_v21 = vld [vmem:[%s4558_s1 + $0x24] ss:$0 sm:$0xff] }
  0xcb   : > { %v612_v17 = vadd.f32 %v604_v1, %v583_v16  ;;  %v1309_v61 = vadd.f32 %v1301_v38, %v1280_v5  ;;  %v691_v16 = vmul.f32 %v3829_v40, %v4117_v50  ;;  %v1389_v1 = vmul.f32 %v4314_v21, %v4152_v32  ;;  %v4325_v40 = vld [vmem:[%s4558_s1 + $0x25] ss:$0 sm:$0xff] }
  0xcc   : > { %v1745_v34 = vadd.f32 %v1737_v37, %v1716_v47  ;;  %v961_v43 = vadd.f32 %v953_v33, %v931_v35  ;;  %v1040_v38 = vmul.f32 %v4096_v52, %v3940_v19  ;;  %v720_v33 = vmul.f32 %v3845_v22, %v4147_v56  ;;  %v4986_v5 = vld [vmem:[#allocation22_spill] sm:$0xff]  ;;  %v4987_v22 = vld [vmem:[#allocation55_spill] sm:$0xff] }
  0xcd   : > { %v641_v37 = vadd.f32 %v633_v31, %v612_v17  ;;  %v1338_v11 = vadd.f32 %v1330_v10, %v1309_v61  ;;  %v1418_v50 = vmul.f32 %v4325_v40, %v4173_v45  ;;  %v1069_v10 = vmul.f32 %v4986_v5, %v3964_v49 }
  0xce   : > { %v1762_v0 = vsel %vm1749_vm0, %v1745_v34, 0.0  ;;  %v990_v13 = vadd.f32 %v982_v39, %v961_v43  ;;  %v750_v39 = vmul.f32 %v3855_v15, %v3868_v57  ;;  %v1447_v56 = vmul.f32 %v4987_v22, %v4194_v27 }
  0xcf   : > { %1763 = vadd.xlane.f32.xlu0 %v1762_v0  ;;  %v670_v4 = vadd.f32 %v662_v53, %v641_v37  ;;  %v1368_v47 = vadd.f32 %v1360_v24, %v1338_v11  ;;  %v4988_v53 = vld [vmem:[#allocation41_spill] sm:$0xff]  ;;  %v779_v43 = vmul.f32 %v3897_v9, %v3892_v51  ;;  %v4342_v0 = vld [vmem:[%s4558_s1 + $0x27] ss:$0 sm:$0xff]  ;;  %v1127_v37 = vmul.f32 %v4157_v14, %v4012_v25  ;;  %v4353_v51 = vld [vmem:[%s4558_s1 + $0x28] ss:$0 sm:$0xff] }
  0xd0   : > { %v1019_v31 = vadd.f32 %v1011_v60, %v990_v13  ;;  %v1098_v61 = vmul.f32 %v4988_v53, %v3988_v28  ;;  %v1476_v15 = vmul.f32 %v4342_v0, %v4215_v29  ;;  %v808_v11 = vmul.f32 %v3921_v36, %v3916_v20  ;;  %v4364_v20 = vld [vmem:[%s4558_s1 + $0x29] ss:$0 sm:$0xff] }
  0xd1   : > { %v699_v35 = vadd.f32 %v691_v16, %v670_v4  ;;  %v1397_v34 = vadd.f32 %v1389_v1, %v1368_v47  ;;  %v1505_v9 = vmul.f32 %v4353_v51, %v4236_v46  ;;  %v1534_v36 = vmul.f32 %v4364_v20, %v4257_v2 }
  0xd2   : > { %v1048_v17 = vadd.f32 %v1040_v38, %v1019_v31  ;;  %v1157_v38 = vmul.f32 %v4178_v62, %v4133_v6  ;;  %v1186_v31 = vmul.f32 %v4199_v7, %v4152_v32 }
  0xd3   : > { %v728_v24 = vadd.f32 %v720_v33, %v699_v35  ;;  %v1426_v60 = vadd.f32 %v1418_v50, %v1397_v34  ;;  %v837_v33 = vmul.f32 %v3945_v48, %v3940_v19  ;;  %v866_v48 = vmul.f32 %v3969_v63, %v3964_v49 }
  0xd4   : > { %v1077_v57 = vadd.f32 %v1069_v10, %v1048_v17  ;;  %v4371_v10 = vld [vmem:[%s2786_s16 + $0xb0] sm:$0xff]  ;;  %v1215_v17 = vmul.f32 %v4220_v42, %v4173_v45  ;;  %v1244_v63 = vmul.f32 %v4241_v44, %v4194_v27 }
  0xd5   : > { %v758_v16 = vadd.f32 %v750_v39, %v728_v24  ;;  %v1455_v1 = vadd.f32 %v1447_v56, %v1426_v60  ;;  %v1564_v34 = vmul.f32 %v4142_v41, %v4371_v10 }
  0xd6   : > { %v1106_v13 = vadd.f32 %v1098_v61, %v1077_v57  ;;  %v4380_v61 = vld [vmem:[%s2786_s16 + $0xb1] sm:$0xff] }
  0xd7   : > { %v787_v4 = vadd.f32 %v779_v43, %v758_v16  ;;  %v1484_v47 = vadd.f32 %v1476_v15, %v1455_v1  ;;  %v895_v43 = vmul.f32 %v3993_v3, %v3988_v28  ;;  %v1593_v15 = vmul.f32 %v4166_v58, %v4380_v61  ;;  %v2509_v57 = vld [vmem:[%s2786_s16 + $0xb2] sm:$0xff] }
  0xd8   : > { %v1135_v50 = vadd.f32 %v1127_v37, %v1106_v13  ;;  %v924_v16 = vmul.f32 %v4017_v54, %v4012_v25  ;;  %v4989_v1 = vld [vmem:[#allocation56_spill] sm:$0xff]  ;;  %v4990_v28 = vld [vmem:[#allocation25_spill] sm:$0xff]  ;;  %v1302_v25 = vmul.f32 %v4280_v8, %v4236_v46 }
  0xd9   : > { %v816_v35 = vadd.f32 %v808_v11, %v787_v4  ;;  %v1513_v39 = vadd.f32 %v1505_v9, %v1484_v47  ;;  %v1622_v9 = vmul.f32 %v4989_v1, %v2509_v57  ;;  %v1273_v3 = vmul.f32 %v4990_v28, %v4215_v29  ;;  %v2527_v54 = vld [vmem:[%s2786_s16 + $0xb4] sm:$0xff] }
  0xda   : > { %v1165_v56 = vadd.f32 %v1157_v38, %v1135_v50  ;;  %v2518_v38 = vld [vmem:[%s2786_s16 + $0xb3] sm:$0xff] }
  0xdb   : > { %v845_v24 = vadd.f32 %v837_v33, %v816_v35  ;;  %v1542_v60 = vadd.f32 %v1534_v36, %v1513_v39  ;;  %v954_v33 = vmul.f32 %v4038_v30, %v4133_v6  ;;  %v4991_v36 = vld [vmem:[#allocation24_spill] sm:$0xff]  ;;  %v1331_v30 = vmul.f32 %v4291_v23, %v4257_v2 }
  0xdc   : > { %v1194_v49 = vadd.f32 %v1186_v31, %v1165_v56  ;;  %v1651_v50 = vmul.f32 %v4991_v36, %v2518_v38  ;;  %v2536_v6 = vld [vmem:[%s2786_s16 + $0xb5] sm:$0xff] }
  0xdd   : > { %v874_v37 = vadd.f32 %v866_v48, %v845_v24  ;;  %v1572_v11 = vadd.f32 %v1564_v34, %v1542_v60  ;;  %v983_v48 = vmul.f32 %v4057_v12, %v4152_v32  ;;  %v4992_v34 = vld [vmem:[#allocation48_spill] sm:$0xff] }
  0xde   : > { %v1223_v13 = vadd.f32 %v1215_v17, %v1194_v49  ;;  %v1680_v56 = vmul.f32 %v4992_v34, %v2527_v54  ;;  %v2545_v12 = vld [vmem:[%s2786_s16 + $0xb6] sm:$0xff] }
  0xdf   : > { %v903_v4 = vadd.f32 %v895_v43, %v874_v37  ;;  %v1601_v47 = vadd.f32 %v1593_v15, %v1572_v11  ;;  %v1012_v43 = vmul.f32 %v4081_v55, %v4173_v45  ;;  %v4993_v15 = vld [vmem:[#allocation61_spill] sm:$0xff]  ;;  %v1361_v37 = vmul.f32 %v4302_v59, %v4371_v10 }
  0xe0   : > { %v1252_v31 = vadd.f32 %v1244_v63, %v1223_v13  ;;  %v1709_v49 = vmul.f32 %v4993_v15, %v2536_v6  ;;  %v1070_v45 = vmul.f32 %v4986_v5, %v4215_v29  ;;  %v1477_v5 = vmul.f32 %v4342_v0, %v2527_v54 }
  0xe1   : > { %v932_v35 = vadd.f32 %v924_v16, %v903_v4  ;;  %v1630_v39 = vadd.f32 %v1622_v9, %v1601_v47  ;;  %v1041_v16 = vmul.f32 %v4096_v52, %v4194_v27  ;;  %v1738_v9 = vmul.f32 %v4271_v18, %v2545_v12 }
  0xe2   : > { %v1281_v17 = vadd.f32 %v1273_v3, %v1252_v31  ;;  %v1390_v3 = vmul.f32 %v4314_v21, %v4380_v61  ;;  %v1419_v47 = vmul.f32 %v4325_v40, %v2509_v57  ;;  %v1099_v31 = vmul.f32 %v4988_v53, %v4236_v46 }
  0xe3   : > { %v962_v24 = vadd.f32 %v954_v33, %v932_v35  ;;  %v1659_v60 = vadd.f32 %v1651_v50, %v1630_v39  ;;  %v1448_v35 = vmul.f32 %v4987_v22, %v2518_v38  ;;  %v1128_v39 = vmul.f32 %v4157_v14, %v4257_v2 }
  0xe4   : > { %v1310_v63 = vadd.f32 %v1302_v25, %v1281_v17  ;;  %v1158_v46 = vmul.f32 %v4178_v62, %v4371_v10  ;;  %v1535_v2 = vmul.f32 %v4364_v20, %v2545_v12  ;;  %v2501_v62 = vld [vmem:[%s2786_s16 + $0xc1] sm:$0xff] }
  0xe5   : > { %v991_v32 = vadd.f32 %v983_v48, %v962_v24  ;;  %v1688_v11 = vadd.f32 %v1680_v56, %v1659_v60  ;;  %v2492_v60 = vld [vmem:[%s2786_s16 + $0xc0] sm:$0xff] }
  0xe6   : > { %v1339_v13 = vadd.f32 %v1331_v30, %v1310_v63  ;;  %v1506_v30 = vmul.f32 %v4353_v51, %v2536_v6  ;;  %v1216_v63 = vmul.f32 %v4220_v42, %v2509_v57  ;;  %v2519_v42 = vld [vmem:[%s2786_s16 + $0xc3] sm:$0xff] }
  0xe7   : > { %v1020_v55 = vadd.f32 %v1012_v43, %v991_v32  ;;  %v1717_v4 = vadd.f32 %v1709_v49, %v1688_v11  ;;  %v1187_v43 = vmul.f32 %v4199_v7, %v4380_v61  ;;  %v1565_v32 = vmul.f32 %v4142_v41, %v2492_v60  ;;  %v2510_v7 = vld [vmem:[%s2786_s16 + $0xc2] sm:$0xff] }
  0xe8   : > { %v1369_v33 = vadd.f32 %v1361_v37, %v1339_v13  ;;  %v1274_v13 = vmul.f32 %v4990_v28, %v2527_v54  ;;  %v1362_v54 = vmul.f32 %v4302_v59, %v2492_v60  ;;  %v1449_v59 = vmul.f32 %v4987_v22, %v2519_v42 }
  0xe9   : > { %v1049_v50 = vadd.f32 %v1041_v16, %v1020_v55  ;;  %v1746_v52 = vadd.f32 %v1738_v9, %v1717_v4  ;;  %v1245_v16 = vmul.f32 %v4241_v44, %v2518_v38  ;;  %v1594_v9 = vmul.f32 %v4166_v58, %v2501_v62  ;;  %v2528_v44 = vld [vmem:[%s2786_s16 + $0xc4] sm:$0xff] }
  0xea   : > { %v1398_v25 = vadd.f32 %v1390_v3, %v1369_v33  ;;  %v1623_v55 = vmul.f32 %v4989_v1, %v2510_v7  ;;  %v1652_v33 = vmul.f32 %v4991_v36, %v2519_v42  ;;  %v2710_v42 = vmov 0.0  }
  0xeb   : > { %v1078_v48 = vadd.f32 %v1070_v45, %v1049_v50  ;;  %v1765_v56 = vsel %vm1749_vm0, %v1746_v52, 0.0  ;;  %v1303_v45 = vmul.f32 %v4280_v8, %v2536_v6  ;;  %v2537_v52 = vld [vmem:[%s2786_s16 + $0xc5] sm:$0xff]  ;;  %v1391_v8 = vmul.f32 %v4314_v21, %v2501_v62  ;;  %2583 = vmatprep.subr.mxu1 %v2710_v42  ;;  %2576 = vmatprep.subr.mxu0 %v2710_v42 }
  0xec   : > { %v1427_v29 = vadd.f32 %v1419_v47, %v1398_v25  ;;  %1766 = vadd.xlane.f32.xlu1 %v1765_v56  ;;  %v1332_v47 = vmul.f32 %v4291_v23, %v2545_v12  ;;  %v1420_v12 = vmul.f32 %v4325_v40, %v2510_v7  ;;  %v2547_v7 = vld [vmem:[%s2786_s16 + $0xd6] sm:$0xff]  ;;  %2580 = vmatprep.mubr.msk.f32.mxu0 %vm2711_vm2, %v2710_v42 }
  0xed   : > { %v1107_v17 = vadd.f32 %v1099_v31, %v1078_v48  ;;  %v1681_v31 = vmul.f32 %v4992_v34, %v2528_v44  ;;  %v2546_v48 = vld [vmem:[%s2786_s16 + $0xc6] sm:$0xff]  ;;  %2591 = vmatprep.mubr.msk.f32.mxu1 %vm2711_vm2, %v2710_v42 }
  0xee   : > { %v1456_v53 = vadd.f32 %v1448_v35, %v1427_v29  ;;  %v1710_v35 = vmul.f32 %v4993_v15, %v2537_v52  ;;  %v1739_v56 = vmul.f32 %v4271_v18, %v2546_v48 }
  0xef   : > { %v1136_v24 = vadd.f32 %v1128_v39, %v1107_v17 }
  0xf0   : > { %v1485_v14 = vadd.f32 %v1477_v5, %v1456_v53  ;;  %v1478_v53 = vmul.f32 %v4342_v0, %v2528_v44 }
  0xf1   : > { %v1166_v49 = vadd.f32 %v1158_v46, %v1136_v24  ;;  %v1507_v24 = vmul.f32 %v4353_v51, %v2537_v52 }
  0xf2   : > { %v1514_v37 = vadd.f32 %v1506_v30, %v1485_v14  ;;  %v1536_v14 = vmul.f32 %v4364_v20, %v2546_v48 }
  0xf3   : > { %v1195_v10 = vadd.f32 %v1187_v43, %v1166_v49  ;;  %v2493_v43 = vld [vmem:[%s2786_s16 + $0xd0] sm:$0xff] }
  0xf4   : > { %v1543_v11 = vadd.f32 %v1535_v2, %v1514_v37  ;;  %v2502_v2 = vld [vmem:[%s2786_s16 + $0xd1] sm:$0xff]  ;;  %v1566_v60 = vmul.f32 %v4142_v41, %v2493_v43 }
  0xf5   : > { %v1224_v61 = vadd.f32 %v1216_v63, %v1195_v10  ;;  %v2511_v49 = vld [vmem:[%s2786_s16 + $0xd2] sm:$0xff]  ;;  %v1595_v0 = vmul.f32 %v4166_v58, %v2502_v2  ;;  %v1740_v58 = vmul.f32 %v4271_v18, %v2547_v7 }
  0xf6   : > { %v1573_v3 = vadd.f32 %v1565_v32, %v1543_v11  ;;  %v2520_v37 = vld [vmem:[%s2786_s16 + $0xd3] sm:$0xff]  ;;  %v1624_v62 = vmul.f32 %v4989_v1, %v2511_v49 }
  0xf7   : > { %v1253_v57 = vadd.f32 %v1245_v16, %v1224_v61  ;;  %v2529_v10 = vld [vmem:[%s2786_s16 + $0xd4] sm:$0xff]  ;;  %v1653_v16 = vmul.f32 %v4991_v36, %v2520_v37 }
  0xf8   : > { %v1602_v4 = vadd.f32 %v1594_v9, %v1573_v3  ;;  %v2538_v11 = vld [vmem:[%s2786_s16 + $0xd5] sm:$0xff]  ;;  %v1682_v9 = vmul.f32 %v4992_v34, %v2529_v10  ;;  %v1868_v34 = vld [vmem:[%s4561_s4 + $0x8] sm:$0xff] }
  0xf9   : > { %v1282_v38 = vadd.f32 %v1274_v13, %v1253_v57  ;;  %v1711_v41 = vmul.f32 %v4993_v15, %v2538_v11  ;;  %v1866_v36 = vld [vmem:[%s4560_s3 + $0x18] sm:$0xff]  ;;  %v1865_v18 = vld [vmem:[%s4560_s3 + $0x10] sm:$0xff]  ;;  %v1867_v15 = vld [vmem:[%s4561_s4] sm:$0xff]  ;;  %2577 = vmatpush3.msra.mxu0 %v1868_v34 }
  0xfa   : > { %v1631_v50 = vadd.f32 %v1623_v55, %v1602_v4  ;;  %2584 = vmatpush3.msra.mxu1 %v1866_v36  ;;  %v1851_v57 = vld [vmem:[%s318_s30] sm:$0xff]  ;;  %2578 = vmatprep.subr.mxu0 %v2710_v42  ;;  %v1864_v4 = vld [vmem:[%s4560_s3 + $0x8] sm:$0xff] }
  0xfb   : > { %v1311_v28 = vadd.f32 %v1303_v45, %v1282_v38  ;;  %v1852_v45 = vld [vmem:[%s318_s30 + $0x8] sm:$0xff]  ;;  %2585 = vmatprep.subr.mxu1 %v2710_v42  ;;  %2579 = vmatpush3.msra.mxu0 %v1867_v15 }
  0xfc   : > { %v1660_v25 = vadd.f32 %v1652_v33, %v1631_v50  ;;  %v1854_v33 = vsel %vm1853_vm1, %v1851_v57, 0.0  ;;  %v1855_v44 = vsel %vm1853_vm1, %v1852_v45, 0.0  ;;  %2586 = vmatpush3.msra.mxu1 %v1865_v18  ;;  %2594 = vmatprep.subr.mxu0 %v2710_v42  ;;  %v2700_v36 = vld [vmem:[%s2786_s16 + $0x63] sm:$0xff] }
  0xfd   : > { %v1340_v39 = vadd.f32 %v1332_v47, %v1311_v28  ;;  %v1856_v38 = vadd.f32 %v1855_v44, %v1854_v33  ;;  %2587 = vmatprep.subr.mxu1 %v2710_v42  ;;  %v1863_v47 = vld [vmem:[%s4560_s3] sm:$0xff]  ;;  %v2701_v33 = vld [vmem:[%s2786_s16 + $0x73] sm:$0xff] }
  0xfe   : > { %v1689_v6 = vadd.f32 %v1681_v31, %v1660_v25  ;;  %2588 = vmatpush3.msra.mxu1 %v1864_v4 }
  0xff   : > { %v1370_v23 = vadd.f32 %v1362_v54, %v1340_v39  ;;  %v1857_v50 = vrot.slane %v1856_v38, 4  ;;  %2589 = vmatprep.subr.mxu1 %v2710_v42 }
 0x100   : > { %v1718_v29 = vadd.f32 %v1710_v35, %v1689_v6  ;;  %2590 = vmatpush3.msra.mxu1 %v1863_v47 }
 0x101   : > { %v1399_v5 = vadd.f32 %v1391_v8, %v1370_v23  ;;  %v1858_v31 = vadd.f32 %v1857_v50, %v1856_v38 }
 0x102   : > { %v1747_v17 = vadd.f32 %v1739_v56, %v1718_v29 }
 0x103   : > { %v1428_v46 = vadd.f32 %v1420_v12, %v1399_v5  ;;  %v1859_v52 = vrot.slane %v1858_v31, 2 }
 0x104   : > { %v1768_v30 = vsel %vm1749_vm0, %v1747_v17, 0.0 }
 0x105   : > { %1769 = vadd.xlane.f32.xlu0 %v1768_v30  ;;  %v1457_v21 = vadd.f32 %v1449_v59, %v1428_v46  ;;  %v1860_v28 = vadd.f32 %v1859_v52, %v1858_v31 }
 0x107   : > { %v1486_v40 = vadd.f32 %v1478_v53, %v1457_v21  ;;  %v1861_v54 = vrot.slane %v1860_v28, 1 }
 0x109   : > { %v1515_v22 = vadd.f32 %v1507_v24, %v1486_v40  ;;  %v1862_v25 = vadd.f32 %v1861_v54, %v1860_v28 }
 0x10b   : > { %v1544_v63 = vadd.f32 %v1536_v14, %v1515_v22  ;;  %2581 = vmatmul.mubr.msk.f32.vlgmr.msra.gmra.mxu0 %vm1853_vm1, %v1862_v25 }
 0x10c   : > { %2602 = vmatprep.mubr.msk.f32.mxu0 %vm2711_vm2, %v2710_v42  ;;  %v1752_v35 = vpop.xlane.xlu0 %1751 }
 0x10d   : > { %v1574_v32 = vadd.f32 %v1566_v60, %v1544_v63  ;;  %v2549_v6 = vmul.f32 -1.442695, %v1752_v35 }
 0x10f   : > { %v1603_v51 = vadd.f32 %v1595_v0, %v1574_v32 }
 0x111   : > { %v1632_v20 = vadd.f32 %v1624_v62, %v1603_v51 }
 0x112   : > { %v1758_v39 = vpop.xlane.xlu1 %1757 }
 0x113   : > { %v1661_v61 = vadd.f32 %v1653_v16, %v1632_v20  ;;  %v2551_v23 = vmul.f32 -1.442695, %v1758_v39  ;;  %v2697_v16 = vld [vmem:[%s2786_s16 + $0x43] sm:$0xff] }
 0x115   : > { %v1690_v13 = vadd.f32 %v1682_v9, %v1661_v61  ;;  %v2698_v9 = vld [vmem:[%s2786_s16 + $0x33] sm:$0xff] }
 0x117   : > { %v1719_v3 = vadd.f32 %v1711_v41, %v1690_v13 }
 0x119   : > { %v1748_v55 = vadd.f32 %v1740_v58, %v1719_v3  ;;  %v2699_v3 = vld [vmem:[%s2786_s16 + $0x53] sm:$0xff] }
 0x11b   : > { %v1771_v1 = vsel %vm1749_vm0, %v1748_v55, 0.0 }
 0x11c   : > { %1772 = vadd.xlane.f32.xlu1 %v1771_v1 }
 0x12b   : > { %v1755_v48 = vpop.xlane.xlu0 %1754 }
 0x12c   : > { %v2550_v8 = vmul.f32 -1.442695, %v1755_v48 }
 0x12e   : > { %2616 = vpow2.f32 %v2550_v8 }
 0x12f   : > { %2618 = vpow2.f32 %v2549_v6 }
 0x130   : > { %2620 = vpow2.f32 %v2551_v23 }
 0x13b   : > { %v2617_v17 = vpop.eup %2616 }
 0x13c   : > { %v2619_v30 = vpop.eup %2618  ;;  %v1799_v21 = vadd.f32 1.0, %v2617_v17 }
 0x13d   : > { %v1798_v43 = vadd.f32 1.0, %v2619_v30  ;;  %v2621_v40 = vpop.eup %2620  ;;  %v2021_v30 = vld [vmem:[%s4563_s6 + $0x18] sm:$0xff] }
 0x13e   : > { %v1761_v56 = vpop.xlane.xlu1 %1760  ;;  %v1800_v2 = vadd.f32 1.0, %v2621_v40  ;;  %2595 = vmatpush3.msra.mxu0 %v2021_v30  ;;  %v2015_v40 = vld [vmem:[%s4562_s5] sm:$0x1] }
 0x13f   : > { %v2552_v12 = vmul.f32 -1.442695, %v1761_v56  ;;  %2596 = vmatprep.subr.mxu0 %v2710_v42 }
 0x141   : > { %2622 = vpow2.f32 %v2552_v12 }
 0x14e   : > { %v2623_v14 = vpop.eup %2622 }
 0x14f   : > { %v1801_v22 = vadd.f32 1.0, %v2623_v14 }
 0x158   : > { %v1764_v29 = vpop.xlane.xlu0 %1763 }
 0x159   : > { %v2553_v5 = vmul.f32 -1.442695, %v1764_v29 }
 0x15b   : > { %2624 = vpow2.f32 %v2553_v5 }
 0x168   : > { %v2625_v60 = vpop.eup %2624 }
 0x169   : > { %v1802_v49 = vadd.f32 1.0, %v2625_v60 }
 0x175   : > { %v1767_v59 = vpop.xlane.xlu1 %1766 }
 0x176   : > { %v2554_v46 = vmul.f32 -1.442695, %v1767_v59 }
 0x178   : > { %2626 = vpow2.f32 %v2554_v46 }
 0x179   : > { %2628 = vrcp.f32 %v1799_v21  ;;  %v2019_v21 = vld [vmem:[%s4563_s6 + $0x8] sm:$0xff] }
 0x185   : > { %v2627_v63 = vpop.eup %2626 }
 0x186   : > { %v2629_v37 = vpop.eup %2628  ;;  %v1803_v32 = vadd.f32 1.0, %v2627_v63 }
 0x187   : > { %v1823_v11 = vmul.f32 %v2697_v16, %v2629_v37 }
 0x189   : > { %v1831_v41 = vsel %vm1749_vm0, %v1823_v11, 0.0 }
 0x18e   : > { %v1770_v53 = vpop.xlane.xlu0 %1769 }
 0x18f   : > { %v2555_v24 = vmul.f32 -1.442695, %v1770_v53 }
 0x191   : > { %2630 = vpow2.f32 %v2555_v24  ;;  %v2018_v24 = vld [vmem:[%s4563_s6] sm:$0xff] }
 0x192   : > { %2632 = vrcp.f32 %v1798_v43 }
 0x193   : > { %2634 = vrcp.f32 %v1800_v2 }
 0x194   : > { %2636 = vrcp.f32 %v1801_v22 }
 0x195   : > { %2638 = vrcp.f32 %v1802_v49 }
 0x19e   : > { %v2631_v10 = vpop.eup %2630 }
 0x19f   : > { %v2633_v51 = vpop.eup %2632  ;;  %v1804_v20 = vadd.f32 1.0, %v2631_v10 }
 0x1a0   : > { %v1822_v7 = vmul.f32 %v2698_v9, %v2633_v51  ;;  %v2635_v61 = vpop.eup %2634 }
 0x1a1   : > { %v2637_v13 = vpop.eup %2636  ;;  %v1824_v55 = vmul.f32 %v2699_v3, %v2635_v61 }
 0x1a2   : > { %v1830_v58 = vsel %vm1749_vm0, %v1822_v7, 0.0  ;;  %v1825_v34 = vmul.f32 %v2700_v36, %v2637_v13  ;;  %v2639_v18 = vpop.eup %2638 }
 0x1a3   : > { %v1832_v1 = vadd.f32 %v1831_v41, %v1830_v58  ;;  %v1833_v15 = vsel %vm1749_vm0, %v1824_v55, 0.0  ;;  %v1826_v44 = vmul.f32 %v2701_v33, %v2639_v18 }
 0x1a4   : > { %v1835_v4 = vsel %vm1749_vm0, %v1825_v34, 0.0 }
 0x1a5   : > { %v1773_v0 = vpop.xlane.xlu1 %1772  ;;  %v1834_v45 = vadd.f32 %v1833_v15, %v1832_v1  ;;  %v1837_v52 = vsel %vm1749_vm0, %v1826_v44, 0.0 }
 0x1a6   : > { %v2556_v62 = vmul.f32 -1.442695, %v1773_v0 }
 0x1a7   : > { %v1836_v50 = vadd.f32 %v1835_v4, %v1834_v45 }
 0x1a8   : > { %2640 = vpow2.f32 %v2556_v62 }
 0x1a9   : > { %2642 = vrcp.f32 %v1803_v32  ;;  %v1838_v54 = vadd.f32 %v1837_v52, %v1836_v50 }
 0x1aa   : > { %2644 = vrcp.f32 %v1804_v20 }
 0x1b5   : > { %v2641_v57 = vpop.eup %2640 }
 0x1b6   : > { %v1805_v38 = vadd.f32 1.0, %v2641_v57  ;;  %v2643_v47 = vpop.eup %2642 }
 0x1b7   : > { %v1827_v31 = vmul.f32 %v2643_v47, %v4091_v26  ;;  %v2645_v28 = vpop.eup %2644 }
 0x1b8   : > { %2646 = vrcp.f32 %v1805_v38  ;;  %v1828_v25 = vmul.f32 %v2645_v28, %v3940_v19 }
 0x1b9   : > { %v1839_v35 = vsel %vm1749_vm0, %v1827_v31, 0.0 }
 0x1ba   : > { %v1840_v48 = vadd.f32 %v1839_v35, %v1838_v54  ;;  %v1841_v39 = vsel %vm1749_vm0, %v1828_v25, 0.0 }
 0x1bc   : > { %v1842_v6 = vadd.f32 %v1841_v39, %v1840_v48 }
 0x1c5   : > { %v2647_v8 = vpop.eup %2646 }
 0x1c6   : > { %v1829_v56 = vmul.f32 %v2647_v8, %v4194_v27  ;;  %v2020_v27 = vld [vmem:[%s4563_s6 + $0x10] sm:$0xff] }
 0x1c7   : > { %2597 = vmatpush3.msra.mxu0 %v2020_v27 }
 0x1c8   : > { %v1843_v23 = vsel %vm1749_vm0, %v1829_v56, 0.0  ;;  %2598 = vmatprep.subr.mxu0 %v2710_v42 }
 0x1c9   : > { %v1844_v12 = vadd.f32 %v1843_v23, %v1842_v6  ;;  %2599 = vmatpush3.msra.mxu0 %v2019_v21 }
 0x1ca   : > { %2600 = vmatprep.subr.mxu0 %v2710_v42  ;;  %v2022_v42 = vld [vmem:[%s4564_s7] sm:$0x1] }
 0x1cb   : > { %v1845_v29 = vrot.slane %v1844_v12, 4  ;;  %v1938_v19 = vpop.f32.mrf.mxu0  ;;  %2601 = vmatpush3.msra.mxu0 %v2018_v24 }
 0x1cd   : > { %v1846_v26 = vadd.f32 %v1845_v29, %v1844_v12  ;;  %v2582_v53 = vpop.f32.mrf.mxu0 }
 0x1cf   : > { %v1847_v5 = vrot.slane %v1846_v26, 2 }
 0x1d1   : > { %v1848_v59 = vadd.f32 %v1847_v5, %v1846_v26 }
 0x1d3   : > { %v1849_v17 = vrot.slane %v1848_v59, 1 }
 0x1d5   : > { %v1850_v46 = vadd.f32 %v1849_v17, %v1848_v59 }
 0x1d7   : > { %2592 = vmatmul.mubr.msk.f32.vlgmr.msra.gmra.mxu1 %vm1749_vm0, %v1850_v46 }
 0x297   : > { %v2011_v43 = vpop.f32.mrf.mxu1 }
 0x298   : > { %v2012_v14 = vadd.f32 %v2011_v43, %v1938_v19 }
 0x299   : > { %v2593_v2 = vpop.f32.mrf.mxu1 }
 0x29a   : > { %v2016_v22 = vadd.f32 %v2015_v40, %v2012_v14 }
 0x29c   : > { %v2017_v60 = vmax.f32 %v2016_v22, 0.0 }
 0x29e   : > { %2603 = vmatmul.mubr.msk.f32.vlgmr.msra.gmra.mxu0 %vm1749_vm0, %v2017_v60 }
 0x35e   : > { %v2092_v49 = vpop.f32.mrf.mxu0 }
 0x35f   : > { %v2093_v63 = vadd.f32 %v2092_v49, %v2022_v42 }
 0x360   : > { %v2604_v0 = vpop.f32.mrf.mxu0 }
 0x361   : > { %2096 = vst [vmem:[%s321_s29] sm:$0x1] %v2093_v63 }
 0x362 PF: > { %s18_s27 = sadd.s32 1, %s2708_s27  }
 0x363   : > { %p15_p4 = scmp.ge.s32.totalorder %s18_s27, 4  }
 0x365   :  { %17 = sbr.rel (!%p15_p4) target bundleno = 1 (0x1), region = 91 }

</bundles_post_ra>
